<compile_context>
chip_gen: v7x
topology: tpu7x:2x2x1
jax: 0.10.0
libtpu: 0.0.40
codegen_flags: <defaults>
</compile_context>

<pallas_src>
import functools
import math

import jax
import jax.numpy as jnp
from jax.experimental import pallas as pl
from jax.experimental.pallas import tpu as pltpu

HEAD_WIDTH = 128           # lane-dense padded width of the fused dueling head
W1_RESIDENT_BYTES = 16 << 20   # keep w1 fully VMEM-resident only below this (bf16 bytes)
K_CHUNK = 2048             # fc1 contraction chunk when streaming w1


def _w1_layout(d_in):
    """Returns (padded D_in, K tile) for the fc1 contraction."""
    if 2 * d_in * 1024 <= W1_RESIDENT_BYTES:
        return d_in, d_in                      # single K step, w1 resident
    d_pad = -(-d_in // K_CHUNK) * K_CHUNK      # stream w1 in K_CHUNK rows
    return d_pad, K_CHUNK


def dueling_mlp_kernel(
    x_ref,              # (TM, TK)     input dtype (cast to bf16 in-kernel)
    w1_ref,             # (TK, 1024)   bf16
    b1_ref,             # (1, 1024)    f32
    w2_ref, b2_ref,     # (1024, 512)  bf16, (1, 512) f32
    wbr_ref, bbr_ref,   # (512, 512)   bf16, (1, 512) f32   fused [fc_value | fc_advantage]
    wq_ref, bq_ref,     # (512, 128)   bf16, (1, 128) f32   fused head, dueling combine folded in
    q_ref,              # (TM, 128)    f32 output (cols >= A are exact zeros)
    acc_ref,            # (TM, 1024)   f32 scratch: fc1 accumulator across K steps
):
    f32 = jnp.float32
    bf16 = jnp.bfloat16
    k = pl.program_id(1)

    @pl.when(k == 0)
    def _():
        acc_ref[...] = jnp.zeros_like(acc_ref)

    # fc1 partial contraction (K-streamed when D_in is large)
    acc_ref[...] += jnp.dot(
        x_ref[...].astype(bf16), w1_ref[...], preferred_element_type=f32)

    @pl.when(k == pl.num_programs(1) - 1)
    def _():
        # fc1 bias + relu
        h1 = jnp.maximum(acc_ref[...] + b1_ref[...], 0.0).astype(bf16)
        # fc2 + relu
        h2 = jnp.dot(h1, w2_ref[...], preferred_element_type=f32) + b2_ref[...]
        h2 = jnp.maximum(h2, 0.0).astype(bf16)
        # fused value/advantage hidden layer: cols [:256] = hv, cols [256:] = ha
        hb = jnp.dot(h2, wbr_ref[...], preferred_element_type=f32) + bbr_ref[...]
        hb = jnp.maximum(hb, 0.0).astype(bf16)
        # fused head with dueling combine folded into the weights:
        # q[:, a] = hv @ wvo + bvo + ha @ (wao[:,a] - mean_a(wao)) + (bao[a] - mean(bao))
        q_ref[...] = (jnp.dot(hb, wq_ref[...], preferred_element_type=f32)
                      + bq_ref[...]).astype(q_ref.dtype)


def _resident(shape):
    # Whole array as one VMEM-resident block; constant index_map across the grid,
    # single-buffered (never re-fetched, so double-buffering would just waste VMEM).
    return pl.BlockSpec(shape, lambda i, k: (0,) * len(shape),
                        pipeline_mode=pl.Buffered(1))


def prepare_params(params):
    """One-time conversion of f32 (in, out)-layout weights into kernel-ready arrays.

    Call once at model-load time (NOT per forward): casts to bf16, fuses
    fc_value/fc_advantage into one (512, 512) matmul, and folds the dueling
    combine (value broadcast + advantage mean-subtraction) into a single
    lane-dense (512, 128) head matmul whose padded columns are exact zeros.
    """
    (w1, b1, w2, b2, wv, bv, wa, ba, wvo, bvo, wao, bao) = params
    bf16, f32 = jnp.bfloat16, jnp.float32

    d_in = w1.shape[0]
    num_actions = wao.shape[1]
    if num_actions > HEAD_WIDTH:
        # TODO(synk): tile the fused head for num_actions > 128
        raise NotImplementedError("fused dueling head supports num_actions <= 128")

    d_pad, _ = _w1_layout(d_in)
    w1p = w1.astype(f32)
    if d_pad != d_in:
        # zero rows: padded x columns contribute nothing to the contraction
        w1p = jnp.pad(w1p, ((0, d_pad - d_in), (0, 0)))
    w1p = w1p.astype(bf16)

    w_branch = jnp.concatenate([wv, wa], axis=1).astype(bf16)    # (512, 512)
    b_branch = jnp.concatenate([bv, ba], axis=1).astype(f32)     # (1, 512)

    # Dueling combine folded into the head: q is linear in [hv | ha].
    wao_c = wao - jnp.mean(wao, axis=1, keepdims=True)           # (256, A)
    bao_c = bao - jnp.mean(bao, axis=1, keepdims=True)           # (1, A)
    w_q = jnp.zeros((512, HEAD_WIDTH), f32)
    w_q = w_q.at[:256, :num_actions].set(jnp.broadcast_to(wvo, (256, num_actions)))
    w_q = w_q.at[256:, :num_actions].set(wao_c)
    b_q = jnp.zeros((1, HEAD_WIDTH), f32)
    b_q = b_q.at[0, :num_actions].set(bao_c[0] + bvo[0, 0])

    return (w1p, b1.astype(f32), w2.astype(bf16), b2.astype(f32),
            w_branch, b_branch, w_q.astype(bf16), b_q)


@functools.partial(jax.jit, static_argnames=("output_shape",))
def dueling_q_forward(x, prepared, output_shape):
    """Forward pass. `prepared` must come from prepare_params()."""
    (w1p, b1p, w2p, b2p, wbrp, bbrp, wqp, bqp) = prepared
    f32 = jnp.float32

    B = x.shape[0]
    x_flat = x.reshape(B, -1)
    D_in = x_flat.shape[1]
    A = int(math.prod(output_shape))
    if A > HEAD_WIDTH:
        # TODO(synk): tile the fused head for num_actions > 128
        raise NotImplementedError("fused dueling head supports num_actions <= 128")

    D_pad, TK = _w1_layout(D_in)
    if w1p.shape[0] != D_pad:
        raise ValueError("params were not prepared for this input size; "
                         "re-run prepare_params()")
    if D_pad != D_in:
        # streaming path only: pad the contraction dim so every K chunk is full
        # (padded w1 rows are zero, so extra columns contribute nothing)
        x_flat = jnp.pad(x_flat, ((0, 0), (0, D_pad - D_in)))

    # Batch tile: 256 amortizes the 256-wide MXU on v6e/v7x; ragged last tile is
    # masked by Pallas (OOB input rows are row-local garbage, dropped on store).
    if B >= 256:
        TM = 256
    elif B >= 128:
        TM = 128
    else:
        TM = max(8, -(-B // 8) * 8)
    num_m = pl.cdiv(B, TM)
    num_k = D_pad // TK

    x_item = x_flat.dtype.itemsize

    in_specs = [
        pl.BlockSpec((TM, TK), lambda i, k: (i, k)),
        pl.BlockSpec((TK, 1024), lambda i, k: (k, 0),
                     pipeline_mode=pl.Buffered(1) if num_k == 1 else pl.Buffered(2)),
        _resident(b1p.shape),
        _resident(w2p.shape), _resident(b2p.shape),
        _resident(wbrp.shape), _resident(bbrp.shape),
        _resident(wqp.shape), _resident(bqp.shape),
    ]

    # VMEM budget derived from the actual buffer footprints (+ headroom for
    # Mosaic internal scratch), capped at v7x's 64 MiB physical VMEM per core.
    resident_bytes = (2 * (1024 * 512 + 512 * 512 + 512 * HEAD_WIDTH)
                      + 4 * (1024 + 512 + 512 + HEAD_WIDTH))
    w1_buf = (1 if num_k == 1 else 2) * 2 * TK * 1024
    x_buf = 2 * TM * TK * x_item
    out_buf = 2 * TM * HEAD_WIDTH * 4
    acc_buf = TM * 1024 * 4
    interm = 2 * TM * (1024 + 512 + 512 + HEAD_WIDTH) * 4
    vmem_limit = resident_bytes + w1_buf + x_buf + out_buf + acc_buf + interm + (8 << 20)
    vmem_limit = int(min(max(vmem_limit, 24 << 20), 64 << 20))

    flops = 2 * B * (D_in * 1024 + 1024 * 512 + 512 * 512 + 512 * HEAD_WIDTH)
    bytes_accessed = (2 * D_pad * 1024
                      + 2 * (1024 * 512 + 512 * 512 + 512 * HEAD_WIDTH)
                      + 4 * (1024 + 512 + 512 + HEAD_WIDTH)
                      + B * D_pad * x_item + 4 * B * HEAD_WIDTH)

    q_pad = pl.pallas_call(
        dueling_mlp_kernel,
        out_shape=jax.ShapeDtypeStruct((B, HEAD_WIDTH), f32),
        grid=(num_m, num_k),
        in_specs=in_specs,
        out_specs=pl.BlockSpec((TM, HEAD_WIDTH), lambda i, k: (i, 0)),
        scratch_shapes=[pltpu.VMEM((TM, 1024), f32)],
        compiler_params=pltpu.CompilerParams(
            dimension_semantics=("parallel", "arbitrary"),
            vmem_limit_bytes=vmem_limit,
        ),
        cost_estimate=pl.CostEstimate(
            flops=flops, transcendentals=0, bytes_accessed=bytes_accessed),
    )(x_flat, w1p, b1p, w2p, b2p, wbrp, bbrp, wqp, bqp)

    return q_pad[:, :A].reshape((B,) + tuple(output_shape))


def init_params(key, input_dim, num_actions):
    """Deterministic init mirroring the PyTorch module's layer shapes.

    Weights are stored transposed relative to nn.Linear: (in, out).
    Biases are stored as (1, out). All params kept in f32; prepare_params()
    produces the bf16 / fused kernel-ready versions once.
    """
    def linear(key, fan_in, fan_out):
        kw, kb = jax.random.split(key)
        bound = 1.0 / jnp.sqrt(fan_in)
        w = jax.random.uniform(kw, (fan_in, fan_out), jnp.float32, -bound, bound)
        b = jax.random.uniform(kb, (1, fan_out), jnp.float32, -bound, bound)
        return w, b

    keys = jax.random.split(key, 6)
    w1, b1 = linear(keys[0], input_dim, 1024)
    w2, b2 = linear(keys[1], 1024, 512)
    wv, bv = linear(keys[2], 512, 256)
    wa, ba = linear(keys[3], 512, 256)
    wvo, bvo = linear(keys[4], 256, 1)
    wao, bao = linear(keys[5], 256, num_actions)
    return (w1, b1, w2, b2, wv, bv, wa, ba, wvo, bvo, wao, bao)


def reference_forward(x, params, output_shape):
    # Pure-JAX f32 reference matching the PyTorch forward.
    (w1, b1, w2, b2, wv, bv, wa, ba, wvo, bvo, wao, bao) = params
    B = x.shape[0]
    h = x.reshape(B, -1)
    h = jax.nn.relu(h @ w1 + b1)
    h = jax.nn.relu(h @ w2 + b2)
    hv = jax.nn.relu(h @ wv + bv)
    ha = jax.nn.relu(h @ wa + ba)
    value = hv @ wvo + bvo
    adv = ha @ wao + bao
    q = value + (adv - adv.mean(axis=1, keepdims=True))
    return q.reshape((B,) + tuple(output_shape))


if __name__ == "__main__":
    key = jax.random.PRNGKey(0)
    kx, kp = jax.random.split(key)

    # input_shape = (4, 16, 16) -> input_dim = 1024 ; output_shape = (8,) -> 8 actions
    B = 2
    input_shape = (4, 16, 16)
    output_shape = (8,)
    input_dim = int(math.prod(input_shape))
    num_actions = int(math.prod(output_shape))

    x = jax.random.normal(kx, (B,) + input_shape, jnp.float32)
    params = init_params(kp, input_dim, num_actions)

    # One-time weight prep (hoisted out of the per-call forward).
    prepared = prepare_params(params)

    q = dueling_q_forward(x, prepared, output_shape)
    q = jax.block_until_ready(q)

    assert q.shape == (B,) + output_shape, q.shape
    assert jnp.all(jnp.isfinite(q))

    # bf16 weights/activations -> ~1e-2-level deviation from the f32 reference.
    q_ref = reference_forward(x, params, output_shape)
    max_err = float(jnp.max(jnp.abs(q - q_ref)))
    assert max_err < 5e-2, max_err

    print("KERNEL_OK")
</pallas_src>

<mosaic_0001>
module attributes {stable_mosaic.version = 11 : i64} {
  func.func @dueling_mlp_kernel(%arg0: i32, %arg1: i32, %arg2: memref<8x1024xf32, #tpu.memory_space<vmem>>, %arg3: memref<1024x1024xbf16, #tpu.memory_space<vmem>>, %arg4: memref<1x1024xf32, #tpu.memory_space<vmem>>, %arg5: memref<1024x512xbf16, #tpu.memory_space<vmem>>, %arg6: memref<1x512xf32, #tpu.memory_space<vmem>>, %arg7: memref<512x512xbf16, #tpu.memory_space<vmem>>, %arg8: memref<1x512xf32, #tpu.memory_space<vmem>>, %arg9: memref<512x128xbf16, #tpu.memory_space<vmem>>, %arg10: memref<1x128xf32, #tpu.memory_space<vmem>>, %arg11: memref<8x128xf32, #tpu.memory_space<vmem>>, %arg12: memref<8x1024xf32, #tpu.memory_space<vmem>>) attributes {dimension_semantics = [#tpu.dimension_semantics<parallel>, #tpu.dimension_semantics<arbitrary>], iteration_bounds = array<i64: 1, 1>, scalar_prefetch = 0 : i64, scratch_operands = 1 : i64, tpu.core_type = #tpu.core_type<tc>, window_params = [{transform_indices = @transform_0, window_bounds = array<i64: 8, 1024>}, {pipeline_mode = #tpu.pipeline_mode<synchronous>, transform_indices = @transform_1, window_bounds = array<i64: 1024, 1024>}, {pipeline_mode = #tpu.pipeline_mode<synchronous>, transform_indices = @transform_2, window_bounds = array<i64: 1, 1024>}, {pipeline_mode = #tpu.pipeline_mode<synchronous>, transform_indices = @transform_3, window_bounds = array<i64: 1024, 512>}, {pipeline_mode = #tpu.pipeline_mode<synchronous>, transform_indices = @transform_4, window_bounds = array<i64: 1, 512>}, {pipeline_mode = #tpu.pipeline_mode<synchronous>, transform_indices = @transform_5, window_bounds = array<i64: 512, 512>}, {pipeline_mode = #tpu.pipeline_mode<synchronous>, transform_indices = @transform_6, window_bounds = array<i64: 1, 512>}, {pipeline_mode = #tpu.pipeline_mode<synchronous>, transform_indices = @transform_7, window_bounds = array<i64: 512, 128>}, {pipeline_mode = #tpu.pipeline_mode<synchronous>, transform_indices = @transform_8, window_bounds = array<i64: 1, 128>}, {transform_indices = @transform_9, window_bounds = array<i64: 8, 128>}]} {
    %c0_i32 = arith.constant 0 : i32
    %0 = arith.cmpi eq, %arg1, %c0_i32 : i32
    %1 = arith.extui %0 : i1 to i32
    %c0_i32_0 = arith.constant 0 : i32
    %2 = arith.cmpi ne, %1, %c0_i32_0 : i32
    scf.if %2 {
      %cst_10 = arith.constant 0.000000e+00 : f32
      %13 = vector.broadcast %cst_10 : f32 to vector<8x1024xf32>
      %c0_11 = arith.constant 0 : index
      %c0_12 = arith.constant 0 : index
      %14 = vector.load %arg12[%c0_11, %c0_12] : memref<8x1024xf32, #tpu.memory_space<vmem>>, vector<8x1024xf32>
      tpu.vector_store %arg12[%c0_11, %c0_12], %13 {strides = array<i32>} : memref<8x1024xf32, #tpu.memory_space<vmem>>, vector<8x1024xf32>,
    } else {
    }
    %c0 = arith.constant 0 : index
    %c0_1 = arith.constant 0 : index
    %3 = vector.load %arg12[%c0, %c0_1] : memref<8x1024xf32, #tpu.memory_space<vmem>>, vector<8x1024xf32>
    %c0_2 = arith.constant 0 : index
    %c0_3 = arith.constant 0 : index
    %4 = vector.load %arg2[%c0_2, %c0_3] : memref<8x1024xf32, #tpu.memory_space<vmem>>, vector<8x1024xf32>
    %5 = arith.truncf %4 : vector<8x1024xf32> to vector<8x1024xbf16>
    %c0_4 = arith.constant 0 : index
    %c0_5 = arith.constant 0 : index
    %6 = vector.load %arg3[%c0_4, %c0_5] : memref<1024x1024xbf16, #tpu.memory_space<vmem>>, vector<1024x1024xbf16>
    %cst = arith.constant dense<0.000000e+00> : vector<8x1024xf32>
    %7 = tpu.matmul %5, %6, %cst {dimension_numbers = #tpu.dot_dimension_numbers<[1], [0], [0], [1], [0, 0, 1, 1], [], []>} : vector<8x1024xbf16>, vector<1024x1024xbf16>, vector<8x1024xf32> -> vector<8x1024xf32>
    %8 = arith.addf %3, %7 : vector<8x1024xf32>
    %c0_6 = arith.constant 0 : index
    %c0_7 = arith.constant 0 : index
    %9 = vector.load %arg12[%c0_6, %c0_7] : memref<8x1024xf32, #tpu.memory_space<vmem>>, vector<8x1024xf32>
    tpu.vector_store %arg12[%c0_6, %c0_7], %8 {strides = array<i32>} : memref<8x1024xf32, #tpu.memory_space<vmem>>, vector<8x1024xf32>,
    %c0_i32_8 = arith.constant 0 : i32
    %10 = arith.cmpi eq, %arg1, %c0_i32_8 : i32
    %11 = arith.extui %10 : i1 to i32
    %c0_i32_9 = arith.constant 0 : i32
    %12 = arith.cmpi ne, %11, %c0_i32_9 : i32
    scf.if %12 {
      %c0_10 = arith.constant 0 : index
      %c0_11 = arith.constant 0 : index
      %13 = vector.load %arg12[%c0_10, %c0_11] : memref<8x1024xf32, #tpu.memory_space<vmem>>, vector<8x1024xf32>
      %c0_12 = arith.constant 0 : index
      %c0_13 = arith.constant 0 : index
      %14 = vector.load %arg4[%c0_12, %c0_13] : memref<1x1024xf32, #tpu.memory_space<vmem>>, vector<1x1024xf32>
      %15 = vector.broadcast %14 : vector<1x1024xf32> to vector<8x1024xf32>
      %16 = arith.addf %13, %15 : vector<8x1024xf32>
      %cst_14 = arith.constant 0.000000e+00 : f32
      %17 = vector.broadcast %cst_14 : f32 to vector<8x1024xf32>
      %18 = arith.maximumf %16, %17 : vector<8x1024xf32>
      %19 = arith.truncf %18 : vector<8x1024xf32> to vector<8x1024xbf16>
      %c0_15 = arith.constant 0 : index
      %c0_16 = arith.constant 0 : index
      %20 = vector.load %arg5[%c0_15, %c0_16] : memref<1024x512xbf16, #tpu.memory_space<vmem>>, vector<1024x512xbf16>
      %cst_17 = arith.constant dense<0.000000e+00> : vector<8x512xf32>
      %21 = tpu.matmul %19, %20, %cst_17 {dimension_numbers = #tpu.dot_dimension_numbers<[1], [0], [0], [1], [0, 0, 1, 1], [], []>} : vector<8x1024xbf16>, vector<1024x512xbf16>, vector<8x512xf32> -> vector<8x512xf32>
      %c0_18 = arith.constant 0 : index
      %c0_19 = arith.constant 0 : index
      %22 = vector.load %arg6[%c0_18, %c0_19] : memref<1x512xf32, #tpu.memory_space<vmem>>, vector<1x512xf32>
      %23 = vector.broadcast %22 : vector<1x512xf32> to vector<8x512xf32>
      %24 = arith.addf %21, %23 : vector<8x512xf32>
      %cst_20 = arith.constant 0.000000e+00 : f32
      %25 = vector.broadcast %cst_20 : f32 to vector<8x512xf32>
      %26 = arith.maximumf %24, %25 : vector<8x512xf32>
      %27 = arith.truncf %26 : vector<8x512xf32> to vector<8x512xbf16>
      %c0_21 = arith.constant 0 : index
      %c0_22 = arith.constant 0 : index
      %28 = vector.load %arg7[%c0_21, %c0_22] : memref<512x512xbf16, #tpu.memory_space<vmem>>, vector<512x512xbf16>
      %cst_23 = arith.constant dense<0.000000e+00> : vector<8x512xf32>
      %29 = tpu.matmul %27, %28, %cst_23 {dimension_numbers = #tpu.dot_dimension_numbers<[1], [0], [0], [1], [0, 0, 1, 1], [], []>} : vector<8x512xbf16>, vector<512x512xbf16>, vector<8x512xf32> -> vector<8x512xf32>
      %c0_24 = arith.constant 0 : index
      %c0_25 = arith.constant 0 : index
      %30 = vector.load %arg8[%c0_24, %c0_25] : memref<1x512xf32, #tpu.memory_space<vmem>>, vector<1x512xf32>
      %31 = vector.broadcast %30 : vector<1x512xf32> to vector<8x512xf32>
      %32 = arith.addf %29, %31 : vector<8x512xf32>
      %cst_26 = arith.constant 0.000000e+00 : f32
      %33 = vector.broadcast %cst_26 : f32 to vector<8x512xf32>
      %34 = arith.maximumf %32, %33 : vector<8x512xf32>
      %35 = arith.truncf %34 : vector<8x512xf32> to vector<8x512xbf16>
      %c0_27 = arith.constant 0 : index
      %c0_28 = arith.constant 0 : index
      %36 = vector.load %arg9[%c0_27, %c0_28] : memref<512x128xbf16, #tpu.memory_space<vmem>>, vector<512x128xbf16>
      %cst_29 = arith.constant dense<0.000000e+00> : vector<8x128xf32>
      %37 = tpu.matmul %35, %36, %cst_29 {dimension_numbers = #tpu.dot_dimension_numbers<[1], [0], [0], [1], [0, 0, 1, 1], [], []>} : vector<8x512xbf16>, vector<512x128xbf16>, vector<8x128xf32> -> vector<8x128xf32>
      %c0_30 = arith.constant 0 : index
      %c0_31 = arith.constant 0 : index
      %38 = vector.load %arg10[%c0_30, %c0_31] : memref<1x128xf32, #tpu.memory_space<vmem>>, vector<1x128xf32>
      %39 = vector.broadcast %38 : vector<1x128xf32> to vector<8x128xf32>
      %40 = arith.addf %37, %39 : vector<8x128xf32>
      %c0_32 = arith.constant 0 : index
      %c0_33 = arith.constant 0 : index
      %41 = vector.load %arg11[%c0_32, %c0_33] : memref<8x128xf32, #tpu.memory_space<vmem>>, vector<8x128xf32>
      tpu.vector_store %arg11[%c0_32, %c0_33], %40 {strides = array<i32>} : memref<8x128xf32, #tpu.memory_space<vmem>>, vector<8x128xf32>,
    } else {
    }
    return
  }
  func.func @transform_0(%arg0: i32, %arg1: i32) -> (i32, i32) {
    %c0_i32 = arith.constant 0 : i32
    return %arg0, %arg1 : i32, i32
  }
  func.func @transform_1(%arg0: i32, %arg1: i32) -> (i32, i32) {
    %c0_i32 = arith.constant 0 : i32
    %c0_i32_0 = arith.constant 0 : i32
    return %arg1, %c0_i32 : i32, i32
  }
  func.func @transform_2(%arg0: i32, %arg1: i32) -> (i32, i32) {
    %c0_i32 = arith.constant 0 : i32
    %c0_i32_0 = arith.constant 0 : i32
    %c0_i32_1 = arith.constant 0 : i32
    return %c0_i32, %c0_i32_0 : i32, i32
  }
  func.func @transform_3(%arg0: i32, %arg1: i32) -> (i32, i32) {
    %c0_i32 = arith.constant 0 : i32
    %c0_i32_0 = arith.constant 0 : i32
    %c0_i32_1 = arith.constant 0 : i32
    return %c0_i32, %c0_i32_0 : i32, i32
  }
  func.func @transform_4(%arg0: i32, %arg1: i32) -> (i32, i32) {
    %c0_i32 = arith.constant 0 : i32
    %c0_i32_0 = arith.constant 0 : i32
    %c0_i32_1 = arith.constant 0 : i32
    return %c0_i32, %c0_i32_0 : i32, i32
  }
  func.func @transform_5(%arg0: i32, %arg1: i32) -> (i32, i32) {
    %c0_i32 = arith.constant 0 : i32
    %c0_i32_0 = arith.constant 0 : i32
    %c0_i32_1 = arith.constant 0 : i32
    return %c0_i32, %c0_i32_0 : i32, i32
  }
  func.func @transform_6(%arg0: i32, %arg1: i32) -> (i32, i32) {
    %c0_i32 = arith.constant 0 : i32
    %c0_i32_0 = arith.constant 0 : i32
    %c0_i32_1 = arith.constant 0 : i32
    return %c0_i32, %c0_i32_0 : i32, i32
  }
  func.func @transform_7(%arg0: i32, %arg1: i32) -> (i32, i32) {
    %c0_i32 = arith.constant 0 : i32
    %c0_i32_0 = arith.constant 0 : i32
    %c0_i32_1 = arith.constant 0 : i32
    return %c0_i32, %c0_i32_0 : i32, i32
  }
  func.func @transform_8(%arg0: i32, %arg1: i32) -> (i32, i32) {
    %c0_i32 = arith.constant 0 : i32
    %c0_i32_0 = arith.constant 0 : i32
    %c0_i32_1 = arith.constant 0 : i32
    return %c0_i32, %c0_i32_0 : i32, i32
  }
  func.func @transform_9(%arg0: i32, %arg1: i32) -> (i32, i32) {
    %c0_i32 = arith.constant 0 : i32
    %c0_i32_0 = arith.constant 0 : i32
    return %arg0, %c0_i32 : i32, i32
  }
}

</mosaic_0001>

<bundles_post_ra>
// kernel: dueling_q_forward.1
= control target key start
LH: loop header
LB: loop body
LE: loop exit
PB: predicated region body
PF: predicated region fallthrough
CT: control target
= control target key end

     0   :  { %14 = vsyncpa [#allocation4], 0  ;;  %s9558_s0 = inlined_call_operand.vmem [shape: f32[2,1024], index: 0, kind: input, shape index: {}]   ;;  %s9559_s1 = inlined_call_operand.hbm [shape: bf16[1024,1024], index: 1, kind: input, shape index: {}]   ;;  %s9560_s2 = inlined_call_operand.hbm [shape: f32[1,1024], index: 2, kind: input, shape index: {}]   ;;  %s9561_s3 = inlined_call_operand.hbm [shape: bf16[1024,512], index: 3, kind: input, shape index: {}]   ;;  %s9562_s4 = inlined_call_operand.hbm [shape: f32[1,512], index: 4, kind: input, shape index: {}]   ;;  %s9563_s5 = inlined_call_operand.hbm [shape: bf16[512,512], index: 5, kind: input, shape index: {}]   ;;  %s9564_s6 = inlined_call_operand.hbm [shape: f32[1,512], index: 6, kind: input, shape index: {}]   ;;  %s9565_s7 = inlined_call_operand.hbm [shape: bf16[512,128], index: 7, kind: input, shape index: {}]   ;;  %s9566_s8 = inlined_call_operand.hbm [shape: f32[1,128], index: 8, kind: input, shape index: {}]   ;;  %s9567_s9 = inlined_call_operand.hbm [shape: f32[2,128], index: 9, kind: output, shape index: {}]  }
   0x1   :  { %15 = vsyncpa [#allocation7], 0 }
   0x2   :  { %16 = vsyncpa [#allocation10], 0 }
   0x3   :  { %17 = vsyncpa [#allocation13], 0 }
   0x4   :  { %18 = vsyncpa [#allocation16], 0 }
   0x5   :  { %19 = vsyncpa [#allocation5], 0  ;;  %s9162_s30 = smov [#allocation6]   ;;  %s9163_s11 = smov [#allocation9]  }
   0x6   :  { %s40_s10 = sshll.u32 %s9162_s30, 4  ;;  %s62_s12 = sshll.u32 %s9163_s11, 4  ;;  %s41_s10 = int_to_ptr.vmem [resolvable:$true] %s40_s10  ;;  %s63_s12 = int_to_ptr.vmem [resolvable:$true] %s62_s12 }
   0x7   :  { %s8952_s15 = scalar_lea.hbm %s9560_s2, 128 }
   0x8   :  { %p8953_p0 = scmp.ne.s32.totalorder %s9560_s2, %s8952_s15  ;;  %p8956_p1 = scmp.lt.u32.totalorder %s8952_s15, %s9560_s2 }
   0xa   :  { %p8958_p2 = pnand %p8956_p1, %p8953_p0 }
   0xc   :  { %8961 = shalt.err (!%p8958_p2)
}
   0xd   :  { %s8962_s20 = scalar_lea.vmem %s41_s10, 128  ;;  %p8967_p4 = scmp.lt.s32.totalorder %s41_s10, %s41_s10 }
   0xe   :  { %p8963_p3 = scmp.ne.s32.totalorder %s41_s10, %s8962_s20  ;;  %p8968_p5 = scmp.lt.s32.totalorder %s8962_s20, %s8962_s20 }
  0x10   :  { %p8969_p6 = por %p8968_p5, %p8967_p4 }
  0x12   :  { %p8970_p7 = pnand %p8969_p6, %p8963_p3 }
  0x14   :  { %8973 = shalt.err (!%p8970_p7)
}
  0x15   :  { %43 = dma.hbm_to_vmem [thread:$0]  %s9560_s2, 128, %s41_s10, [#allocation7]  }
  0x16   :  { %s8974_s25 = scalar_lea.hbm %s9562_s4, 64 }
  0x17   :  { %p8975_p8 = scmp.ne.s32.totalorder %s9562_s4, %s8974_s25  ;;  %p8978_p9 = scmp.lt.u32.totalorder %s8974_s25, %s9562_s4 }
  0x19   :  { %p8980_p10 = pnand %p8978_p9, %p8975_p8 }
  0x1b   :  { %8983 = shalt.err (!%p8980_p10)
}
  0x1c   :  { %s8984_s30 = scalar_lea.vmem %s63_s12, 64  ;;  %p8989_p12 = scmp.lt.s32.totalorder %s63_s12, %s63_s12 }
  0x1d   :  { %p8985_p11 = scmp.ne.s32.totalorder %s63_s12, %s8984_s30  ;;  %p8990_p13 = scmp.lt.s32.totalorder %s8984_s30, %s8984_s30 }
  0x1f   :  { %p8991_p0 = por %p8990_p13, %p8989_p12 }
  0x21   :  { %p8992_p1 = pnand %p8991_p0, %p8985_p11 }
  0x23   :  { %8995 = shalt.err (!%p8992_p1)
}
  0x24   :  { %65 = dma.hbm_to_vmem [thread:$0]  %s9562_s4, 64, %s63_s12, [#allocation10]  }
  0x25   :  { %s9164_s11 = smov [#allocation12]   ;;  %s9165_s14 = smov [#allocation3]  }
  0x26   :  { %s84_s13 = sshll.u32 %s9164_s11, 4  ;;  %s27_s15 = sshll.u32 %s9165_s14, 4  ;;  %s85_s13 = int_to_ptr.vmem [resolvable:$true] %s84_s13  ;;  %s9253_s15 = int_to_ptr.vmem [resolvable:$true] %s27_s15 }
  0x27   :  { %s8996_s18 = scalar_lea.hbm %s9564_s6, 64 }
  0x28   :  { %p8997_p2 = scmp.ne.s32.totalorder %s9564_s6, %s8996_s18  ;;  %p9000_p3 = scmp.lt.u32.totalorder %s8996_s18, %s9564_s6 }
  0x2a   :  { %p9002_p4 = pnand %p9000_p3, %p8997_p2 }
  0x2c   :  { %9005 = shalt.err (!%p9002_p4)
}
  0x2d   :  { %s9006_s4 = scalar_lea.vmem %s85_s13, 64  ;;  %p9011_p6 = scmp.lt.s32.totalorder %s85_s13, %s85_s13 }
  0x2e   :  { %p9007_p5 = scmp.ne.s32.totalorder %s85_s13, %s9006_s4  ;;  %p9012_p7 = scmp.lt.s32.totalorder %s9006_s4, %s9006_s4 }
  0x30   :  { %p9013_p8 = por %p9012_p7, %p9011_p6 }
  0x32   :  { %p9014_p9 = pnand %p9013_p8, %p9007_p5 }
  0x34   :  { %9017 = shalt.err (!%p9014_p9)
}
  0x35   :  { %87 = dma.hbm_to_vmem [thread:$0]  %s9564_s6, 64, %s85_s13, [#allocation13]  }
  0x36   :  { %s9018_s26 = scalar_lea.hbm %s9559_s1, 65536 }
  0x37   :  { %p9019_p10 = scmp.ne.s32.totalorder %s9559_s1, %s9018_s26  ;;  %p9022_p11 = scmp.lt.u32.totalorder %s9018_s26, %s9559_s1 }
  0x39   :  { %p9024_p12 = pnand %p9022_p11, %p9019_p10 }
  0x3b   :  { %9027 = shalt.err (!%p9024_p12)
}
  0x3c   :  { %s9028_s2 = scalar_lea.vmem %s9253_s15, 65536  ;;  %p9033_p0 = scmp.lt.s32.totalorder %s9253_s15, %s9253_s15 }
  0x3d   :  { %p9029_p13 = scmp.ne.s32.totalorder %s9253_s15, %s9028_s2  ;;  %p9034_p1 = scmp.lt.s32.totalorder %s9028_s2, %s9028_s2 }
  0x3f   :  { %p9035_p2 = por %p9034_p1, %p9033_p0 }
  0x41   :  { %p9036_p3 = pnand %p9035_p2, %p9029_p13 }
  0x43   :  { %9039 = shalt.err (!%p9036_p3)
}
  0x44   :  { %s9166_s6 = smov 512   ;;  %s9167_s10 = smov 32  }
  0x45   :  { %33 = dma.hbm_to_vmem [thread:$0]  %s9559_s1, 65536, %s9253_s15, [#allocation4], %s9166_s6, %s9166_s6, %s9167_s10  }
  0x46   :  { %s9168_s14 = smov [#allocation8]   ;;  %s9040_s19 = scalar_lea.hbm %s9561_s3, 32768 }
  0x47   :  { %s49_s16 = sshll.u32 %s9168_s14, 4  ;;  %p9041_p4 = scmp.ne.s32.totalorder %s9561_s3, %s9040_s19  ;;  %s50_s16 = int_to_ptr.vmem [resolvable:$true] %s49_s16 }
  0x48   :  { %p9044_p5 = scmp.lt.u32.totalorder %s9040_s19, %s9561_s3 }
  0x4a   :  { %p9046_p6 = pnand %p9044_p5, %p9041_p4 }
  0x4c   :  { %9049 = shalt.err (!%p9046_p6)
}
  0x4d   :  { %s9050_s12 = scalar_lea.vmem %s50_s16, 32768  ;;  %p9055_p8 = scmp.lt.s32.totalorder %s50_s16, %s50_s16 }
  0x4e   :  { %p9051_p7 = scmp.ne.s32.totalorder %s50_s16, %s9050_s12  ;;  %p9056_p9 = scmp.lt.s32.totalorder %s9050_s12, %s9050_s12 }
  0x50   :  { %p9057_p10 = por %p9056_p9, %p9055_p8 }
  0x52   :  { %p9058_p11 = pnand %p9057_p10, %p9051_p7 }
  0x54   :  { %9061 = shalt.err (!%p9058_p11)
}
  0x55   :  { %s9169_s1 = smov 256   ;;  %s9170_s15 = smov 16  }
  0x56   :  { %55 = dma.hbm_to_vmem [thread:$0]  %s9561_s3, 32768, %s50_s16, [#allocation7], %s9169_s1, %s9169_s1, %s9170_s15  }
  0x57   :  { %s9171_s25 = smov [#allocation11]   ;;  %s9172_s27 = smov [#allocation14]  }
  0x58   :  { %s71_s26 = sshll.u32 %s9171_s25, 4  ;;  %s93_s28 = sshll.u32 %s9172_s27, 4  ;;  %s72_s26 = int_to_ptr.vmem [resolvable:$true] %s71_s26  ;;  %s94_s28 = int_to_ptr.vmem [resolvable:$true] %s93_s28 }
  0x59   :  { %s9062_s2 = scalar_lea.hbm %s9563_s5, 16384 }
  0x5a   :  { %p9063_p12 = scmp.ne.s32.totalorder %s9563_s5, %s9062_s2  ;;  %p9066_p13 = scmp.lt.u32.totalorder %s9062_s2, %s9563_s5 }
  0x5c   :  { %p9068_p0 = pnand %p9066_p13, %p9063_p12 }
  0x5e   :  { %9071 = shalt.err (!%p9068_p0)
}
  0x5f   :  { %s9072_s3 = scalar_lea.vmem %s72_s26, 16384  ;;  %p9077_p2 = scmp.lt.s32.totalorder %s72_s26, %s72_s26 }
  0x60   :  { %p9073_p1 = scmp.ne.s32.totalorder %s72_s26, %s9072_s3  ;;  %p9078_p3 = scmp.lt.s32.totalorder %s9072_s3, %s9072_s3 }
  0x62   :  { %p9079_p4 = por %p9078_p3, %p9077_p2 }
  0x64   :  { %p9080_p5 = pnand %p9079_p4, %p9073_p1 }
  0x66   :  { %9083 = shalt.err (!%p9080_p5)
}
  0x67   :  { %77 = dma.hbm_to_vmem [thread:$0]  %s9563_s5, 16384, %s72_s26, [#allocation10], %s9169_s1, %s9169_s1, %s9170_s15  }
  0x68   :  { %s9084_s20 = scalar_lea.hbm %s9565_s7, 4096 }
  0x69   :  { %p9085_p6 = scmp.ne.s32.totalorder %s9565_s7, %s9084_s20  ;;  %p9088_p7 = scmp.lt.u32.totalorder %s9084_s20, %s9565_s7 }
  0x6b   :  { %p9090_p8 = pnand %p9088_p7, %p9085_p6 }
  0x6d   :  { %9093 = shalt.err (!%p9090_p8)
}
  0x6e   :  { %s9094_s23 = scalar_lea.vmem %s94_s28, 4096  ;;  %p9099_p10 = scmp.lt.s32.totalorder %s94_s28, %s94_s28 }
  0x6f   :  { %p9095_p9 = scmp.ne.s32.totalorder %s94_s28, %s9094_s23  ;;  %p9100_p11 = scmp.lt.s32.totalorder %s9094_s23, %s9094_s23 }
  0x71   :  { %p9101_p12 = por %p9100_p11, %p9099_p10 }
  0x73   :  { %p9102_p13 = pnand %p9101_p12, %p9095_p9 }
  0x75   :  { %9105 = shalt.err (!%p9102_p13)
}
  0x76   :  { %s9173_s5 = smov 64   ;;  %s9174_s1 = smov 4  }
  0x77   :  { %99 = dma.hbm_to_vmem [thread:$0]  %s9565_s7, 4096, %s94_s28, [#allocation13], %s9173_s5, %s9173_s5, %s9174_s1  }
  0x78   :  { %s9175_s25 = smov [#allocation15]   ;;  %s9106_s30 = scalar_lea.hbm %s9566_s8, 16 }
  0x79   :  { %s106_s26 = sshll.u32 %s9175_s25, 4  ;;  %p9107_p0 = scmp.ne.s32.totalorder %s9566_s8, %s9106_s30  ;;  %s107_s26 = int_to_ptr.vmem [resolvable:$true] %s106_s26 }
  0x7a   :  { %p9110_p1 = scmp.lt.u32.totalorder %s9106_s30, %s9566_s8 }
  0x7c   :  { %p9112_p2 = pnand %p9110_p1, %p9107_p0 }
  0x7e   :  { %9115 = shalt.err (!%p9112_p2)
}
  0x7f   :  { %s9116_s14 = scalar_lea.vmem %s107_s26, 16  ;;  %s9120_s7 = scalar_lea.vmem %s107_s26, 32 }
  0x80   :  { %p9117_p3 = scmp.ne.s32.totalorder %s107_s26, %s9116_s14  ;;  %p9121_p4 = scmp.lt.s32.totalorder %s107_s26, %s107_s26 }
  0x81   :  { %p9122_p5 = scmp.lt.s32.totalorder %s9120_s7, %s9116_s14 }
  0x83   :  { %p9123_p6 = por %p9122_p5, %p9121_p4 }
  0x85   :  { %p9124_p7 = pnand %p9123_p6, %p9117_p3 }
  0x87   :  { %9127 = shalt.err (!%p9124_p7)
}
  0x88   :  { %109 = dma.hbm_to_vmem [thread:$0]  %s9566_s8, 16, %s107_s26, [#allocation16]  }
  0x89   :  { %9150 = dma.done.wait [#allocation4], 65536  }
  0x8a   :  { %9151 = vsyncadd [#allocation4], 4294901760 }
  0x8b   :  { %9152 = dma.done.wait [#allocation7], 32896  }
  0x8c   :  { %9153 = vsyncadd [#allocation7], 4294934400 }
  0x8d   :  { %9154 = dma.done.wait [#allocation10], 16448  }
  0x8e   :  { %9155 = vsyncadd [#allocation10], 4294950848 }
  0x8f   :  { %9156 = dma.done.wait [#allocation13], 4160  }
  0x90   :  { %9157 = vsyncadd [#allocation13], 4294963136 }
  0x91   :  { %9158 = dma.done.wait [#allocation16], 16  }
  0x92   :  { %9159 = vsyncadd [#allocation16], 4294967280  ;;  %v259_v0 = vld [vmem:[#allocation3] sm:$0xff]  ;;  %v9176_v35 = vmov 1983009808   ;;  %v178_v37 = vlaneseq }
  0x93   :  { %v263_v1 = vld [vmem:[#allocation3 + $0x20] sm:$0xff]  ;;  %v176_v36 = vunpack.c.l.s4 %v9176_v35 }
  0x94   :  { %v387_v2 = vld [vmem:[#allocation3 + $0x400] sm:$0xff]  ;;  %v7302_v3 = vcombine.high %v259_v0, %v263_v1  ;;  %v7301_v5 = vcombine.low %v259_v0, %v263_v1  ;;  %v9333_v47 = vshrl.u32 %v178_v37, 7 }
  0x95   :  { %v391_v4 = vld [vmem:[#allocation3 + $0x420] sm:$0xff]  ;;  %v177_v46 = vunpack.c.0.s8 %v176_v36 }
  0x96   :  { %v267_v6 = vld [vmem:[#allocation3 + $0x40] sm:$0xff]  ;;  %v7430_v8 = vcombine.high %v387_v2, %v391_v4  ;;  %v7429_v9 = vcombine.low %v387_v2, %v391_v4  ;;  %3331 = vmatprep.subr.bf16.mxu0 %v7302_v3 }
  0x97   :  { %v271_v7 = vld [vmem:[#allocation3 + $0x60] sm:$0xff]  ;;  %3332 = vmatpush1.bf16.msra.mxu0 %v7301_v5  ;;  %v9336_v58 = vsub.s32 %v177_v46, %v9333_v47 }
  0x98   :  { %v7310_v10 = vcombine.high %v267_v6, %v271_v7  ;;  %v395_v11 = vld [vmem:[#allocation3 + $0x440] sm:$0xff]  ;;  %3372 = vmatprep.subr.bf16.mxu1 %v7430_v8  ;;  %v7309_v18 = vcombine.low %v267_v6, %v271_v7 }
  0x99   :  { %v399_v12 = vld [vmem:[#allocation3 + $0x460] sm:$0xff]  ;;  %3373 = vmatpush1.bf16.msra.mxu1 %v7429_v9 }
  0x9a   :  { %v275_v13 = vld [vmem:[#allocation3 + $0x80] sm:$0xff]  ;;  %v7438_v14 = vcombine.high %v395_v11, %v399_v12  ;;  %3333 = vmatprep.subr.bf16.mxu0 %v7310_v10  ;;  %v7437_v19 = vcombine.low %v395_v11, %v399_v12 }
  0x9b   :  { %v279_v15 = vld [vmem:[#allocation3 + $0xa0] sm:$0xff]  ;;  %3334 = vmatpush1.bf16.msra.mxu0 %v7309_v18 }
  0x9c   :  { %v403_v16 = vld [vmem:[#allocation3 + $0x480] sm:$0xff]  ;;  %v7318_v20 = vcombine.high %v275_v13, %v279_v15  ;;  %3374 = vmatprep.subr.bf16.mxu1 %v7438_v14  ;;  %v7317_v26 = vcombine.low %v275_v13, %v279_v15 }
  0x9d   :  { %v407_v17 = vld [vmem:[#allocation3 + $0x4a0] sm:$0xff]  ;;  %3375 = vmatpush1.bf16.msra.mxu1 %v7437_v19 }
  0x9e   :  { %v7446_v21 = vcombine.high %v403_v16, %v407_v17  ;;  %v283_v22 = vld [vmem:[#allocation3 + $0xc0] sm:$0xff]  ;;  %3335 = vmatprep.subr.bf16.mxu0 %v7318_v20  ;;  %v7445_v27 = vcombine.low %v403_v16, %v407_v17 }
  0x9f   :  { %v287_v23 = vld [vmem:[#allocation3 + $0xe0] sm:$0xff]  ;;  %3336 = vmatpush1.bf16.msra.mxu0 %v7317_v26 }
  0xa0   :  { %v411_v24 = vld [vmem:[#allocation3 + $0x4c0] sm:$0xff]  ;;  %v7326_v28 = vcombine.high %v283_v22, %v287_v23  ;;  %3376 = vmatprep.subr.bf16.mxu1 %v7446_v21  ;;  %v7325_v34 = vcombine.low %v283_v22, %v287_v23 }
  0xa1   :  { %v415_v25 = vld [vmem:[#allocation3 + $0x4e0] sm:$0xff]  ;;  %3377 = vmatpush1.bf16.msra.mxu1 %v7445_v27 }
  0xa2   :  { %v7454_v29 = vcombine.high %v411_v24, %v415_v25  ;;  %v291_v30 = vld [vmem:[#allocation3 + $0x100] sm:$0xff]  ;;  %3337 = vmatprep.subr.bf16.mxu0 %v7326_v28  ;;  %v7453_v38 = vcombine.low %v411_v24, %v415_v25 }
  0xa3   :  { %v295_v31 = vld [vmem:[#allocation3 + $0x120] sm:$0xff]  ;;  %3338 = vmatpush1.bf16.msra.mxu0 %v7325_v34 }
  0xa4   :  { %v419_v32 = vld [vmem:[#allocation3 + $0x500] sm:$0xff]  ;;  %v7334_v39 = vcombine.high %v291_v30, %v295_v31  ;;  %3378 = vmatprep.subr.bf16.mxu1 %v7454_v29  ;;  %v7333_v45 = vcombine.low %v291_v30, %v295_v31 }
  0xa5   :  { %v423_v33 = vld [vmem:[#allocation3 + $0x520] sm:$0xff]  ;;  %3379 = vmatpush1.bf16.msra.mxu1 %v7453_v38 }
  0xa6   :  { %v7462_v40 = vcombine.high %v419_v32, %v423_v33  ;;  %v299_v41 = vld [vmem:[#allocation3 + $0x140] sm:$0xff]  ;;  %3339 = vmatprep.subr.bf16.mxu0 %v7334_v39  ;;  %v7461_v48 = vcombine.low %v419_v32, %v423_v33 }
  0xa7   :  { %v303_v42 = vld [vmem:[#allocation3 + $0x160] sm:$0xff]  ;;  %3340 = vmatpush1.bf16.msra.mxu0 %v7333_v45 }
  0xa8   :  { %v427_v43 = vld [vmem:[#allocation3 + $0x540] sm:$0xff]  ;;  %v7342_v49 = vcombine.high %v299_v41, %v303_v42  ;;  %3380 = vmatprep.subr.bf16.mxu1 %v7462_v40  ;;  %v7341_v55 = vcombine.low %v299_v41, %v303_v42 }
  0xa9   :  { %v431_v44 = vld [vmem:[#allocation3 + $0x560] sm:$0xff]  ;;  %3381 = vmatpush1.bf16.msra.mxu1 %v7461_v48 }
  0xaa   :  { %v7470_v50 = vcombine.high %v427_v43, %v431_v44  ;;  %v307_v51 = vld [vmem:[#allocation3 + $0x180] sm:$0xff]  ;;  %3341 = vmatprep.subr.bf16.mxu0 %v7342_v49  ;;  %v7469_v59 = vcombine.low %v427_v43, %v431_v44 }
  0xab   :  { %v311_v52 = vld [vmem:[#allocation3 + $0x1a0] sm:$0xff]  ;;  %3342 = vmatpush1.bf16.msra.mxu0 %v7341_v55 }
  0xac   :  { %v435_v53 = vld [vmem:[#allocation3 + $0x580] sm:$0xff]  ;;  %v7350_v60 = vcombine.high %v307_v51, %v311_v52  ;;  %3382 = vmatprep.subr.bf16.mxu1 %v7470_v50  ;;  %v7349_v4 = vcombine.low %v307_v51, %v311_v52 }
  0xad   :  { %v439_v54 = vld [vmem:[#allocation3 + $0x5a0] sm:$0xff]  ;;  %3383 = vmatpush1.bf16.msra.mxu1 %v7469_v59 }
  0xae   :  { %v315_v56 = vld [vmem:[#allocation3 + $0x1c0] sm:$0xff]  ;;  %v7478_v63 = vcombine.high %v435_v53, %v439_v54  ;;  %v7477_v5 = vcombine.low %v435_v53, %v439_v54  ;;  %3343 = vmatprep.subr.bf16.mxu0 %v7350_v60 }
  0xaf   :  { %v319_v57 = vld [vmem:[#allocation3 + $0x1e0] sm:$0xff]  ;;  %3344 = vmatpush1.bf16.msra.mxu0 %v7349_v4 }
  0xb0   :  { %v443_v61 = vld [vmem:[#allocation3 + $0x5c0] sm:$0xff]  ;;  %v7358_v6 = vcombine.high %v315_v56, %v319_v57  ;;  %3384 = vmatprep.subr.bf16.mxu1 %v7478_v63  ;;  %v7357_v18 = vcombine.low %v315_v56, %v319_v57 }
  0xb1   :  { %v447_v62 = vld [vmem:[#allocation3 + $0x5e0] sm:$0xff]  ;;  %3385 = vmatpush1.bf16.msra.mxu1 %v7477_v5 }
  0xb2   :  { %v8331_v0 = vld [vmem:[%s9558_s0] ss:$16 sps:$4 sm:$0xff]   ;;  %v8335_v2 = vld [vmem:[%s9558_s0 + $0x4] ss:$16 sps:$4 sm:$0xff]   ;;  %v7486_v11 = vcombine.high %v443_v61, %v447_v62  ;;  %v7485_v19 = vcombine.low %v443_v61, %v447_v62  ;;  %3345 = vmatprep.subr.bf16.mxu0 %v7358_v6 }
  0xb3   :  { %v8333_v1 = vld [vmem:[%s9558_s0 + $0x20] ss:$16 sps:$4 sm:$0xff]   ;;  %v8336_v3 = vld [vmem:[%s9558_s0 + $0x24] ss:$16 sps:$4 sm:$0xff]   ;;  %v9351_v7 = vrot.slane %v8331_v0, %v9336_v58  ;;  %v9357_v9 = vrot.slane %v8335_v2, %v9336_v58  ;;  %3346 = vmatpush1.bf16.msra.mxu0 %v7357_v18  ;;  %v8339_v18 = vld [vmem:[%s9558_s0 + $0x28] ss:$16 sps:$4 sm:$0xff]  }
  0xb4   :  { %v9354_v8 = vrot.slane %v8333_v1, %v9336_v58  ;;  %v9360_v10 = vrot.slane %v8336_v3, %v9336_v58  ;;  %v323_v12 = vld [vmem:[#allocation3 + $0x200] sm:$0xff]  ;;  %3386 = vmatprep.subr.bf16.mxu1 %v7486_v11 }
  0xb5   :  { %v327_v13 = vld [vmem:[#allocation3 + $0x220] sm:$0xff]  ;;  %3387 = vmatpush1.bf16.msra.mxu1 %v7485_v19 }
  0xb6   :  { %v451_v14 = vld [vmem:[#allocation3 + $0x600] sm:$0xff]  ;;  %v204_v16 = vcombine.high %v9351_v7, %v9354_v8  ;;  %v206_v17 = vcombine.high %v9357_v9, %v9360_v10  ;;  %v7366_v20 = vcombine.high %v323_v12, %v327_v13  ;;  %v7365_v28 = vcombine.low %v323_v12, %v327_v13 }
  0xb7   :  { %v455_v15 = vld [vmem:[#allocation3 + $0x620] sm:$0xff] }
  0xb8   :  { %v9366_v21 = vpack.c.bf16 %v204_v16, %v204_v16  ;;  %v9368_v22 = vpack.c.bf16 %v206_v17, %v206_v17  ;;  %v7494_v23 = vcombine.high %v451_v14, %v455_v15  ;;  %v331_v24 = vld [vmem:[#allocation3 + $0x240] sm:$0xff]  ;;  %3347 = vmatprep.subr.bf16.mxu0 %v7366_v20  ;;  %v7493_v29 = vcombine.low %v451_v14, %v455_v15  ;;  %v8337_v17 = vld [vmem:[%s9558_s0 + $0x8] ss:$16 sps:$4 sm:$0xff]   ;;  %v8341_v20 = vld [vmem:[%s9558_s0 + $0xc] ss:$16 sps:$4 sm:$0xff]  }
  0xb9   :  { %v335_v25 = vld [vmem:[#allocation3 + $0x260] sm:$0xff]  ;;  %3348 = vmatpush1.bf16.msra.mxu0 %v7365_v28 }
  0xba   :  { %v459_v26 = vld [vmem:[#allocation3 + $0x640] sm:$0xff]  ;;  %3363 = vmatprep.mubr.bf16.mxu0 %v9366_v21  ;;  %3404 = vmatprep.mubr.bf16.mxu1 %v9368_v22  ;;  %v7374_v30 = vcombine.high %v331_v24, %v335_v25  ;;  %v7373_v36 = vcombine.low %v331_v24, %v335_v25 }
  0xbb   :  { %v463_v27 = vld [vmem:[#allocation3 + $0x660] sm:$0xff]  ;;  %3388 = vmatprep.subr.bf16.mxu1 %v7494_v23  ;;  %v8342_v23 = vld [vmem:[%s9558_s0 + $0x2c] ss:$16 sps:$4 sm:$0xff]  }
  0xbc   :  { %v7502_v31 = vcombine.high %v459_v26, %v463_v27  ;;  %v339_v32 = vld [vmem:[#allocation3 + $0x280] sm:$0xff]  ;;  %3389 = vmatpush1.bf16.msra.mxu1 %v7493_v29  ;;  %3349 = vmatprep.subr.bf16.mxu0 %v7374_v30  ;;  %v7501_v37 = vcombine.low %v459_v26, %v463_v27  ;;  %v9385_v30 = vrot.slane %v8337_v17, %v9336_v58 }
  0xbd   :  { %v343_v33 = vld [vmem:[#allocation3 + $0x2a0] sm:$0xff]  ;;  %3350 = vmatpush1.bf16.msra.mxu0 %v7373_v36  ;;  %v9396_v36 = vrot.slane %v8342_v23, %v9336_v58 }
  0xbe   :  { %v467_v34 = vld [vmem:[#allocation3 + $0x680] sm:$0xff]  ;;  %v7382_v38 = vcombine.high %v339_v32, %v343_v33  ;;  %3390 = vmatprep.subr.bf16.mxu1 %v7502_v31  ;;  %v7381_v44 = vcombine.low %v339_v32, %v343_v33  ;;  %v9388_v31 = vrot.slane %v8339_v18, %v9336_v58  ;;  %v203_v32 = vcombine.low %v9351_v7, %v9354_v8 }
  0xbf   :  { %v471_v35 = vld [vmem:[#allocation3 + $0x6a0] sm:$0xff] }
  0xc0   :  { %v7510_v39 = vcombine.high %v467_v34, %v471_v35  ;;  %v347_v40 = vld [vmem:[#allocation3 + $0x2c0] sm:$0xff]  ;;  %3391 = vmatpush1.bf16.msra.mxu1 %v7501_v37  ;;  %3351 = vmatprep.subr.bf16.mxu0 %v7382_v38  ;;  %v7509_v45 = vcombine.low %v467_v34, %v471_v35  ;;  %v9393_v35 = vrot.slane %v8341_v20, %v9336_v58 }
  0xc1   :  { %v351_v41 = vld [vmem:[#allocation3 + $0x2e0] sm:$0xff]  ;;  %3352 = vmatpush1.bf16.msra.mxu0 %v7381_v44  ;;  %v205_v38 = vcombine.low %v9357_v9, %v9360_v10 }
  0xc2   :  { %v475_v42 = vld [vmem:[#allocation3 + $0x6c0] sm:$0xff]  ;;  %v7390_v46 = vcombine.high %v347_v40, %v351_v41  ;;  %3392 = vmatprep.subr.bf16.mxu1 %v7510_v39  ;;  %v7389_v53 = vcombine.low %v347_v40, %v351_v41 }
  0xc3   :  { %v479_v43 = vld [vmem:[#allocation3 + $0x6e0] sm:$0xff]  ;;  %v9406_v9 = vpack.c.bf16 %v205_v38, %v205_v38 }
  0xc4   :  { %v7518_v48 = vcombine.high %v475_v42, %v479_v43  ;;  %v355_v49 = vld [vmem:[#allocation3 + $0x300] sm:$0xff]  ;;  %3393 = vmatpush1.bf16.msra.mxu1 %v7509_v45  ;;  %3353 = vmatprep.subr.bf16.mxu0 %v7390_v46  ;;  %v7517_v54 = vcombine.low %v475_v42, %v479_v43  ;;  %v240_v42 = vcombine.high %v9385_v30, %v9388_v31 }
  0xc5   :  { %v359_v50 = vld [vmem:[#allocation3 + $0x320] sm:$0xff]  ;;  %3354 = vmatpush1.bf16.msra.mxu0 %v7389_v53  ;;  %v9402_v43 = vpack.c.bf16 %v203_v32, %v203_v32  ;;  %v242_v45 = vcombine.high %v9393_v35, %v9396_v36 }
  0xc6   :  { %v483_v51 = vld [vmem:[#allocation3 + $0x700] sm:$0xff]  ;;  %v7398_v55 = vcombine.high %v355_v49, %v359_v50  ;;  %3394 = vmatprep.subr.bf16.mxu1 %v7518_v48  ;;  %v7397_v62 = vcombine.low %v355_v49, %v359_v50 }
  0xc7   :  { %v487_v52 = vld [vmem:[#allocation3 + $0x720] sm:$0xff] }
  0xc8   :  { %v363_v56 = vld [vmem:[#allocation3 + $0x340] sm:$0xff]  ;;  %v7526_v57 = vcombine.high %v483_v51, %v487_v52  ;;  %3395 = vmatpush1.bf16.msra.mxu1 %v7517_v54  ;;  %3355 = vmatprep.subr.bf16.mxu0 %v7398_v55  ;;  %v7525_v63 = vcombine.low %v483_v51, %v487_v52  ;;  %v9408_v52 = vpack.c.bf16 %v240_v42, %v240_v42 }
  0xc9   :  { %v367_v59 = vld [vmem:[#allocation3 + $0x360] sm:$0xff]  ;;  %3356 = vmatpush1.bf16.msra.mxu0 %v7397_v62  ;;  %v9411_v55 = vpack.c.bf16 %v242_v45, %v242_v45 }
  0xca   :  { %v491_v60 = vld [vmem:[#allocation3 + $0x740] sm:$0xff]  ;;  %v7406_v0 = vcombine.high %v363_v56, %v367_v59  ;;  %3396 = vmatprep.subr.bf16.mxu1 %v7526_v57  ;;  %v7405_v6 = vcombine.low %v363_v56, %v367_v59 }
  0xcb   :  { %v495_v61 = vld [vmem:[#allocation3 + $0x760] sm:$0xff] }
  0xcc   :  { %v7534_v1 = vcombine.high %v491_v60, %v495_v61  ;;  %v371_v2 = vld [vmem:[#allocation3 + $0x380] sm:$0xff]  ;;  %3397 = vmatpush1.bf16.msra.mxu1 %v7525_v63  ;;  %3357 = vmatprep.subr.bf16.mxu0 %v7406_v0  ;;  %v7533_v11 = vcombine.low %v491_v60, %v495_v61 }
  0xcd   :  { %v375_v3 = vld [vmem:[#allocation3 + $0x3a0] sm:$0xff]  ;;  %3358 = vmatpush1.bf16.msra.mxu0 %v7405_v6 }
  0xce   :  { %v499_v4 = vld [vmem:[#allocation3 + $0x780] sm:$0xff]  ;;  %v7414_v12 = vcombine.high %v371_v2, %v375_v3  ;;  %3398 = vmatprep.subr.bf16.mxu1 %v7534_v1  ;;  %v7413_v24 = vcombine.low %v371_v2, %v375_v3 }
  0xcf   :  { %v503_v5 = vld [vmem:[#allocation3 + $0x7a0] sm:$0xff] }
  0xd0   :  { %v379_v13 = vld [vmem:[#allocation3 + $0x3c0] sm:$0xff]  ;;  %v7542_v15 = vcombine.high %v499_v4, %v503_v5  ;;  %3399 = vmatpush1.bf16.msra.mxu1 %v7533_v11  ;;  %3359 = vmatprep.subr.bf16.mxu0 %v7414_v12  ;;  %v7541_v25 = vcombine.low %v499_v4, %v503_v5 }
  0xd1   :  { %v383_v14 = vld [vmem:[#allocation3 + $0x3e0] sm:$0xff]  ;;  %3360 = vmatpush1.bf16.msra.mxu0 %v7413_v24 }
  0xd2   :  { %v507_v16 = vld [vmem:[#allocation3 + $0x7c0] sm:$0xff]  ;;  %v7422_v26 = vcombine.high %v379_v13, %v383_v14  ;;  %3400 = vmatprep.subr.bf16.mxu1 %v7542_v15  ;;  %v7421_v37 = vcombine.low %v379_v13, %v383_v14 }
  0xd3   :  { %v511_v19 = vld [vmem:[#allocation3 + $0x7e0] sm:$0xff] }
  0xd4   :  { %v7550_v27 = vcombine.high %v507_v16, %v511_v19  ;;  %v515_v28 = vld [vmem:[#allocation3 + $0x800] sm:$0xff]  ;;  %3401 = vmatpush1.bf16.msra.mxu1 %v7541_v25  ;;  %3361 = vmatprep.subr.bf16.mxu0 %v7422_v26  ;;  %v7549_v39 = vcombine.low %v507_v16, %v511_v19 }
  0xd5   :  { %v519_v29 = vld [vmem:[#allocation3 + $0x820] sm:$0xff]  ;;  %3362 = vmatpush1.bf16.msra.mxu0 %v7421_v37 }
  0xd6   :  { %v643_v33 = vld [vmem:[#allocation3 + $0xc00] sm:$0xff]  ;;  %v7558_v40 = vcombine.high %v515_v28, %v519_v29  ;;  %3402 = vmatprep.subr.bf16.mxu1 %v7550_v27  ;;  %v7557_v10 = vcombine.low %v515_v28, %v519_v29 }
  0xd7   :  { %v647_v34 = vld [vmem:[#allocation3 + $0xc20] sm:$0xff] }
  0xd8   :  { %v7686_v41 = vcombine.high %v643_v33, %v647_v34  ;;  %v523_v7 = vld [vmem:[#allocation3 + $0x840] sm:$0xff]  ;;  %3403 = vmatpush1.bf16.msra.mxu1 %v7549_v39  ;;  %3413 = vmatprep.subr.bf16.mxu0 %v7558_v40  ;;  %v7685_v46 = vcombine.low %v643_v33, %v647_v34 }
  0xd9   :  { %v527_v8 = vld [vmem:[#allocation3 + $0x860] sm:$0xff]  ;;  %3364 = vmatmul.mubr.bf16.vlgmr.msra.gmra.mrb[0].mxu0 %v9402_v43 }
  0xda   :  { %v651_v58 = vld [vmem:[#allocation3 + $0xc40] sm:$0xff]  ;;  %v7566_v48 = vcombine.high %v523_v7, %v527_v8  ;;  %3454 = vmatprep.subr.bf16.mxu1 %v7686_v41  ;;  %3414 = vmatpush1.bf16.msra.mxu0 %v7557_v10  ;;  %v7565_v56 = vcombine.low %v523_v7, %v527_v8 }
  0xdb   :  { %v655_v44 = vld [vmem:[#allocation3 + $0xc60] sm:$0xff]  ;;  %3405 = vmatmul.mubr.bf16.vlgmr.msra.gmra.mrb[0].mxu1 %v9406_v9  ;;  %3445 = vmatprep.mubr.bf16.mxu0 %v9408_v52 }
  0xdc   :  { %v7694_v49 = vcombine.high %v651_v58, %v655_v44  ;;  %v531_v50 = vld [vmem:[#allocation3 + $0x880] sm:$0xff]  ;;  %3455 = vmatpush1.bf16.msra.mxu1 %v7685_v46  ;;  %3415 = vmatprep.subr.bf16.mxu0 %v7566_v48  ;;  %v7693_v57 = vcombine.low %v651_v58, %v655_v44 }
  0xdd   :  { %v535_v51 = vld [vmem:[#allocation3 + $0x8a0] sm:$0xff]  ;;  %3486 = vmatprep.mubr.bf16.mxu1 %v9411_v55 }
  0xde   :  { %v659_v53 = vld [vmem:[#allocation3 + $0xc80] sm:$0xff]  ;;  %v7574_v59 = vcombine.high %v531_v50, %v535_v51  ;;  %3456 = vmatprep.subr.bf16.mxu1 %v7694_v49  ;;  %3416 = vmatpush1.bf16.msra.mxu0 %v7565_v56  ;;  %v7573_v1 = vcombine.low %v531_v50, %v535_v51 }
  0xdf   :  { %v663_v54 = vld [vmem:[#allocation3 + $0xca0] sm:$0xff] }
  0xe0   :  { %v7702_v60 = vcombine.high %v659_v53, %v663_v54  ;;  %v539_v61 = vld [vmem:[#allocation3 + $0x8c0] sm:$0xff]  ;;  %3457 = vmatpush1.bf16.msra.mxu1 %v7693_v57  ;;  %3417 = vmatprep.subr.bf16.mxu0 %v7574_v59  ;;  %v7701_v2 = vcombine.low %v659_v53, %v663_v54 }
  0xe1   :  { %v543_v62 = vld [vmem:[#allocation3 + $0x8e0] sm:$0xff] }
  0xe2   :  { %v667_v63 = vld [vmem:[#allocation3 + $0xcc0] sm:$0xff]  ;;  %v7582_v3 = vcombine.high %v539_v61, %v543_v62  ;;  %3458 = vmatprep.subr.bf16.mxu1 %v7702_v60  ;;  %3418 = vmatpush1.bf16.msra.mxu0 %v7573_v1  ;;  %v7581_v13 = vcombine.low %v539_v61, %v543_v62 }
  0xe3   :  { %v671_v0 = vld [vmem:[#allocation3 + $0xce0] sm:$0xff] }
  0xe4   :  { %v547_v4 = vld [vmem:[#allocation3 + $0x900] sm:$0xff]  ;;  %v7710_v11 = vcombine.high %v667_v63, %v671_v0  ;;  %3459 = vmatpush1.bf16.msra.mxu1 %v7701_v2  ;;  %3419 = vmatprep.subr.bf16.mxu0 %v7582_v3  ;;  %v7709_v14 = vcombine.low %v667_v63, %v671_v0 }
  0xe5   :  { %v551_v5 = vld [vmem:[#allocation3 + $0x920] sm:$0xff] }
  0xe6   :  { %v675_v6 = vld [vmem:[#allocation3 + $0xd00] sm:$0xff]  ;;  %v7590_v15 = vcombine.high %v547_v4, %v551_v5  ;;  %3460 = vmatprep.subr.bf16.mxu1 %v7710_v11  ;;  %3420 = vmatpush1.bf16.msra.mxu0 %v7581_v13  ;;  %v7589_v23 = vcombine.low %v547_v4, %v551_v5 }
  0xe7   :  { %v679_v12 = vld [vmem:[#allocation3 + $0xd20] sm:$0xff] }
  0xe8   :  { %v555_v16 = vld [vmem:[#allocation3 + $0x940] sm:$0xff]  ;;  %v7718_v19 = vcombine.high %v675_v6, %v679_v12  ;;  %3461 = vmatpush1.bf16.msra.mxu1 %v7709_v14  ;;  %3421 = vmatprep.subr.bf16.mxu0 %v7590_v15  ;;  %v7717_v24 = vcombine.low %v675_v6, %v679_v12 }
  0xe9   :  { %v559_v17 = vld [vmem:[#allocation3 + $0x960] sm:$0xff] }
  0xea   :  { %v683_v18 = vld [vmem:[#allocation3 + $0xd40] sm:$0xff]  ;;  %v7598_v25 = vcombine.high %v555_v16, %v559_v17  ;;  %3462 = vmatprep.subr.bf16.mxu1 %v7718_v19  ;;  %3422 = vmatpush1.bf16.msra.mxu0 %v7589_v23  ;;  %v7597_v33 = vcombine.low %v555_v16, %v559_v17 }
  0xeb   :  { %v687_v20 = vld [vmem:[#allocation3 + $0xd60] sm:$0xff] }
  0xec   :  { %v563_v26 = vld [vmem:[#allocation3 + $0x980] sm:$0xff]  ;;  %v7726_v29 = vcombine.high %v683_v18, %v687_v20  ;;  %3463 = vmatpush1.bf16.msra.mxu1 %v7717_v24  ;;  %3423 = vmatprep.subr.bf16.mxu0 %v7598_v25  ;;  %v7725_v34 = vcombine.low %v683_v18, %v687_v20 }
  0xed   :  { %v567_v27 = vld [vmem:[#allocation3 + $0x9a0] sm:$0xff] }
  0xee   :  { %v691_v28 = vld [vmem:[#allocation3 + $0xd80] sm:$0xff]  ;;  %v7606_v37 = vcombine.high %v563_v26, %v567_v27  ;;  %3464 = vmatprep.subr.bf16.mxu1 %v7726_v29  ;;  %3424 = vmatpush1.bf16.msra.mxu0 %v7597_v33  ;;  %v7605_v8 = vcombine.low %v563_v26, %v567_v27 }
  0xef   :  { %v695_v32 = vld [vmem:[#allocation3 + $0xda0] sm:$0xff] }
  0xf0   :  { %v571_v38 = vld [vmem:[#allocation3 + $0x9c0] sm:$0xff]  ;;  %v7734_v41 = vcombine.high %v691_v28, %v695_v32  ;;  %3465 = vmatpush1.bf16.msra.mxu1 %v7725_v34  ;;  %3425 = vmatprep.subr.bf16.mxu0 %v7606_v37  ;;  %v7733_v42 = vcombine.low %v691_v28, %v695_v32 }
  0xf1   :  { %v575_v39 = vld [vmem:[#allocation3 + $0x9e0] sm:$0xff] }
  0xf2   :  { %v699_v40 = vld [vmem:[#allocation3 + $0xdc0] sm:$0xff]  ;;  %v7614_v58 = vcombine.high %v571_v38, %v575_v39  ;;  %3466 = vmatprep.subr.bf16.mxu1 %v7734_v41  ;;  %3426 = vmatpush1.bf16.msra.mxu0 %v7605_v8  ;;  %v7613_v49 = vcombine.low %v571_v38, %v575_v39 }
  0xf3   :  { %v703_v7 = vld [vmem:[#allocation3 + $0xde0] sm:$0xff] }
  0xf4   :  { %v579_v44 = vld [vmem:[#allocation3 + $0xa00] sm:$0xff]  ;;  %v7742_v46 = vcombine.high %v699_v40, %v703_v7  ;;  %3467 = vmatpush1.bf16.msra.mxu1 %v7733_v42  ;;  %3427 = vmatprep.subr.bf16.mxu0 %v7614_v58  ;;  %v7741_v50 = vcombine.low %v699_v40, %v703_v7 }
  0xf5   :  { %v583_v45 = vld [vmem:[#allocation3 + $0xa20] sm:$0xff] }
  0xf6   :  { %v707_v10 = vld [vmem:[#allocation3 + $0xe00] sm:$0xff]  ;;  %v7622_v51 = vcombine.high %v579_v44, %v583_v45  ;;  %3468 = vmatprep.subr.bf16.mxu1 %v7742_v46  ;;  %3428 = vmatpush1.bf16.msra.mxu0 %v7613_v49  ;;  %v7621_v60 = vcombine.low %v579_v44, %v583_v45 }
  0xf7   :  { %v711_v48 = vld [vmem:[#allocation3 + $0xe20] sm:$0xff] }
  0xf8   :  { %v587_v53 = vld [vmem:[#allocation3 + $0xa40] sm:$0xff]  ;;  %v7750_v57 = vcombine.high %v707_v10, %v711_v48  ;;  %3469 = vmatpush1.bf16.msra.mxu1 %v7741_v50  ;;  %3429 = vmatprep.subr.bf16.mxu0 %v7622_v51  ;;  %v7749_v61 = vcombine.low %v707_v10, %v711_v48 }
  0xf9   :  { %v591_v54 = vld [vmem:[#allocation3 + $0xa60] sm:$0xff] }
  0xfa   :  { %v715_v56 = vld [vmem:[#allocation3 + $0xe40] sm:$0xff]  ;;  %v7630_v62 = vcombine.high %v587_v53, %v591_v54  ;;  %3470 = vmatprep.subr.bf16.mxu1 %v7750_v57  ;;  %3430 = vmatpush1.bf16.msra.mxu0 %v7621_v60  ;;  %v7629_v4 = vcombine.low %v587_v53, %v591_v54  ;;  %v260_v57 = vld [vmem:[#allocation3 + $0x8] sm:$0xff] }
  0xfb   :  { %v719_v59 = vld [vmem:[#allocation3 + $0xe60] sm:$0xff]  ;;  %v388_v60 = vld [vmem:[#allocation3 + $0x408] sm:$0xff] }
  0xfc   :  { %v595_v63 = vld [vmem:[#allocation3 + $0xa80] sm:$0xff]  ;;  %v7758_v2 = vcombine.high %v715_v56, %v719_v59  ;;  %3471 = vmatpush1.bf16.msra.mxu1 %v7749_v61  ;;  %3431 = vmatprep.subr.bf16.mxu0 %v7630_v62  ;;  %v7757_v5 = vcombine.low %v715_v56, %v719_v59  ;;  %v264_v59 = vld [vmem:[#allocation3 + $0x28] sm:$0xff] }
  0xfd   :  { %v599_v0 = vld [vmem:[#allocation3 + $0xaa0] sm:$0xff]  ;;  %v392_v62 = vld [vmem:[#allocation3 + $0x428] sm:$0xff] }
  0xfe   :  { %v723_v1 = vld [vmem:[#allocation3 + $0xe80] sm:$0xff]  ;;  %v7638_v6 = vcombine.high %v595_v63, %v599_v0  ;;  %3472 = vmatprep.subr.bf16.mxu1 %v7758_v2  ;;  %3432 = vmatpush1.bf16.msra.mxu0 %v7629_v4  ;;  %v7637_v16 = vcombine.low %v595_v63, %v599_v0  ;;  %v239_v63 = vcombine.low %v9385_v30, %v9388_v31  ;;  %v268_v4 = vld [vmem:[#allocation3 + $0x48] sm:$0xff] }
  0xff   :  { %v727_v3 = vld [vmem:[#allocation3 + $0xea0] sm:$0xff]  ;;  %v7431_v31 = vcombine.low %v388_v60, %v392_v62 }
 0x100   :  { %v603_v11 = vld [vmem:[#allocation3 + $0xac0] sm:$0xff]  ;;  %v7766_v14 = vcombine.high %v723_v1, %v727_v3  ;;  %3473 = vmatpush1.bf16.msra.mxu1 %v7757_v5  ;;  %3433 = vmatprep.subr.bf16.mxu0 %v7638_v6  ;;  %v7765_v17 = vcombine.low %v723_v1, %v727_v3  ;;  %v241_v1 = vcombine.low %v9393_v35, %v9396_v36  ;;  %v272_v5 = vld [vmem:[#allocation3 + $0x68] sm:$0xff] }
 0x101   :  { %v607_v12 = vld [vmem:[#allocation3 + $0xae0] sm:$0xff]  ;;  %v7304_v3 = vcombine.high %v260_v57, %v264_v59  ;;  %v396_v6 = vld [vmem:[#allocation3 + $0x448] sm:$0xff]  ;;  %v7312_v35 = vcombine.high %v268_v4, %v272_v5 }
 0x102   :  { %v731_v13 = vld [vmem:[#allocation3 + $0xec0] sm:$0xff]  ;;  %v7646_v18 = vcombine.high %v603_v11, %v607_v12  ;;  %3474 = vmatprep.subr.bf16.mxu1 %v7766_v14  ;;  %3434 = vmatpush1.bf16.msra.mxu0 %v7637_v16  ;;  %v7645_v26 = vcombine.low %v603_v11, %v607_v12  ;;  %v7432_v11 = vcombine.high %v388_v60, %v392_v62  ;;  %v400_v12 = vld [vmem:[#allocation3 + $0x468] sm:$0xff] }
 0x103   :  { %v735_v15 = vld [vmem:[#allocation3 + $0xee0] sm:$0xff]  ;;  %v7303_v14 = vcombine.low %v260_v57, %v264_v59  ;;  %v9422_v30 = vpack.c.bf16 %v241_v1, %v241_v1  ;;  %v276_v36 = vld [vmem:[#allocation3 + $0x88] sm:$0xff] }
 0x104   :  { %v611_v19 = vld [vmem:[#allocation3 + $0xb00] sm:$0xff]  ;;  %v7774_v24 = vcombine.high %v731_v13, %v735_v15  ;;  %3475 = vmatpush1.bf16.msra.mxu1 %v7765_v17  ;;  %3435 = vmatprep.subr.bf16.mxu0 %v7646_v18  ;;  %v7773_v27 = vcombine.low %v731_v13, %v735_v15  ;;  %v9420_v13 = vpack.c.bf16 %v239_v63, %v239_v63  ;;  %v280_v15 = vld [vmem:[#allocation3 + $0xa8] sm:$0xff] }
 0x105   :  { %v615_v20 = vld [vmem:[#allocation3 + $0xb20] sm:$0xff]  ;;  %v404_v16 = vld [vmem:[#allocation3 + $0x488] sm:$0xff]  ;;  %v7440_v17 = vcombine.high %v396_v6, %v400_v12 }
 0x106   :  { %v739_v23 = vld [vmem:[#allocation3 + $0xf00] sm:$0xff]  ;;  %v7654_v28 = vcombine.high %v611_v19, %v615_v20  ;;  %3476 = vmatprep.subr.bf16.mxu1 %v7774_v24  ;;  %3436 = vmatpush1.bf16.msra.mxu0 %v7645_v26  ;;  %v7653_v38 = vcombine.low %v611_v19, %v615_v20  ;;  %v408_v18 = vld [vmem:[#allocation3 + $0x4a8] sm:$0xff]  ;;  %v7311_v19 = vcombine.low %v268_v4, %v272_v5 }
 0x107   :  { %v743_v25 = vld [vmem:[#allocation3 + $0xf20] sm:$0xff]  ;;  %v7439_v20 = vcombine.low %v396_v6, %v400_v12  ;;  %v284_v24 = vld [vmem:[#allocation3 + $0xc8] sm:$0xff] }
 0x108   :  { %v619_v29 = vld [vmem:[#allocation3 + $0xb40] sm:$0xff]  ;;  %v7782_v34 = vcombine.high %v739_v23, %v743_v25  ;;  %3477 = vmatpush1.bf16.msra.mxu1 %v7773_v27  ;;  %3437 = vmatprep.subr.bf16.mxu0 %v7654_v28  ;;  %v7781_v39 = vcombine.low %v739_v23, %v743_v25  ;;  %v7320_v23 = vcombine.high %v276_v36, %v280_v15  ;;  %v288_v25 = vld [vmem:[#allocation3 + $0xe8] sm:$0xff] }
 0x109   :  { %v623_v32 = vld [vmem:[#allocation3 + $0xb60] sm:$0xff]  ;;  %v412_v26 = vld [vmem:[#allocation3 + $0x4c8] sm:$0xff]  ;;  %v7448_v27 = vcombine.high %v404_v16, %v408_v18 }
 0x10a   :  { %v747_v33 = vld [vmem:[#allocation3 + $0xf40] sm:$0xff]  ;;  %v7662_v40 = vcombine.high %v619_v29, %v623_v32  ;;  %3478 = vmatprep.subr.bf16.mxu1 %v7782_v34  ;;  %3438 = vmatpush1.bf16.msra.mxu0 %v7653_v38  ;;  %v7661_v44 = vcombine.low %v619_v29, %v623_v32  ;;  %v416_v28 = vld [vmem:[#allocation3 + $0x4e8] sm:$0xff]  ;;  %v7319_v29 = vcombine.low %v276_v36, %v280_v15 }
 0x10b   :  { %v751_v37 = vld [vmem:[#allocation3 + $0xf60] sm:$0xff]  ;;  %v7447_v32 = vcombine.low %v404_v16, %v408_v18  ;;  %v292_v34 = vld [vmem:[#allocation3 + $0x108] sm:$0xff] }
 0x10c   :  { %v627_v41 = vld [vmem:[#allocation3 + $0xb80] sm:$0xff]  ;;  %v7790_v42 = vcombine.high %v747_v33, %v751_v37  ;;  %3479 = vmatpush1.bf16.msra.mxu1 %v7781_v39  ;;  %3439 = vmatprep.subr.bf16.mxu0 %v7662_v40  ;;  %v7789_v45 = vcombine.low %v747_v33, %v751_v37  ;;  %v7328_v33 = vcombine.high %v284_v24, %v288_v25  ;;  %v296_v37 = vld [vmem:[#allocation3 + $0x128] sm:$0xff] }
 0x10d   :  { %v631_v7 = vld [vmem:[#allocation3 + $0xba0] sm:$0xff]  ;;  %v420_v38 = vld [vmem:[#allocation3 + $0x508] sm:$0xff]  ;;  %v7456_v39 = vcombine.high %v412_v26, %v416_v28 }
 0x10e   :  { %v755_v8 = vld [vmem:[#allocation3 + $0xf80] sm:$0xff]  ;;  %v7670_v10 = vcombine.high %v627_v41, %v631_v7  ;;  %3480 = vmatprep.subr.bf16.mxu1 %v7790_v42  ;;  %3440 = vmatpush1.bf16.msra.mxu0 %v7661_v44  ;;  %v7669_v53 = vcombine.low %v627_v41, %v631_v7  ;;  %v424_v40 = vld [vmem:[#allocation3 + $0x528] sm:$0xff]  ;;  %v7327_v41 = vcombine.low %v284_v24, %v288_v25 }
 0x10f   :  { %v759_v58 = vld [vmem:[#allocation3 + $0xfa0] sm:$0xff]  ;;  %v7455_v7 = vcombine.low %v412_v26, %v416_v28  ;;  %v300_v42 = vld [vmem:[#allocation3 + $0x148] sm:$0xff] }
 0x110   :  { %v635_v46 = vld [vmem:[#allocation3 + $0xbc0] sm:$0xff]  ;;  %v7798_v50 = vcombine.high %v755_v8, %v759_v58  ;;  %3481 = vmatpush1.bf16.msra.mxu1 %v7789_v45  ;;  %3441 = vmatprep.subr.bf16.mxu0 %v7670_v10  ;;  %v7797_v54 = vcombine.low %v755_v8, %v759_v58  ;;  %v7336_v8 = vcombine.high %v292_v34, %v296_v37  ;;  %v304_v58 = vld [vmem:[#allocation3 + $0x168] sm:$0xff] }
 0x111   :  { %v639_v48 = vld [vmem:[#allocation3 + $0xbe0] sm:$0xff]  ;;  %v428_v44 = vld [vmem:[#allocation3 + $0x548] sm:$0xff]  ;;  %v7464_v45 = vcombine.high %v420_v38, %v424_v40  ;;  %v7343_v57 = vcombine.low %v300_v42, %v304_v58 }
 0x112   :  { %v763_v49 = vld [vmem:[#allocation3 + $0xfc0] sm:$0xff]  ;;  %v7678_v56 = vcombine.high %v635_v46, %v639_v48  ;;  %3482 = vmatprep.subr.bf16.mxu1 %v7798_v50  ;;  %3442 = vmatpush1.bf16.msra.mxu0 %v7669_v53  ;;  %v7677_v0 = vcombine.low %v635_v46, %v639_v48  ;;  %v432_v10 = vld [vmem:[#allocation3 + $0x568] sm:$0xff]  ;;  %v7335_v46 = vcombine.low %v292_v34, %v296_v37 }
 0x113   :  { %v767_v51 = vld [vmem:[#allocation3 + $0xfe0] sm:$0xff]  ;;  %v7463_v48 = vcombine.low %v420_v38, %v424_v40  ;;  %v308_v50 = vld [vmem:[#allocation3 + $0x188] sm:$0xff]  ;;  %v7471_v59 = vcombine.low %v428_v44, %v432_v10 }
 0x114   :  { %v7806_v61 = vcombine.high %v763_v49, %v767_v51  ;;  %3483 = vmatpush1.bf16.msra.mxu1 %v7797_v54  ;;  %3443 = vmatprep.subr.bf16.mxu0 %v7678_v56  ;;  %v7805_v2 = vcombine.low %v763_v49, %v767_v51  ;;  %v7344_v49 = vcombine.high %v300_v42, %v304_v58  ;;  %v312_v51 = vld [vmem:[#allocation3 + $0x1a8] sm:$0xff] }
 0x115   :  { %v436_v53 = vld [vmem:[#allocation3 + $0x588] sm:$0xff]  ;;  %v7472_v54 = vcombine.high %v428_v44, %v432_v10  ;;  %v7352_v60 = vcombine.high %v308_v50, %v312_v51 }
 0x116   :  { %3484 = vmatprep.subr.bf16.mxu1 %v7806_v61  ;;  %3444 = vmatpush1.bf16.msra.mxu0 %v7677_v0  ;;  %v440_v56 = vld [vmem:[#allocation3 + $0x5a8] sm:$0xff] }
 0x117   :  { %3495 = vmatprep.subr.bf16.mxu0 %v7304_v3  ;;  %v316_v61 = vld [vmem:[#allocation3 + $0x1c8] sm:$0xff]  ;;  %v7480_v0 = vcombine.high %v436_v53, %v440_v56  ;;  %v7479_v3 = vcombine.low %v436_v53, %v440_v56 }
 0x118   :  { %3485 = vmatpush1.bf16.msra.mxu1 %v7805_v2  ;;  %v320_v62 = vld [vmem:[#allocation3 + $0x1e8] sm:$0xff]  ;;  %v7351_v2 = vcombine.low %v308_v50, %v312_v51 }
 0x119   :  { %3536 = vmatprep.subr.bf16.mxu1 %v7432_v11  ;;  %3446 = vmatmul.mubr.bf16.vlgmr.msra.gmra.mrb[4].mxu0 %v9420_v13  ;;  %v444_v63 = vld [vmem:[#allocation3 + $0x5c8] sm:$0xff]  ;;  %v7360_v4 = vcombine.high %v316_v61, %v320_v62 }
 0x11a   :  { %3496 = vmatpush1.bf16.msra.mxu0 %v7303_v14  ;;  %3527 = vmatprep.mubr.bf16.mxu0 %v9366_v21  ;;  %v448_v1 = vld [vmem:[#allocation3 + $0x5e8] sm:$0xff] }
 0x11b   :  { %3487 = vmatmul.mubr.bf16.vlgmr.msra.gmra.mrb[4].mxu1 %v9422_v30  ;;  %3497 = vmatprep.subr.bf16.mxu0 %v7312_v35  ;;  %v324_v5 = vld [vmem:[#allocation3 + $0x208] sm:$0xff]  ;;  %v7488_v12 = vcombine.high %v444_v63, %v448_v1  ;;  %v7487_v35 = vcombine.low %v444_v63, %v448_v1 }
 0x11c   :  { %3537 = vmatpush1.bf16.msra.mxu1 %v7431_v31  ;;  %3568 = vmatprep.mubr.bf16.mxu1 %v9368_v22  ;;  %v328_v6 = vld [vmem:[#allocation3 + $0x228] sm:$0xff]  ;;  %v7359_v31 = vcombine.low %v316_v61, %v320_v62 }
 0x11d   :  { %3538 = vmatprep.subr.bf16.mxu1 %v7440_v17  ;;  %v452_v11 = vld [vmem:[#allocation3 + $0x608] sm:$0xff]  ;;  %v7368_v36 = vcombine.high %v324_v5, %v328_v6 }
 0x11e   :  { %3498 = vmatpush1.bf16.msra.mxu0 %v7311_v19  ;;  %v456_v14 = vld [vmem:[#allocation3 + $0x628] sm:$0xff] }
 0x11f   :  { %3499 = vmatprep.subr.bf16.mxu0 %v7320_v23  ;;  %v332_v15 = vld [vmem:[#allocation3 + $0x248] sm:$0xff]  ;;  %v7496_v18 = vcombine.high %v452_v11, %v456_v14  ;;  %v7495_v23 = vcombine.low %v452_v11, %v456_v14 }
 0x120   :  { %3539 = vmatpush1.bf16.msra.mxu1 %v7439_v20  ;;  %v336_v16 = vld [vmem:[#allocation3 + $0x268] sm:$0xff]  ;;  %v7367_v20 = vcombine.low %v324_v5, %v328_v6 }
 0x121   :  { %3540 = vmatprep.subr.bf16.mxu1 %v7448_v27  ;;  %v460_v17 = vld [vmem:[#allocation3 + $0x648] sm:$0xff]  ;;  %v7376_v24 = vcombine.high %v332_v15, %v336_v16 }
 0x122   :  { %3500 = vmatpush1.bf16.msra.mxu0 %v7319_v29  ;;  %v464_v19 = vld [vmem:[#allocation3 + $0x668] sm:$0xff] }
 0x123   :  { %3501 = vmatprep.subr.bf16.mxu0 %v7328_v33  ;;  %v340_v25 = vld [vmem:[#allocation3 + $0x288] sm:$0xff]  ;;  %v7504_v28 = vcombine.high %v460_v17, %v464_v19  ;;  %v7503_v33 = vcombine.low %v460_v17, %v464_v19 }
 0x124   :  { %3541 = vmatpush1.bf16.msra.mxu1 %v7447_v32  ;;  %v344_v26 = vld [vmem:[#allocation3 + $0x2a8] sm:$0xff]  ;;  %v7375_v32 = vcombine.low %v332_v15, %v336_v16 }
 0x125   :  { %3542 = vmatprep.subr.bf16.mxu1 %v7456_v39  ;;  %v468_v27 = vld [vmem:[#allocation3 + $0x688] sm:$0xff]  ;;  %v7384_v34 = vcombine.high %v340_v25, %v344_v26 }
 0x126   :  { %3502 = vmatpush1.bf16.msra.mxu0 %v7327_v41  ;;  %v472_v29 = vld [vmem:[#allocation3 + $0x6a8] sm:$0xff] }
 0x127   :  { %3503 = vmatprep.subr.bf16.mxu0 %v7336_v8  ;;  %v348_v37 = vld [vmem:[#allocation3 + $0x2c8] sm:$0xff]  ;;  %v7512_v40 = vcombine.high %v468_v27, %v472_v29  ;;  %v7511_v8 = vcombine.low %v468_v27, %v472_v29 }
 0x128   :  { %3543 = vmatpush1.bf16.msra.mxu1 %v7455_v7  ;;  %v352_v38 = vld [vmem:[#allocation3 + $0x2e8] sm:$0xff]  ;;  %v7383_v7 = vcombine.low %v340_v25, %v344_v26 }
 0x129   :  { %3544 = vmatprep.subr.bf16.mxu1 %v7464_v45  ;;  %v476_v39 = vld [vmem:[#allocation3 + $0x6c8] sm:$0xff]  ;;  %v7392_v42 = vcombine.high %v348_v37, %v352_v38 }
 0x12a   :  { %3504 = vmatpush1.bf16.msra.mxu0 %v7335_v46  ;;  %v480_v41 = vld [vmem:[#allocation3 + $0x6e8] sm:$0xff] }
 0x12b   :  { %3505 = vmatprep.subr.bf16.mxu0 %v7344_v49  ;;  %v356_v58 = vld [vmem:[#allocation3 + $0x308] sm:$0xff]  ;;  %v7520_v10 = vcombine.high %v476_v39, %v480_v41  ;;  %v7519_v49 = vcombine.low %v476_v39, %v480_v41 }
 0x12c   :  { %3545 = vmatpush1.bf16.msra.mxu1 %v7463_v48  ;;  %v360_v44 = vld [vmem:[#allocation3 + $0x328] sm:$0xff]  ;;  %v7391_v48 = vcombine.low %v348_v37, %v352_v38 }
 0x12d   :  { %3546 = vmatprep.subr.bf16.mxu1 %v7472_v54  ;;  %v484_v45 = vld [vmem:[#allocation3 + $0x708] sm:$0xff]  ;;  %v7400_v50 = vcombine.high %v356_v58, %v360_v44 }
 0x12e   :  { %3506 = vmatpush1.bf16.msra.mxu0 %v7343_v57  ;;  %v488_v46 = vld [vmem:[#allocation3 + $0x728] sm:$0xff] }
 0x12f   :  { %3507 = vmatprep.subr.bf16.mxu0 %v7352_v60  ;;  %v364_v51 = vld [vmem:[#allocation3 + $0x348] sm:$0xff]  ;;  %v7528_v56 = vcombine.high %v484_v45, %v488_v46  ;;  %v7527_v60 = vcombine.low %v484_v45, %v488_v46 }
 0x130   :  { %3547 = vmatpush1.bf16.msra.mxu1 %v7471_v59  ;;  %v368_v53 = vld [vmem:[#allocation3 + $0x368] sm:$0xff]  ;;  %v7399_v59 = vcombine.low %v356_v58, %v360_v44 }
 0x131   :  { %3548 = vmatprep.subr.bf16.mxu1 %v7480_v0  ;;  %v492_v54 = vld [vmem:[#allocation3 + $0x748] sm:$0xff]  ;;  %v7408_v61 = vcombine.high %v364_v51, %v368_v53 }
 0x132   :  { %3508 = vmatpush1.bf16.msra.mxu0 %v7351_v2  ;;  %v496_v57 = vld [vmem:[#allocation3 + $0x768] sm:$0xff] }
 0x133   :  { %3509 = vmatprep.subr.bf16.mxu0 %v7360_v4  ;;  %v372_v62 = vld [vmem:[#allocation3 + $0x388] sm:$0xff]  ;;  %v7536_v1 = vcombine.high %v492_v54, %v496_v57  ;;  %v7535_v4 = vcombine.low %v492_v54, %v496_v57 }
 0x134   :  { %3549 = vmatpush1.bf16.msra.mxu1 %v7479_v3  ;;  %v376_v63 = vld [vmem:[#allocation3 + $0x3a8] sm:$0xff]  ;;  %v7407_v3 = vcombine.low %v364_v51, %v368_v53 }
 0x135   :  { %3550 = vmatprep.subr.bf16.mxu1 %v7488_v12  ;;  %v500_v0 = vld [vmem:[#allocation3 + $0x788] sm:$0xff]  ;;  %v7416_v5 = vcombine.high %v372_v62, %v376_v63 }
 0x136   :  { %3510 = vmatpush1.bf16.msra.mxu0 %v7359_v31  ;;  %v504_v2 = vld [vmem:[#allocation3 + $0x7a8] sm:$0xff] }
 0x137   :  { %3511 = vmatprep.subr.bf16.mxu0 %v7368_v36  ;;  %v380_v6 = vld [vmem:[#allocation3 + $0x3c8] sm:$0xff]  ;;  %v7544_v14 = vcombine.high %v500_v0, %v504_v2  ;;  %v7543_v36 = vcombine.low %v500_v0, %v504_v2 }
 0x138   :  { %3551 = vmatpush1.bf16.msra.mxu1 %v7487_v35  ;;  %v384_v11 = vld [vmem:[#allocation3 + $0x3e8] sm:$0xff]  ;;  %v7415_v35 = vcombine.low %v372_v62, %v376_v63 }
 0x139   :  { %3552 = vmatprep.subr.bf16.mxu1 %v7496_v18  ;;  %v508_v12 = vld [vmem:[#allocation3 + $0x7c8] sm:$0xff]  ;;  %v7424_v15 = vcombine.high %v380_v6, %v384_v11 }
 0x13a   :  { %3512 = vmatpush1.bf16.msra.mxu0 %v7367_v20  ;;  %v512_v31 = vld [vmem:[#allocation3 + $0x7e8] sm:$0xff] }
 0x13b   :  { %3513 = vmatprep.subr.bf16.mxu0 %v7376_v24  ;;  %v516_v16 = vld [vmem:[#allocation3 + $0x808] sm:$0xff]  ;;  %v7552_v19 = vcombine.high %v508_v12, %v512_v31  ;;  %v7551_v24 = vcombine.low %v508_v12, %v512_v31 }
 0x13c   :  { %3553 = vmatpush1.bf16.msra.mxu1 %v7495_v23  ;;  %v520_v17 = vld [vmem:[#allocation3 + $0x828] sm:$0xff]  ;;  %v7423_v23 = vcombine.low %v380_v6, %v384_v11 }
 0x13d   :  { %3554 = vmatprep.subr.bf16.mxu1 %v7504_v28  ;;  %v644_v18 = vld [vmem:[#allocation3 + $0xc08] sm:$0xff]  ;;  %v7560_v25 = vcombine.high %v516_v16, %v520_v17 }
 0x13e   :  { %3514 = vmatpush1.bf16.msra.mxu0 %v7375_v32  ;;  %v648_v20 = vld [vmem:[#allocation3 + $0xc28] sm:$0xff] }
 0x13f   :  { %3515 = vmatprep.subr.bf16.mxu0 %v7384_v34  ;;  %v524_v26 = vld [vmem:[#allocation3 + $0x848] sm:$0xff]  ;;  %v7688_v29 = vcombine.high %v644_v18, %v648_v20  ;;  %v7687_v34 = vcombine.low %v644_v18, %v648_v20 }
 0x140   :  { %3555 = vmatpush1.bf16.msra.mxu1 %v7503_v33  ;;  %v528_v27 = vld [vmem:[#allocation3 + $0x868] sm:$0xff]  ;;  %v7559_v33 = vcombine.low %v516_v16, %v520_v17 }
 0x141   :  { %3556 = vmatprep.subr.bf16.mxu1 %v7512_v40  ;;  %v652_v28 = vld [vmem:[#allocation3 + $0xc48] sm:$0xff]  ;;  %v7568_v37 = vcombine.high %v524_v26, %v528_v27 }
 0x142   :  { %3516 = vmatpush1.bf16.msra.mxu0 %v7383_v7  ;;  %v656_v32 = vld [vmem:[#allocation3 + $0xc68] sm:$0xff] }
 0x143   :  { %3517 = vmatprep.subr.bf16.mxu0 %v7392_v42  ;;  %v532_v38 = vld [vmem:[#allocation3 + $0x888] sm:$0xff]  ;;  %v7696_v41 = vcombine.high %v652_v28, %v656_v32  ;;  %v7695_v42 = vcombine.low %v652_v28, %v656_v32 }
 0x144   :  { %3557 = vmatpush1.bf16.msra.mxu1 %v7511_v8  ;;  %v536_v39 = vld [vmem:[#allocation3 + $0x8a8] sm:$0xff]  ;;  %v7567_v8 = vcombine.low %v524_v26, %v528_v27 }
 0x145   :  { %3558 = vmatprep.subr.bf16.mxu1 %v7520_v10  ;;  %v660_v40 = vld [vmem:[#allocation3 + $0xc88] sm:$0xff]  ;;  %v7576_v58 = vcombine.high %v532_v38, %v536_v39 }
 0x146   :  { %3518 = vmatpush1.bf16.msra.mxu0 %v7391_v48  ;;  %v664_v7 = vld [vmem:[#allocation3 + $0xca8] sm:$0xff] }
 0x147   :  { %3519 = vmatprep.subr.bf16.mxu0 %v7400_v50  ;;  %v540_v44 = vld [vmem:[#allocation3 + $0x8c8] sm:$0xff]  ;;  %v7704_v46 = vcombine.high %v660_v40, %v664_v7  ;;  %v7703_v50 = vcombine.low %v660_v40, %v664_v7 }
 0x148   :  { %3559 = vmatpush1.bf16.msra.mxu1 %v7519_v49  ;;  %v544_v45 = vld [vmem:[#allocation3 + $0x8e8] sm:$0xff]  ;;  %v7575_v49 = vcombine.low %v532_v38, %v536_v39 }
 0x149   :  { %3560 = vmatprep.subr.bf16.mxu1 %v7528_v56  ;;  %v668_v10 = vld [vmem:[#allocation3 + $0xcc8] sm:$0xff]  ;;  %v7584_v51 = vcombine.high %v540_v44, %v544_v45 }
 0x14a   :  { %3520 = vmatpush1.bf16.msra.mxu0 %v7399_v59  ;;  %v672_v48 = vld [vmem:[#allocation3 + $0xce8] sm:$0xff] }
 0x14b   :  { %3521 = vmatprep.subr.bf16.mxu0 %v7408_v61  ;;  %v548_v53 = vld [vmem:[#allocation3 + $0x908] sm:$0xff]  ;;  %v7712_v57 = vcombine.high %v668_v10, %v672_v48  ;;  %v7711_v61 = vcombine.low %v668_v10, %v672_v48 }
 0x14c   :  { %3561 = vmatpush1.bf16.msra.mxu1 %v7527_v60  ;;  %v552_v54 = vld [vmem:[#allocation3 + $0x928] sm:$0xff]  ;;  %v7583_v60 = vcombine.low %v540_v44, %v544_v45 }
 0x14d   :  { %3562 = vmatprep.subr.bf16.mxu1 %v7536_v1  ;;  %v676_v56 = vld [vmem:[#allocation3 + $0xd08] sm:$0xff]  ;;  %v7592_v62 = vcombine.high %v548_v53, %v552_v54 }
 0x14e   :  { %3522 = vmatpush1.bf16.msra.mxu0 %v7407_v3  ;;  %v680_v59 = vld [vmem:[#allocation3 + $0xd28] sm:$0xff] }
 0x14f   :  { %3523 = vmatprep.subr.bf16.mxu0 %v7416_v5  ;;  %v556_v63 = vld [vmem:[#allocation3 + $0x948] sm:$0xff]  ;;  %v7720_v2 = vcombine.high %v676_v56, %v680_v59  ;;  %v7719_v5 = vcombine.low %v676_v56, %v680_v59 }
 0x150   :  { %3563 = vmatpush1.bf16.msra.mxu1 %v7535_v4  ;;  %v560_v0 = vld [vmem:[#allocation3 + $0x968] sm:$0xff]  ;;  %v7591_v4 = vcombine.low %v548_v53, %v552_v54 }
 0x151   :  { %3564 = vmatprep.subr.bf16.mxu1 %v7544_v14  ;;  %v684_v1 = vld [vmem:[#allocation3 + $0xd48] sm:$0xff]  ;;  %v7600_v6 = vcombine.high %v556_v63, %v560_v0 }
 0x152   :  { %3524 = vmatpush1.bf16.msra.mxu0 %v7415_v35  ;;  %v688_v3 = vld [vmem:[#allocation3 + $0xd68] sm:$0xff] }
 0x153   :  { %3525 = vmatprep.subr.bf16.mxu0 %v7424_v15  ;;  %v564_v11 = vld [vmem:[#allocation3 + $0x988] sm:$0xff]  ;;  %v7728_v31 = vcombine.high %v684_v1, %v688_v3  ;;  %v7727_v15 = vcombine.low %v684_v1, %v688_v3 }
 0x154   :  { %3565 = vmatpush1.bf16.msra.mxu1 %v7543_v36  ;;  %v568_v12 = vld [vmem:[#allocation3 + $0x9a8] sm:$0xff]  ;;  %v7599_v36 = vcombine.low %v556_v63, %v560_v0 }
 0x155   :  { %3566 = vmatprep.subr.bf16.mxu1 %v7552_v19  ;;  %v692_v14 = vld [vmem:[#allocation3 + $0xd88] sm:$0xff]  ;;  %v7608_v16 = vcombine.high %v564_v11, %v568_v12 }
 0x156   :  { %3526 = vmatpush1.bf16.msra.mxu0 %v7423_v23  ;;  %v696_v35 = vld [vmem:[#allocation3 + $0xda8] sm:$0xff] }
 0x157   :  { %3577 = vmatprep.subr.bf16.mxu0 %v7560_v25  ;;  %v572_v17 = vld [vmem:[#allocation3 + $0x9c8] sm:$0xff]  ;;  %v7736_v20 = vcombine.high %v692_v14, %v696_v35  ;;  %v7735_v25 = vcombine.low %v692_v14, %v696_v35 }
 0x158   :  { %3567 = vmatpush1.bf16.msra.mxu1 %v7551_v24  ;;  %v576_v18 = vld [vmem:[#allocation3 + $0x9e8] sm:$0xff]  ;;  %v7607_v24 = vcombine.low %v564_v11, %v568_v12 }
 0x159   :  { %3618 = vmatprep.subr.bf16.mxu1 %v7688_v29  ;;  %3528 = vmatmul.mubr.bf16.vlgmr.msra.gmra.mrb[8].mxu0 %v9402_v43  ;;  %v700_v19 = vld [vmem:[#allocation3 + $0xdc8] sm:$0xff]  ;;  %v7616_v26 = vcombine.high %v572_v17, %v576_v18 }
 0x15a   :  { %3578 = vmatpush1.bf16.msra.mxu0 %v7559_v33  ;;  %3609 = vmatprep.mubr.bf16.mxu0 %v9408_v52  ;;  %v704_v23 = vld [vmem:[#allocation3 + $0xde8] sm:$0xff] }
 0x15b   :  { %3569 = vmatmul.mubr.bf16.vlgmr.msra.gmra.mrb[8].mxu1 %v9406_v9  ;;  %3579 = vmatprep.subr.bf16.mxu0 %v7568_v37  ;;  %v580_v27 = vld [vmem:[#allocation3 + $0xa08] sm:$0xff]  ;;  %v7744_v29 = vcombine.high %v700_v19, %v704_v23  ;;  %v7743_v37 = vcombine.low %v700_v19, %v704_v23 }
 0x15c   :  { %3619 = vmatpush1.bf16.msra.mxu1 %v7687_v34  ;;  %3650 = vmatprep.mubr.bf16.mxu1 %v9411_v55  ;;  %v584_v28 = vld [vmem:[#allocation3 + $0xa28] sm:$0xff]  ;;  %v7615_v34 = vcombine.low %v572_v17, %v576_v18 }
 0x15d   :  { %3620 = vmatprep.subr.bf16.mxu1 %v7696_v41  ;;  %v708_v32 = vld [vmem:[#allocation3 + $0xe08] sm:$0xff]  ;;  %v7624_v38 = vcombine.high %v580_v27, %v584_v28 }
 0x15e   :  { %3580 = vmatpush1.bf16.msra.mxu0 %v7567_v8  ;;  %v712_v33 = vld [vmem:[#allocation3 + $0xe28] sm:$0xff] }
 0x15f   :  { %3581 = vmatprep.subr.bf16.mxu0 %v7576_v58  ;;  %v588_v39 = vld [vmem:[#allocation3 + $0xa48] sm:$0xff]  ;;  %v7752_v7 = vcombine.high %v708_v32, %v712_v33  ;;  %v7751_v58 = vcombine.low %v708_v32, %v712_v33 }
 0x160   :  { %3621 = vmatpush1.bf16.msra.mxu1 %v7695_v42  ;;  %v592_v40 = vld [vmem:[#allocation3 + $0xa68] sm:$0xff]  ;;  %v7623_v42 = vcombine.low %v580_v27, %v584_v28 }
 0x161   :  { %3622 = vmatprep.subr.bf16.mxu1 %v7704_v46  ;;  %v716_v41 = vld [vmem:[#allocation3 + $0xe48] sm:$0xff]  ;;  %v7632_v44 = vcombine.high %v588_v39, %v592_v40 }
 0x162   :  { %3582 = vmatpush1.bf16.msra.mxu0 %v7575_v49  ;;  %v720_v8 = vld [vmem:[#allocation3 + $0xe68] sm:$0xff] }
 0x163   :  { %3583 = vmatprep.subr.bf16.mxu0 %v7584_v51  ;;  %v596_v45 = vld [vmem:[#allocation3 + $0xa88] sm:$0xff]  ;;  %v7760_v48 = vcombine.high %v716_v41, %v720_v8  ;;  %v7759_v51 = vcombine.low %v716_v41, %v720_v8  ;;  %v265_v41 = vld [vmem:[#allocation3 + $0x30] sm:$0xff] }
 0x164   :  { %3623 = vmatpush1.bf16.msra.mxu1 %v7703_v50  ;;  %v600_v10 = vld [vmem:[#allocation3 + $0xaa8] sm:$0xff]  ;;  %v7631_v50 = vcombine.low %v588_v39, %v592_v40  ;;  %v261_v40 = vld [vmem:[#allocation3 + $0x10] sm:$0xff] }
 0x165   :  { %3624 = vmatprep.subr.bf16.mxu1 %v7712_v57  ;;  %v724_v46 = vld [vmem:[#allocation3 + $0xe88] sm:$0xff]  ;;  %v7640_v53 = vcombine.high %v596_v45, %v600_v10 }
 0x166   :  { %3584 = vmatpush1.bf16.msra.mxu0 %v7583_v60  ;;  %v728_v49 = vld [vmem:[#allocation3 + $0xea8] sm:$0xff] }
 0x167   :  { %3585 = vmatprep.subr.bf16.mxu0 %v7592_v62  ;;  %v604_v54 = vld [vmem:[#allocation3 + $0xac8] sm:$0xff]  ;;  %v7768_v59 = vcombine.high %v724_v46, %v728_v49  ;;  %v7767_v62 = vcombine.low %v724_v46, %v728_v49  ;;  %v273_v46 = vld [vmem:[#allocation3 + $0x70] sm:$0xff] }
 0x168   :  { %3625 = vmatpush1.bf16.msra.mxu1 %v7711_v61  ;;  %v608_v56 = vld [vmem:[#allocation3 + $0xae8] sm:$0xff]  ;;  %v7639_v61 = vcombine.low %v596_v45, %v600_v10  ;;  %v7306_v45 = vcombine.high %v261_v40, %v265_v41  ;;  %v269_v10 = vld [vmem:[#allocation3 + $0x50] sm:$0xff] }
 0x169   :  { %3626 = vmatprep.subr.bf16.mxu1 %v7720_v2  ;;  %v732_v57 = vld [vmem:[#allocation3 + $0xec8] sm:$0xff]  ;;  %v7648_v63 = vcombine.high %v604_v54, %v608_v56 }
 0x16a   :  { %3586 = vmatpush1.bf16.msra.mxu0 %v7591_v4  ;;  %v736_v60 = vld [vmem:[#allocation3 + $0xee8] sm:$0xff] }
 0x16b   :  { %3587 = vmatprep.subr.bf16.mxu0 %v7600_v6  ;;  %v612_v0 = vld [vmem:[#allocation3 + $0xb08] sm:$0xff]  ;;  %v7776_v3 = vcombine.high %v732_v57, %v736_v60  ;;  %v7775_v6 = vcombine.low %v732_v57, %v736_v60  ;;  %v281_v57 = vld [vmem:[#allocation3 + $0xb0] sm:$0xff] }
 0x16c   :  { %3627 = vmatpush1.bf16.msra.mxu1 %v7719_v5  ;;  %v616_v1 = vld [vmem:[#allocation3 + $0xb28] sm:$0xff]  ;;  %v7647_v5 = vcombine.low %v604_v54, %v608_v56  ;;  %v7314_v54 = vcombine.high %v269_v10, %v273_v46  ;;  %v277_v56 = vld [vmem:[#allocation3 + $0x90] sm:$0xff] }
 0x16d   :  { %3628 = vmatprep.subr.bf16.mxu1 %v7728_v31  ;;  %v740_v2 = vld [vmem:[#allocation3 + $0xf08] sm:$0xff]  ;;  %v7656_v11 = vcombine.high %v612_v0, %v616_v1 }
 0x16e   :  { %3588 = vmatpush1.bf16.msra.mxu0 %v7599_v36  ;;  %v744_v4 = vld [vmem:[#allocation3 + $0xf28] sm:$0xff] }
 0x16f   :  { %3589 = vmatprep.subr.bf16.mxu0 %v7608_v16  ;;  %v620_v12 = vld [vmem:[#allocation3 + $0xb48] sm:$0xff]  ;;  %v7784_v35 = vcombine.high %v740_v2, %v744_v4  ;;  %v7783_v16 = vcombine.low %v740_v2, %v744_v4  ;;  %v289_v2 = vld [vmem:[#allocation3 + $0xf0] sm:$0xff] }
 0x170   :  { %3629 = vmatpush1.bf16.msra.mxu1 %v7727_v15  ;;  %v624_v14 = vld [vmem:[#allocation3 + $0xb68] sm:$0xff]  ;;  %v7655_v15 = vcombine.low %v612_v0, %v616_v1  ;;  %v7322_v0 = vcombine.high %v277_v56, %v281_v57  ;;  %v285_v1 = vld [vmem:[#allocation3 + $0xd0] sm:$0xff] }
 0x171   :  { %3630 = vmatprep.subr.bf16.mxu1 %v7736_v20  ;;  %v748_v31 = vld [vmem:[#allocation3 + $0xf48] sm:$0xff]  ;;  %v7664_v17 = vcombine.high %v620_v12, %v624_v14 }
 0x172   :  { %3590 = vmatpush1.bf16.msra.mxu0 %v7607_v24  ;;  %v752_v36 = vld [vmem:[#allocation3 + $0xf68] sm:$0xff] }
 0x173   :  { %3591 = vmatprep.subr.bf16.mxu0 %v7616_v26  ;;  %v628_v18 = vld [vmem:[#allocation3 + $0xb88] sm:$0xff]  ;;  %v7792_v23 = vcombine.high %v748_v31, %v752_v36  ;;  %v7791_v26 = vcombine.low %v748_v31, %v752_v36  ;;  %v297_v31 = vld [vmem:[#allocation3 + $0x130] sm:$0xff] }
 0x174   :  { %3631 = vmatpush1.bf16.msra.mxu1 %v7735_v25  ;;  %v632_v19 = vld [vmem:[#allocation3 + $0xba8] sm:$0xff]  ;;  %v7663_v25 = vcombine.low %v620_v12, %v624_v14  ;;  %v7330_v12 = vcombine.high %v285_v1, %v289_v2  ;;  %v293_v14 = vld [vmem:[#allocation3 + $0x110] sm:$0xff] }
 0x175   :  { %3632 = vmatprep.subr.bf16.mxu1 %v7744_v29  ;;  %v756_v20 = vld [vmem:[#allocation3 + $0xf88] sm:$0xff]  ;;  %v7672_v27 = vcombine.high %v628_v18, %v632_v19 }
 0x176   :  { %3592 = vmatpush1.bf16.msra.mxu0 %v7615_v34  ;;  %v760_v24 = vld [vmem:[#allocation3 + $0xfa8] sm:$0xff] }
 0x177   :  { %3593 = vmatprep.subr.bf16.mxu0 %v7624_v38  ;;  %v636_v28 = vld [vmem:[#allocation3 + $0xbc8] sm:$0xff]  ;;  %v7800_v33 = vcombine.high %v756_v20, %v760_v24  ;;  %v7799_v38 = vcombine.low %v756_v20, %v760_v24  ;;  %v305_v20 = vld [vmem:[#allocation3 + $0x170] sm:$0xff] }
 0x178   :  { %3633 = vmatpush1.bf16.msra.mxu1 %v7743_v37  ;;  %v640_v29 = vld [vmem:[#allocation3 + $0xbe8] sm:$0xff]  ;;  %v7671_v37 = vcombine.low %v628_v18, %v632_v19  ;;  %v7338_v18 = vcombine.high %v293_v14, %v297_v31  ;;  %v301_v19 = vld [vmem:[#allocation3 + $0x150] sm:$0xff] }
 0x179   :  { %3634 = vmatprep.subr.bf16.mxu1 %v7752_v7  ;;  %v764_v32 = vld [vmem:[#allocation3 + $0xfc8] sm:$0xff]  ;;  %v7680_v39 = vcombine.high %v636_v28, %v640_v29  ;;  %v389_v7 = vld [vmem:[#allocation3 + $0x410] sm:$0xff] }
 0x17a   :  { %3594 = vmatpush1.bf16.msra.mxu0 %v7623_v42  ;;  %v768_v34 = vld [vmem:[#allocation3 + $0xfe8] sm:$0xff]  ;;  %v393_v42 = vld [vmem:[#allocation3 + $0x430] sm:$0xff] }
 0x17b   :  { %3595 = vmatprep.subr.bf16.mxu0 %v7632_v44  ;;  %v7808_v8 = vcombine.high %v764_v32, %v768_v34  ;;  %v7807_v44 = vcombine.low %v764_v32, %v768_v34  ;;  %v7434_v49 = vcombine.high %v389_v7, %v393_v42  ;;  %v313_v32 = vld [vmem:[#allocation3 + $0x1b0] sm:$0xff] }
 0x17c   :  { %3635 = vmatpush1.bf16.msra.mxu1 %v7751_v58  ;;  %v7679_v58 = vcombine.low %v636_v28, %v640_v29  ;;  %v7346_v28 = vcombine.high %v301_v19, %v305_v20  ;;  %v309_v29 = vld [vmem:[#allocation3 + $0x190] sm:$0xff] }
 0x17d   :  { %3636 = vmatprep.subr.bf16.mxu1 %v7760_v48  ;;  %v397_v48 = vld [vmem:[#allocation3 + $0x450] sm:$0xff] }
 0x17e   :  { %3596 = vmatpush1.bf16.msra.mxu0 %v7631_v50  ;;  %v401_v50 = vld [vmem:[#allocation3 + $0x470] sm:$0xff] }
 0x17f   :  { %3597 = vmatprep.subr.bf16.mxu0 %v7640_v53  ;;  %v7433_v53 = vcombine.low %v389_v7, %v393_v42  ;;  %v7442_v60 = vcombine.high %v397_v48, %v401_v50  ;;  %v321_v7 = vld [vmem:[#allocation3 + $0x1f0] sm:$0xff] }
 0x180   :  { %3637 = vmatpush1.bf16.msra.mxu1 %v7759_v51  ;;  %v7305_v51 = vcombine.low %v261_v40, %v265_v41  ;;  %v7354_v40 = vcombine.high %v309_v29, %v313_v32  ;;  %v317_v41 = vld [vmem:[#allocation3 + $0x1d0] sm:$0xff] }
 0x181   :  { %3638 = vmatprep.subr.bf16.mxu1 %v7768_v59  ;;  %v405_v59 = vld [vmem:[#allocation3 + $0x490] sm:$0xff] }
 0x182   :  { %3598 = vmatpush1.bf16.msra.mxu0 %v7639_v61  ;;  %v409_v61 = vld [vmem:[#allocation3 + $0x4b0] sm:$0xff] }
 0x183   :  { %3599 = vmatprep.subr.bf16.mxu0 %v7648_v63  ;;  %v7441_v63 = vcombine.low %v397_v48, %v401_v50  ;;  %v7450_v4 = vcombine.high %v405_v59, %v409_v61  ;;  %v7353_v50 = vcombine.low %v309_v29, %v313_v32 }
 0x184   :  { %3639 = vmatpush1.bf16.msra.mxu1 %v7767_v62  ;;  %v7313_v62 = vcombine.low %v269_v10, %v273_v46 }
 0x185   :  { %3640 = vmatprep.subr.bf16.mxu1 %v7776_v3  ;;  %v413_v3 = vld [vmem:[#allocation3 + $0x4d0] sm:$0xff] }
 0x186   :  { %3600 = vmatpush1.bf16.msra.mxu0 %v7647_v5  ;;  %v417_v5 = vld [vmem:[#allocation3 + $0x4f0] sm:$0xff] }
 0x187   :  { %3601 = vmatprep.subr.bf16.mxu0 %v7656_v11  ;;  %v7449_v11 = vcombine.low %v405_v59, %v409_v61  ;;  %v7458_v36 = vcombine.high %v413_v3, %v417_v5  ;;  %v329_v59 = vld [vmem:[#allocation3 + $0x230] sm:$0xff] }
 0x188   :  { %3641 = vmatpush1.bf16.msra.mxu1 %v7775_v6  ;;  %v7321_v6 = vcombine.low %v277_v56, %v281_v57  ;;  %v7362_v56 = vcombine.high %v317_v41, %v321_v7  ;;  %v325_v57 = vld [vmem:[#allocation3 + $0x210] sm:$0xff] }
 0x189   :  { %3642 = vmatprep.subr.bf16.mxu1 %v7784_v35  ;;  %v421_v35 = vld [vmem:[#allocation3 + $0x510] sm:$0xff] }
 0x18a   :  { %3602 = vmatpush1.bf16.msra.mxu0 %v7655_v15  ;;  %v425_v15 = vld [vmem:[#allocation3 + $0x530] sm:$0xff] }
 0x18b   :  { %3603 = vmatprep.subr.bf16.mxu0 %v7664_v17  ;;  %v7457_v17 = vcombine.low %v413_v3, %v417_v5  ;;  %v7466_v24 = vcombine.high %v421_v35, %v425_v15  ;;  %v7370_v3 = vcombine.high %v325_v57, %v329_v59  ;;  %v337_v5 = vld [vmem:[#allocation3 + $0x270] sm:$0xff] }
 0x18c   :  { %3643 = vmatpush1.bf16.msra.mxu1 %v7783_v16  ;;  %v7329_v16 = vcombine.low %v285_v1, %v289_v2  ;;  %v7361_v1 = vcombine.low %v317_v41, %v321_v7 }
 0x18d   :  { %3644 = vmatprep.subr.bf16.mxu1 %v7792_v23  ;;  %v429_v23 = vld [vmem:[#allocation3 + $0x550] sm:$0xff] }
 0x18e   :  { %3604 = vmatpush1.bf16.msra.mxu0 %v7663_v25  ;;  %v433_v25 = vld [vmem:[#allocation3 + $0x570] sm:$0xff] }
 0x18f   :  { %3605 = vmatprep.subr.bf16.mxu0 %v7672_v27  ;;  %v7465_v27 = vcombine.low %v421_v35, %v425_v15  ;;  %v7474_v34 = vcombine.high %v429_v23, %v433_v25  ;;  %v345_v15 = vld [vmem:[#allocation3 + $0x2b0] sm:$0xff] }
 0x190   :  { %3645 = vmatpush1.bf16.msra.mxu1 %v7791_v26  ;;  %v7337_v26 = vcombine.low %v293_v14, %v297_v31  ;;  %v7369_v14 = vcombine.low %v325_v57, %v329_v59  ;;  %v501_v57 = vld [vmem:[#allocation3 + $0x790] sm:$0xff] }
 0x191   :  { %3646 = vmatprep.subr.bf16.mxu1 %v7800_v33  ;;  %v437_v33 = vld [vmem:[#allocation3 + $0x590] sm:$0xff] }
 0x192   :  { %3606 = vmatpush1.bf16.msra.mxu0 %v7671_v37  ;;  %v441_v37 = vld [vmem:[#allocation3 + $0x5b0] sm:$0xff] }
 0x193   :  { %3607 = vmatprep.subr.bf16.mxu0 %v7680_v39  ;;  %v7473_v39 = vcombine.low %v429_v23, %v433_v25  ;;  %v353_v25 = vld [vmem:[#allocation3 + $0x2f0] sm:$0xff] }
 0x194   :  { %3647 = vmatpush1.bf16.msra.mxu1 %v7799_v38  ;;  %v7345_v38 = vcombine.low %v301_v19, %v305_v20  ;;  %v505_v59 = vld [vmem:[#allocation3 + $0x7b0] sm:$0xff] }
 0x195   :  { %3648 = vmatprep.subr.bf16.mxu1 %v7808_v8  ;;  %v445_v8 = vld [vmem:[#allocation3 + $0x5d0] sm:$0xff] }
 0x196   :  { %3608 = vmatpush1.bf16.msra.mxu0 %v7679_v58  ;;  %v7482_v58 = vcombine.high %v437_v33, %v441_v37 }
 0x197   :  { %3659 = vmatprep.subr.bf16.mxu0 %v7306_v45 }
 0x198   :  { %3649 = vmatpush1.bf16.msra.mxu1 %v7807_v44  ;;  %v449_v44 = vld [vmem:[#allocation3 + $0x5f0] sm:$0xff] }
 0x199   :  { %3700 = vmatprep.subr.bf16.mxu1 %v7434_v49  ;;  %3610 = vmatmul.mubr.bf16.vlgmr.msra.gmra.mrb[12].mxu0 %v9420_v13  ;;  %v7489_v2 = vcombine.low %v445_v8, %v449_v44 }
 0x19a   :  { %3660 = vmatpush1.bf16.msra.mxu0 %v7305_v51  ;;  %3691 = vmatprep.mubr.bf16.mxu0 %v9366_v21 }
 0x19b   :  { %3651 = vmatmul.mubr.bf16.vlgmr.msra.gmra.mrb[12].mxu1 %v9422_v30  ;;  %3661 = vmatprep.subr.bf16.mxu0 %v7314_v54  ;;  %v7481_v54 = vcombine.low %v437_v33, %v441_v37  ;;  %v357_v37 = vld [vmem:[#allocation3 + $0x310] sm:$0xff] }
 0x19c   :  { %3701 = vmatpush1.bf16.msra.mxu1 %v7433_v53  ;;  %3732 = vmatprep.mubr.bf16.mxu1 %v9368_v22 }
 0x19d   :  { %3702 = vmatprep.subr.bf16.mxu1 %v7442_v60  ;;  %v453_v60 = vld [vmem:[#allocation3 + $0x610] sm:$0xff] }
 0x19e   :  { %3662 = vmatpush1.bf16.msra.mxu0 %v7313_v62  ;;  %v7490_v62 = vcombine.high %v445_v8, %v449_v44  ;;  %v369_v44 = vld [vmem:[#allocation3 + $0x370] sm:$0xff] }
 0x19f   :  { %3663 = vmatprep.subr.bf16.mxu0 %v7322_v0 }
 0x1a0   :  { %3703 = vmatpush1.bf16.msra.mxu1 %v7441_v63  ;;  %v457_v63 = vld [vmem:[#allocation3 + $0x630] sm:$0xff] }
 0x1a1   :  { %3704 = vmatprep.subr.bf16.mxu1 %v7450_v4  ;;  %v333_v4 = vld [vmem:[#allocation3 + $0x250] sm:$0xff]  ;;  %v7497_v31 = vcombine.low %v453_v60, %v457_v63 }
 0x1a2   :  { %3664 = vmatpush1.bf16.msra.mxu0 %v7321_v6  ;;  %v461_v6 = vld [vmem:[#allocation3 + $0x650] sm:$0xff]  ;;  %v7378_v35 = vcombine.high %v333_v4, %v337_v5  ;;  %v7377_v19 = vcombine.low %v333_v4, %v337_v5  ;;  %v7545_v5 = vcombine.low %v501_v57, %v505_v59 }
 0x1a3   :  { %3665 = vmatprep.subr.bf16.mxu0 %v7330_v12  ;;  %v465_v12 = vld [vmem:[#allocation3 + $0x670] sm:$0xff] }
 0x1a4   :  { %3705 = vmatpush1.bf16.msra.mxu1 %v7449_v11  ;;  %v7498_v11 = vcombine.high %v453_v60, %v457_v63  ;;  %v7505_v20 = vcombine.low %v461_v6, %v465_v12  ;;  %v7546_v63 = vcombine.high %v501_v57, %v505_v59  ;;  %v557_v59 = vld [vmem:[#allocation3 + $0x950] sm:$0xff] }
 0x1a5   :  { %3706 = vmatprep.subr.bf16.mxu1 %v7458_v36  ;;  %v341_v36 = vld [vmem:[#allocation3 + $0x290] sm:$0xff] }
 0x1a6   :  { %3666 = vmatpush1.bf16.msra.mxu0 %v7329_v16  ;;  %v469_v16 = vld [vmem:[#allocation3 + $0x690] sm:$0xff]  ;;  %v7386_v23 = vcombine.high %v341_v36, %v345_v15  ;;  %v7385_v29 = vcombine.low %v341_v36, %v345_v15 }
 0x1a7   :  { %3667 = vmatprep.subr.bf16.mxu0 %v7338_v18  ;;  %v473_v18 = vld [vmem:[#allocation3 + $0x6b0] sm:$0xff] }
 0x1a8   :  { %3707 = vmatpush1.bf16.msra.mxu1 %v7457_v17  ;;  %v7506_v17 = vcombine.high %v461_v6, %v465_v12  ;;  %v7513_v32 = vcombine.low %v469_v16, %v473_v18  ;;  %v517_v12 = vld [vmem:[#allocation3 + $0x810] sm:$0xff] }
 0x1a9   :  { %3708 = vmatprep.subr.bf16.mxu1 %v7466_v24  ;;  %v349_v24 = vld [vmem:[#allocation3 + $0x2d0] sm:$0xff] }
 0x1aa   :  { %3668 = vmatpush1.bf16.msra.mxu0 %v7337_v26  ;;  %v477_v26 = vld [vmem:[#allocation3 + $0x6d0] sm:$0xff]  ;;  %v7394_v33 = vcombine.high %v349_v24, %v353_v25  ;;  %v7393_v41 = vcombine.low %v349_v24, %v353_v25 }
 0x1ab   :  { %3669 = vmatprep.subr.bf16.mxu0 %v7346_v28  ;;  %v481_v28 = vld [vmem:[#allocation3 + $0x6f0] sm:$0xff] }
 0x1ac   :  { %3709 = vmatpush1.bf16.msra.mxu1 %v7465_v27  ;;  %v3365_v42 = vpop.f32.mrb[0].mxu0  ;;  %v7514_v27 = vcombine.high %v469_v16, %v473_v18  ;;  %v7521_v7 = vcombine.low %v477_v26, %v481_v28  ;;  %v525_v18 = vld [vmem:[#allocation3 + $0x850] sm:$0xff] }
 0x1ad   :  { %3710 = vmatprep.subr.bf16.mxu1 %v7474_v34  ;;  %v3367_v10 = vpop.f32.mrb[1].mxu0  ;;  %v7522_v34 = vcombine.high %v477_v26, %v481_v28  ;;  %v533_v28 = vld [vmem:[#allocation3 + $0x890] sm:$0xff] }
 0x1ae   :  { %v3406_v45 = vpop.f32.mrb[0].mxu1  ;;  %v3369_v49 = vpop.f32.mrb[2].mxu0  ;;  %3670 = vmatpush1.bf16.msra.mxu0 %v7345_v38  ;;  %v361_v38 = vld [vmem:[#allocation3 + $0x330] sm:$0xff] }
 0x1af   :  { %v9436_v46 = vadd.f32 %v3406_v45, %v3365_v42  ;;  %v3408_v48 = vpop.f32.mrb[1].mxu1  ;;  %v3370_v53 = vpop.f32.mrb[3].mxu0  ;;  %3671 = vmatprep.subr.bf16.mxu0 %v7354_v40  ;;  %v489_v40 = vld [vmem:[#allocation3 + $0x730] sm:$0xff]  ;;  %v7402_v8 = vcombine.high %v357_v37, %v361_v38 }
 0x1b0   :  { %v9438_v51 = vadd.f32 %v3408_v48, %v3367_v10  ;;  %3711 = vmatpush1.bf16.msra.mxu1 %v7473_v39  ;;  %v3410_v61 = vpop.f32.mrb[2].mxu1  ;;  %v485_v39 = vld [vmem:[#allocation3 + $0x710] sm:$0xff]  ;;  %v7401_v48 = vcombine.low %v357_v37, %v361_v38 }
 0x1b1   :  { %3712 = vmatprep.subr.bf16.mxu1 %v7482_v58  ;;  %v3411_v0 = vpop.f32.mrb[3].mxu1  ;;  %v7530_v42 = vcombine.high %v485_v39, %v489_v40  ;;  %v365_v58 = vld [vmem:[#allocation3 + $0x350] sm:$0xff]  ;;  %v7529_v49 = vcombine.low %v485_v39, %v489_v40 }
 0x1b2   :  { %3672 = vmatpush1.bf16.msra.mxu0 %v7353_v50  ;;  %v493_v45 = vld [vmem:[#allocation3 + $0x750] sm:$0xff]  ;;  %v7410_v50 = vcombine.high %v365_v58, %v369_v44  ;;  %v7409_v60 = vcombine.low %v365_v58, %v369_v44 }
 0x1b3   :  { %3673 = vmatprep.subr.bf16.mxu0 %v7362_v56  ;;  %v497_v10 = vld [vmem:[#allocation3 + $0x770] sm:$0xff] }
 0x1b4   :  { %3713 = vmatpush1.bf16.msra.mxu1 %v7481_v54  ;;  %v7538_v53 = vcombine.high %v493_v45, %v497_v10  ;;  %v373_v54 = vld [vmem:[#allocation3 + $0x390] sm:$0xff]  ;;  %v7537_v61 = vcombine.low %v493_v45, %v497_v10 }
 0x1b5   :  { %3714 = vmatprep.subr.bf16.mxu1 %v7490_v62  ;;  %v377_v56 = vld [vmem:[#allocation3 + $0x3b0] sm:$0xff] }
 0x1b6   :  { %3674 = vmatpush1.bf16.msra.mxu0 %v7361_v1  ;;  %v7418_v62 = vcombine.high %v373_v54, %v377_v56  ;;  %v381_v0 = vld [vmem:[#allocation3 + $0x3d0] sm:$0xff]  ;;  %v7417_v4 = vcombine.low %v373_v54, %v377_v56 }
 0x1b7   :  { %3675 = vmatprep.subr.bf16.mxu0 %v7370_v3  ;;  %v385_v1 = vld [vmem:[#allocation3 + $0x3f0] sm:$0xff] }
 0x1b8   :  { %3715 = vmatpush1.bf16.msra.mxu1 %v7489_v2  ;;  %v509_v2 = vld [vmem:[#allocation3 + $0x7d0] sm:$0xff]  ;;  %v7426_v6 = vcombine.high %v381_v0, %v385_v1  ;;  %v7425_v36 = vcombine.low %v381_v0, %v385_v1 }
 0x1b9   :  { %3716 = vmatprep.subr.bf16.mxu1 %v7498_v11  ;;  %v513_v3 = vld [vmem:[#allocation3 + $0x7f0] sm:$0xff] }
 0x1ba   :  { %3676 = vmatpush1.bf16.msra.mxu0 %v7369_v14  ;;  %v7554_v11 = vcombine.high %v509_v2, %v513_v3  ;;  %v521_v14 = vld [vmem:[#allocation3 + $0x830] sm:$0xff]  ;;  %v7553_v15 = vcombine.low %v509_v2, %v513_v3 }
 0x1bb   :  { %3677 = vmatprep.subr.bf16.mxu0 %v7378_v35  ;;  %v649_v35 = vld [vmem:[#allocation3 + $0xc30] sm:$0xff]  ;;  %v7562_v16 = vcombine.high %v517_v12, %v521_v14  ;;  %v7561_v24 = vcombine.low %v517_v12, %v521_v14 }
 0x1bc   :  { %3717 = vmatpush1.bf16.msra.mxu1 %v7497_v31  ;;  %v645_v31 = vld [vmem:[#allocation3 + $0xc10] sm:$0xff] }
 0x1bd   :  { %3718 = vmatprep.subr.bf16.mxu1 %v7506_v17  ;;  %v7690_v17 = vcombine.high %v645_v31, %v649_v35  ;;  %v7689_v25 = vcombine.low %v645_v31, %v649_v35  ;;  %v541_v40 = vld [vmem:[#allocation3 + $0x8d0] sm:$0xff] }
 0x1be   :  { %3678 = vmatpush1.bf16.msra.mxu0 %v7377_v19  ;;  %v529_v19 = vld [vmem:[#allocation3 + $0x870] sm:$0xff] }
 0x1bf   :  { %3679 = vmatprep.subr.bf16.mxu0 %v7386_v23  ;;  %v657_v23 = vld [vmem:[#allocation3 + $0xc70] sm:$0xff]  ;;  %v7570_v26 = vcombine.high %v525_v18, %v529_v19 }
 0x1c0   :  { %3719 = vmatpush1.bf16.msra.mxu1 %v7505_v20  ;;  %v653_v20 = vld [vmem:[#allocation3 + $0xc50] sm:$0xff] }
 0x1c1   :  { %3720 = vmatprep.subr.bf16.mxu1 %v7514_v27  ;;  %v7698_v27 = vcombine.high %v653_v20, %v657_v23  ;;  %v7697_v37 = vcombine.low %v653_v20, %v657_v23  ;;  %v549_v10 = vld [vmem:[#allocation3 + $0x910] sm:$0xff] }
 0x1c2   :  { %3680 = vmatpush1.bf16.msra.mxu0 %v7385_v29  ;;  %v537_v29 = vld [vmem:[#allocation3 + $0x8b0] sm:$0xff] }
 0x1c3   :  { %3681 = vmatprep.subr.bf16.mxu0 %v7394_v33  ;;  %v665_v33 = vld [vmem:[#allocation3 + $0xcb0] sm:$0xff]  ;;  %v7578_v38 = vcombine.high %v533_v28, %v537_v29 }
 0x1c4   :  { %3721 = vmatpush1.bf16.msra.mxu1 %v7513_v32  ;;  %v661_v32 = vld [vmem:[#allocation3 + $0xc90] sm:$0xff] }
 0x1c5   :  { %3722 = vmatprep.subr.bf16.mxu1 %v7522_v34  ;;  %v7569_v34 = vcombine.low %v525_v18, %v529_v19  ;;  %v7706_v39 = vcombine.high %v661_v32, %v665_v33  ;;  %v7705_v58 = vcombine.low %v661_v32, %v665_v33  ;;  %v565_v3 = vld [vmem:[#allocation3 + $0x990] sm:$0xff] }
 0x1c6   :  { %3682 = vmatpush1.bf16.msra.mxu0 %v7393_v41  ;;  %v545_v41 = vld [vmem:[#allocation3 + $0x8f0] sm:$0xff] }
 0x1c7   :  { %3683 = vmatprep.subr.bf16.mxu0 %v7402_v8  ;;  %v673_v8 = vld [vmem:[#allocation3 + $0xcf0] sm:$0xff]  ;;  %v7586_v44 = vcombine.high %v541_v40, %v545_v41 }
 0x1c8   :  { %3723 = vmatpush1.bf16.msra.mxu1 %v7521_v7  ;;  %v669_v7 = vld [vmem:[#allocation3 + $0xcd0] sm:$0xff] }
 0x1c9   :  { %3724 = vmatprep.subr.bf16.mxu1 %v7530_v42  ;;  %v7577_v42 = vcombine.low %v533_v28, %v537_v29  ;;  %v7714_v45 = vcombine.high %v669_v7, %v673_v8  ;;  %v7713_v54 = vcombine.low %v669_v7, %v673_v8  ;;  %v701_v19 = vld [vmem:[#allocation3 + $0xdd0] sm:$0xff] }
 0x1ca   :  { %3684 = vmatpush1.bf16.msra.mxu0 %v7401_v48  ;;  %v553_v48 = vld [vmem:[#allocation3 + $0x930] sm:$0xff] }
 0x1cb   :  { %3685 = vmatprep.subr.bf16.mxu0 %v7410_v50  ;;  %v681_v50 = vld [vmem:[#allocation3 + $0xd30] sm:$0xff]  ;;  %v7594_v56 = vcombine.high %v549_v10, %v553_v48 }
 0x1cc   :  { %3725 = vmatpush1.bf16.msra.mxu1 %v7529_v49  ;;  %v677_v49 = vld [vmem:[#allocation3 + $0xd10] sm:$0xff] }
 0x1cd   :  { %3726 = vmatprep.subr.bf16.mxu1 %v7538_v53  ;;  %v7585_v53 = vcombine.low %v541_v40, %v545_v41  ;;  %v7722_v57 = vcombine.high %v677_v49, %v681_v50  ;;  %v7721_v0 = vcombine.low %v677_v49, %v681_v50  ;;  %v705_v20 = vld [vmem:[#allocation3 + $0xdf0] sm:$0xff] }
 0x1ce   :  { %3686 = vmatpush1.bf16.msra.mxu0 %v7409_v60  ;;  %v561_v60 = vld [vmem:[#allocation3 + $0x970] sm:$0xff]  ;;  %v7745_v7 = vcombine.low %v701_v19, %v705_v20 }
 0x1cf   :  { %3687 = vmatprep.subr.bf16.mxu0 %v7418_v62  ;;  %v689_v62 = vld [vmem:[#allocation3 + $0xd70] sm:$0xff]  ;;  %v7602_v1 = vcombine.high %v557_v59, %v561_v60 }
 0x1d0   :  { %3727 = vmatpush1.bf16.msra.mxu1 %v7537_v61  ;;  %v685_v61 = vld [vmem:[#allocation3 + $0xd50] sm:$0xff] }
 0x1d1   :  { %3728 = vmatprep.subr.bf16.mxu1 %v7546_v63  ;;  %v7593_v63 = vcombine.low %v549_v10, %v553_v48  ;;  %v7730_v2 = vcombine.high %v685_v61, %v689_v62  ;;  %v7729_v12 = vcombine.low %v685_v61, %v689_v62  ;;  %v713_v40 = vld [vmem:[#allocation3 + $0xe30] sm:$0xff] }
 0x1d2   :  { %3688 = vmatpush1.bf16.msra.mxu0 %v7417_v4  ;;  %v569_v4 = vld [vmem:[#allocation3 + $0x9b0] sm:$0xff] }
 0x1d3   :  { %3689 = vmatprep.subr.bf16.mxu0 %v7426_v6  ;;  %v697_v6 = vld [vmem:[#allocation3 + $0xdb0] sm:$0xff]  ;;  %v7610_v14 = vcombine.high %v565_v3, %v569_v4 }
 0x1d4   :  { %3729 = vmatpush1.bf16.msra.mxu1 %v7545_v5  ;;  %v693_v5 = vld [vmem:[#allocation3 + $0xd90] sm:$0xff] }
 0x1d5   :  { %3730 = vmatprep.subr.bf16.mxu1 %v7554_v11  ;;  %v7601_v11 = vcombine.low %v557_v59, %v561_v60  ;;  %v7738_v35 = vcombine.high %v693_v5, %v697_v6  ;;  %v7737_v29 = vcombine.low %v693_v5, %v697_v6  ;;  %v721_v10 = vld [vmem:[#allocation3 + $0xe70] sm:$0xff] }
 0x1d6   :  { %3690 = vmatpush1.bf16.msra.mxu0 %v7425_v36  ;;  %v573_v36 = vld [vmem:[#allocation3 + $0x9d0] sm:$0xff] }
 0x1d7   :  { %3741 = vmatprep.subr.bf16.mxu0 %v7562_v16  ;;  %v729_v59 = vld [vmem:[#allocation3 + $0xeb0] sm:$0xff] }
 0x1d8   :  { %3731 = vmatpush1.bf16.msra.mxu1 %v7553_v15  ;;  %v577_v15 = vld [vmem:[#allocation3 + $0x9f0] sm:$0xff] }
 0x1d9   :  { %3782 = vmatprep.subr.bf16.mxu1 %v7690_v17  ;;  %3692 = vmatmul.mubr.bf16.vlgmr.msra.gmra.mrb[16].mxu0 %v9402_v43  ;;  %v7618_v32 = vcombine.high %v573_v36, %v577_v15  ;;  %v7617_v41 = vcombine.low %v573_v36, %v577_v15 }
 0x1da   :  { %3742 = vmatpush1.bf16.msra.mxu0 %v7561_v24  ;;  %3773 = vmatprep.mubr.bf16.mxu0 %v9408_v52 }
 0x1db   :  { %3733 = vmatmul.mubr.bf16.vlgmr.msra.gmra.mrb[16].mxu1 %v9406_v9  ;;  %3743 = vmatprep.subr.bf16.mxu0 %v7570_v26  ;;  %v7609_v26 = vcombine.low %v565_v3, %v569_v4  ;;  %v737_v3 = vld [vmem:[#allocation3 + $0xef0] sm:$0xff] }
 0x1dc   :  { %3783 = vmatpush1.bf16.msra.mxu1 %v7689_v25  ;;  %3814 = vmatprep.mubr.bf16.mxu1 %v9411_v55 }
 0x1dd   :  { %3784 = vmatprep.subr.bf16.mxu1 %v7698_v27 }
 0x1de   :  { %3744 = vmatpush1.bf16.msra.mxu0 %v7569_v34 }
 0x1df   :  { %3745 = vmatprep.subr.bf16.mxu0 %v7578_v38  ;;  %v585_v38 = vld [vmem:[#allocation3 + $0xa30] sm:$0xff] }
 0x1e0   :  { %3785 = vmatpush1.bf16.msra.mxu1 %v7697_v37  ;;  %v581_v37 = vld [vmem:[#allocation3 + $0xa10] sm:$0xff] }
 0x1e1   :  { %3786 = vmatprep.subr.bf16.mxu1 %v7706_v39  ;;  %v7626_v8 = vcombine.high %v581_v37, %v585_v38  ;;  %v7625_v48 = vcombine.low %v581_v37, %v585_v38 }
 0x1e2   :  { %3746 = vmatpush1.bf16.msra.mxu0 %v7577_v42 }
 0x1e3   :  { %3747 = vmatprep.subr.bf16.mxu0 %v7586_v44  ;;  %v593_v44 = vld [vmem:[#allocation3 + $0xa70] sm:$0xff] }
 0x1e4   :  { %3787 = vmatpush1.bf16.msra.mxu1 %v7705_v58  ;;  %v589_v58 = vld [vmem:[#allocation3 + $0xa50] sm:$0xff] }
 0x1e5   :  { %3788 = vmatprep.subr.bf16.mxu1 %v7714_v45  ;;  %v717_v45 = vld [vmem:[#allocation3 + $0xe50] sm:$0xff]  ;;  %v7634_v50 = vcombine.high %v589_v58, %v593_v44  ;;  %v7633_v60 = vcombine.low %v589_v58, %v593_v44 }
 0x1e6   :  { %3748 = vmatpush1.bf16.msra.mxu0 %v7585_v53  ;;  %v7762_v53 = vcombine.high %v717_v45, %v721_v10  ;;  %v7761_v61 = vcombine.low %v717_v45, %v721_v10  ;;  %v262_v10 = vld [vmem:[#allocation3 + $0x18] sm:$0xff] }
 0x1e7   :  { %3749 = vmatprep.subr.bf16.mxu0 %v7594_v56  ;;  %v601_v56 = vld [vmem:[#allocation3 + $0xab0] sm:$0xff] }
 0x1e8   :  { %3789 = vmatpush1.bf16.msra.mxu1 %v7713_v54  ;;  %v597_v54 = vld [vmem:[#allocation3 + $0xa90] sm:$0xff] }
 0x1e9   :  { %3790 = vmatprep.subr.bf16.mxu1 %v7722_v57  ;;  %v725_v57 = vld [vmem:[#allocation3 + $0xe90] sm:$0xff]  ;;  %v7642_v62 = vcombine.high %v597_v54, %v601_v56  ;;  %v7641_v4 = vcombine.low %v597_v54, %v601_v56 }
 0x1ea   :  { %3750 = vmatpush1.bf16.msra.mxu0 %v7593_v63  ;;  %v7770_v63 = vcombine.high %v725_v57, %v729_v59  ;;  %v7769_v5 = vcombine.low %v725_v57, %v729_v59  ;;  %v270_v59 = vld [vmem:[#allocation3 + $0x58] sm:$0xff] }
 0x1eb   :  { %3751 = vmatprep.subr.bf16.mxu0 %v7602_v1  ;;  %v609_v1 = vld [vmem:[#allocation3 + $0xaf0] sm:$0xff] }
 0x1ec   :  { %3791 = vmatpush1.bf16.msra.mxu1 %v7721_v0  ;;  %v3447_v31 = vpop.f32.mrb[4].mxu0  ;;  %v605_v0 = vld [vmem:[#allocation3 + $0xad0] sm:$0xff] }
 0x1ed   :  { %3792 = vmatprep.subr.bf16.mxu1 %v7730_v2  ;;  %v3448_v16 = vadd.f32 %v3447_v31, %v9436_v46  ;;  %v3449_v17 = vpop.f32.mrb[5].mxu0  ;;  %v7746_v46 = vcombine.high %v701_v19, %v705_v20  ;;  %v733_v2 = vld [vmem:[#allocation3 + $0xed0] sm:$0xff]  ;;  %v7650_v6 = vcombine.high %v605_v0, %v609_v1  ;;  %v7649_v36 = vcombine.low %v605_v0, %v609_v1 }
 0x1ee   :  { %v3488_v18 = vpop.f32.mrb[4].mxu1  ;;  %v3450_v23 = vadd.f32 %v3449_v17, %v9438_v51  ;;  %v3451_v24 = vpop.f32.mrb[6].mxu0  ;;  %3752 = vmatpush1.bf16.msra.mxu0 %v7601_v11  ;;  %v709_v51 = vld [vmem:[#allocation3 + $0xe10] sm:$0xff]  ;;  %v7778_v11 = vcombine.high %v733_v2, %v737_v3  ;;  %v7777_v15 = vcombine.low %v733_v2, %v737_v3  ;;  %v278_v3 = vld [vmem:[#allocation3 + $0x98] sm:$0xff] }
 0x1ef   :  { %v3490_v25 = vpop.f32.mrb[5].mxu1  ;;  %v9446_v27 = vadd.f32 %v3488_v18, %v3448_v16  ;;  %v3452_v28 = vpop.f32.mrb[7].mxu0  ;;  %3753 = vmatprep.subr.bf16.mxu0 %v7610_v14  ;;  %v7754_v42 = vcombine.high %v709_v51, %v713_v40  ;;  %v7753_v49 = vcombine.low %v709_v51, %v713_v40  ;;  %v617_v14 = vld [vmem:[#allocation3 + $0xb30] sm:$0xff] }
 0x1f0   :  { %3793 = vmatpush1.bf16.msra.mxu1 %v7729_v12  ;;  %v3492_v33 = vpop.f32.mrb[6].mxu1  ;;  %v9448_v34 = vadd.f32 %v3490_v25, %v3450_v23  ;;  %v613_v12 = vld [vmem:[#allocation3 + $0xb10] sm:$0xff] }
 0x1f1   :  { %3794 = vmatprep.subr.bf16.mxu1 %v7738_v35  ;;  %v3493_v39 = vpop.f32.mrb[7].mxu1  ;;  %v741_v31 = vld [vmem:[#allocation3 + $0xf10] sm:$0xff]  ;;  %v7658_v16 = vcombine.high %v613_v12, %v617_v14  ;;  %v7657_v24 = vcombine.low %v613_v12, %v617_v14 }
 0x1f2   :  { %3754 = vmatpush1.bf16.msra.mxu0 %v7609_v26  ;;  %v745_v35 = vld [vmem:[#allocation3 + $0xf30] sm:$0xff] }
 0x1f3   :  { %3755 = vmatprep.subr.bf16.mxu0 %v7618_v32  ;;  %v7786_v17 = vcombine.high %v741_v31, %v745_v35  ;;  %v621_v18 = vld [vmem:[#allocation3 + $0xb50] sm:$0xff]  ;;  %v7785_v25 = vcombine.low %v741_v31, %v745_v35  ;;  %v286_v35 = vld [vmem:[#allocation3 + $0xd8] sm:$0xff] }
 0x1f4   :  { %3795 = vmatpush1.bf16.msra.mxu1 %v7737_v29  ;;  %v625_v19 = vld [vmem:[#allocation3 + $0xb70] sm:$0xff] }
 0x1f5   :  { %3796 = vmatprep.subr.bf16.mxu1 %v7746_v46  ;;  %v749_v20 = vld [vmem:[#allocation3 + $0xf50] sm:$0xff]  ;;  %v7666_v26 = vcombine.high %v621_v18, %v625_v19  ;;  %v7665_v37 = vcombine.low %v621_v18, %v625_v19 }
 0x1f6   :  { %3756 = vmatpush1.bf16.msra.mxu0 %v7617_v41  ;;  %v753_v23 = vld [vmem:[#allocation3 + $0xf70] sm:$0xff] }
 0x1f7   :  { %3757 = vmatprep.subr.bf16.mxu0 %v7626_v8  ;;  %v7794_v28 = vcombine.high %v749_v20, %v753_v23  ;;  %v629_v29 = vld [vmem:[#allocation3 + $0xb90] sm:$0xff]  ;;  %v7793_v38 = vcombine.low %v749_v20, %v753_v23  ;;  %v294_v23 = vld [vmem:[#allocation3 + $0x118] sm:$0xff] }
 0x1f8   :  { %3797 = vmatpush1.bf16.msra.mxu1 %v7745_v7  ;;  %v633_v32 = vld [vmem:[#allocation3 + $0xbb0] sm:$0xff] }
 0x1f9   :  { %3798 = vmatprep.subr.bf16.mxu1 %v7754_v42  ;;  %v757_v33 = vld [vmem:[#allocation3 + $0xf90] sm:$0xff]  ;;  %v7674_v39 = vcombine.high %v629_v29, %v633_v32  ;;  %v7673_v42 = vcombine.low %v629_v29, %v633_v32  ;;  %v302_v32 = vld [vmem:[#allocation3 + $0x158] sm:$0xff] }
 0x1fa   :  { %3758 = vmatpush1.bf16.msra.mxu0 %v7625_v48  ;;  %v761_v46 = vld [vmem:[#allocation3 + $0xfb0] sm:$0xff]  ;;  %v266_v48 = vld [vmem:[#allocation3 + $0x38] sm:$0xff] }
 0x1fb   :  { %3759 = vmatprep.subr.bf16.mxu0 %v7634_v50  ;;  %v7802_v51 = vcombine.high %v757_v33, %v761_v46  ;;  %v637_v40 = vld [vmem:[#allocation3 + $0xbd0] sm:$0xff]  ;;  %v7801_v58 = vcombine.low %v757_v33, %v761_v46  ;;  %v394_v50 = vld [vmem:[#allocation3 + $0x438] sm:$0xff]  ;;  %v7308_v56 = vcombine.high %v262_v10, %v266_v48 }
 0x1fc   :  { %3799 = vmatpush1.bf16.msra.mxu1 %v7753_v49  ;;  %v641_v41 = vld [vmem:[#allocation3 + $0xbf0] sm:$0xff]  ;;  %v390_v49 = vld [vmem:[#allocation3 + $0x418] sm:$0xff] }
 0x1fd   :  { %3800 = vmatprep.subr.bf16.mxu1 %v7762_v53  ;;  %v765_v7 = vld [vmem:[#allocation3 + $0xfd0] sm:$0xff]  ;;  %v7682_v44 = vcombine.high %v637_v40, %v641_v41  ;;  %v7681_v53 = vcombine.low %v637_v40, %v641_v41  ;;  %v7436_v57 = vcombine.high %v390_v49, %v394_v50  ;;  %v7435_v0 = vcombine.low %v390_v49, %v394_v50  ;;  %v306_v33 = vld [vmem:[#allocation3 + $0x178] sm:$0xff] }
 0x1fe   :  { %3760 = vmatpush1.bf16.msra.mxu0 %v7633_v60  ;;  %v769_v8 = vld [vmem:[#allocation3 + $0xff0] sm:$0xff]  ;;  %v274_v60 = vld [vmem:[#allocation3 + $0x78] sm:$0xff] }
 0x1ff   :  { %3761 = vmatprep.subr.bf16.mxu0 %v7642_v62  ;;  %v7810_v45 = vcombine.high %v765_v7, %v769_v8  ;;  %v7809_v54 = vcombine.low %v765_v7, %v769_v8  ;;  %v402_v62 = vld [vmem:[#allocation3 + $0x478] sm:$0xff]  ;;  %v7316_v1 = vcombine.high %v270_v59, %v274_v60 }
 0x200   :  { %3801 = vmatpush1.bf16.msra.mxu1 %v7761_v61  ;;  %v398_v61 = vld [vmem:[#allocation3 + $0x458] sm:$0xff] }
 0x201   :  { %3802 = vmatprep.subr.bf16.mxu1 %v7770_v63  ;;  %v7307_v63 = vcombine.low %v262_v10, %v266_v48  ;;  %v7444_v2 = vcombine.high %v398_v61, %v402_v62  ;;  %v7443_v12 = vcombine.low %v398_v61, %v402_v62  ;;  %v430_v46 = vld [vmem:[#allocation3 + $0x558] sm:$0xff] }
 0x202   :  { %3762 = vmatpush1.bf16.msra.mxu0 %v7641_v4  ;;  %v282_v4 = vld [vmem:[#allocation3 + $0xb8] sm:$0xff] }
 0x203   :  { %3763 = vmatprep.subr.bf16.mxu0 %v7650_v6  ;;  %v410_v6 = vld [vmem:[#allocation3 + $0x4b8] sm:$0xff]  ;;  %v7324_v14 = vcombine.high %v278_v3, %v282_v4 }
 0x204   :  { %3803 = vmatpush1.bf16.msra.mxu1 %v7769_v5  ;;  %v406_v5 = vld [vmem:[#allocation3 + $0x498] sm:$0xff] }
 0x205   :  { %3804 = vmatprep.subr.bf16.mxu1 %v7778_v11  ;;  %v7315_v11 = vcombine.low %v270_v59, %v274_v60  ;;  %v7452_v31 = vcombine.high %v406_v5, %v410_v6  ;;  %v7451_v18 = vcombine.low %v406_v5, %v410_v6  ;;  %v310_v41 = vld [vmem:[#allocation3 + $0x198] sm:$0xff] }
 0x206   :  { %3764 = vmatpush1.bf16.msra.mxu0 %v7649_v36  ;;  %v290_v36 = vld [vmem:[#allocation3 + $0xf8] sm:$0xff] }
 0x207   :  { %3765 = vmatprep.subr.bf16.mxu0 %v7658_v16  ;;  %v418_v16 = vld [vmem:[#allocation3 + $0x4f8] sm:$0xff]  ;;  %v7332_v19 = vcombine.high %v286_v35, %v290_v36 }
 0x208   :  { %3805 = vmatpush1.bf16.msra.mxu1 %v7777_v15  ;;  %v414_v15 = vld [vmem:[#allocation3 + $0x4d8] sm:$0xff] }
 0x209   :  { %3806 = vmatprep.subr.bf16.mxu1 %v7786_v17  ;;  %v7323_v17 = vcombine.low %v278_v3, %v282_v4  ;;  %v7460_v20 = vcombine.high %v414_v15, %v418_v16  ;;  %v314_v7 = vld [vmem:[#allocation3 + $0x1b8] sm:$0xff] }
 0x20a   :  { %3766 = vmatpush1.bf16.msra.mxu0 %v7657_v24  ;;  %v298_v24 = vld [vmem:[#allocation3 + $0x138] sm:$0xff]  ;;  %v7355_v62 = vcombine.low %v310_v41, %v314_v7 }
 0x20b   :  { %3767 = vmatprep.subr.bf16.mxu0 %v7666_v26  ;;  %v426_v26 = vld [vmem:[#allocation3 + $0x538] sm:$0xff]  ;;  %v7340_v29 = vcombine.high %v294_v23, %v298_v24 }
 0x20c   :  { %3807 = vmatpush1.bf16.msra.mxu1 %v7785_v25  ;;  %v422_v25 = vld [vmem:[#allocation3 + $0x518] sm:$0xff] }
 0x20d   :  { %3808 = vmatprep.subr.bf16.mxu1 %v7794_v28  ;;  %v7331_v28 = vcombine.low %v286_v35, %v290_v36  ;;  %v438_v8 = vld [vmem:[#allocation3 + $0x598] sm:$0xff] }
 0x20e   :  { %3768 = vmatpush1.bf16.msra.mxu0 %v7665_v37  ;;  %v434_v37 = vld [vmem:[#allocation3 + $0x578] sm:$0xff] }
 0x20f   :  { %3769 = vmatprep.subr.bf16.mxu0 %v7674_v39  ;;  %v7467_v39 = vcombine.low %v422_v25, %v426_v26  ;;  %v7476_v40 = vcombine.high %v430_v46, %v434_v37  ;;  %v318_v49 = vld [vmem:[#allocation3 + $0x1d8] sm:$0xff] }
 0x210   :  { %3809 = vmatpush1.bf16.msra.mxu1 %v7793_v38  ;;  %v7339_v38 = vcombine.low %v294_v23, %v298_v24  ;;  %v322_v50 = vld [vmem:[#allocation3 + $0x1f8] sm:$0xff] }
 0x211   :  { %3810 = vmatprep.subr.bf16.mxu1 %v7802_v51  ;;  %v7348_v51 = vcombine.high %v302_v32, %v306_v33  ;;  %v326_v5 = vld [vmem:[#allocation3 + $0x218] sm:$0xff] }
 0x212   :  { %3770 = vmatpush1.bf16.msra.mxu0 %v7673_v42  ;;  %v442_v42 = vld [vmem:[#allocation3 + $0x5b8] sm:$0xff] }
 0x213   :  { %3771 = vmatprep.subr.bf16.mxu0 %v7682_v44  ;;  %v7475_v44 = vcombine.low %v430_v46, %v434_v37  ;;  %v7484_v48 = vcombine.high %v438_v8, %v442_v42  ;;  %v330_v6 = vld [vmem:[#allocation3 + $0x238] sm:$0xff] }
 0x214   :  { %3811 = vmatpush1.bf16.msra.mxu1 %v7801_v58  ;;  %v7347_v58 = vcombine.low %v302_v32, %v306_v33  ;;  %v7372_v36 = vcombine.high %v326_v5, %v330_v6  ;;  %v350_v37 = vld [vmem:[#allocation3 + $0x2d8] sm:$0xff] }
 0x215   :  { %3812 = vmatprep.subr.bf16.mxu1 %v7810_v45  ;;  %v7356_v45 = vcombine.high %v310_v41, %v314_v7 }
 0x216   :  { %3772 = vmatpush1.bf16.msra.mxu0 %v7681_v53 }
 0x217   :  { %3823 = vmatprep.subr.bf16.mxu0 %v7308_v56  ;;  %v446_v56 = vld [vmem:[#allocation3 + $0x5d8] sm:$0xff] }
 0x218   :  { %3813 = vmatpush1.bf16.msra.mxu1 %v7809_v54 }
 0x219   :  { %3864 = vmatprep.subr.bf16.mxu1 %v7436_v57  ;;  %3774 = vmatmul.mubr.bf16.vlgmr.msra.gmra.mrb[20].mxu0 %v9420_v13  ;;  %v450_v57 = vld [vmem:[#allocation3 + $0x5f8] sm:$0xff] }
 0x21a   :  { %3824 = vmatpush1.bf16.msra.mxu0 %v7307_v63  ;;  %3855 = vmatprep.mubr.bf16.mxu0 %v9366_v21  ;;  %v7459_v21 = vcombine.low %v414_v15, %v418_v16  ;;  %v7492_v4 = vcombine.high %v446_v56, %v450_v57  ;;  %v7491_v35 = vcombine.low %v446_v56, %v450_v57  ;;  %v334_v16 = vld [vmem:[#allocation3 + $0x258] sm:$0xff] }
 0x21b   :  { %3815 = vmatmul.mubr.bf16.vlgmr.msra.gmra.mrb[20].mxu1 %v9422_v30  ;;  %3825 = vmatprep.subr.bf16.mxu0 %v7316_v1  ;;  %v7483_v1 = vcombine.low %v438_v8, %v442_v42  ;;  %v358_v42 = vld [vmem:[#allocation3 + $0x318] sm:$0xff] }
 0x21c   :  { %3865 = vmatpush1.bf16.msra.mxu1 %v7435_v0  ;;  %3896 = vmatprep.mubr.bf16.mxu1 %v9368_v22  ;;  %v7468_v22 = vcombine.high %v422_v25, %v426_v26  ;;  %v342_v26 = vld [vmem:[#allocation3 + $0x298] sm:$0xff] }
 0x21d   :  { %3866 = vmatprep.subr.bf16.mxu1 %v7444_v2  ;;  %v7364_v2 = vcombine.high %v318_v49, %v322_v50  ;;  %v494_v56 = vld [vmem:[#allocation3 + $0x758] sm:$0xff] }
 0x21e   :  { %3826 = vmatpush1.bf16.msra.mxu0 %v7315_v11  ;;  %v498_v57 = vld [vmem:[#allocation3 + $0x778] sm:$0xff] }
 0x21f   :  { %3827 = vmatprep.subr.bf16.mxu0 %v7324_v14  ;;  %v458_v14 = vld [vmem:[#allocation3 + $0x638] sm:$0xff] }
 0x220   :  { %3867 = vmatpush1.bf16.msra.mxu1 %v7443_v12  ;;  %v454_v12 = vld [vmem:[#allocation3 + $0x618] sm:$0xff] }
 0x221   :  { %3868 = vmatprep.subr.bf16.mxu1 %v7452_v31  ;;  %v7363_v31 = vcombine.low %v318_v49, %v322_v50  ;;  %v7500_v15 = vcombine.high %v454_v12, %v458_v14  ;;  %v7499_v23 = vcombine.low %v454_v12, %v458_v14  ;;  %v382_v14 = vld [vmem:[#allocation3 + $0x3d8] sm:$0xff] }
 0x222   :  { %3828 = vmatpush1.bf16.msra.mxu0 %v7323_v17  ;;  %v338_v17 = vld [vmem:[#allocation3 + $0x278] sm:$0xff] }
 0x223   :  { %3829 = vmatprep.subr.bf16.mxu0 %v7332_v19  ;;  %v466_v19 = vld [vmem:[#allocation3 + $0x678] sm:$0xff]  ;;  %v7380_v24 = vcombine.high %v334_v16, %v338_v17 }
 0x224   :  { %3869 = vmatpush1.bf16.msra.mxu1 %v7451_v18  ;;  %v462_v18 = vld [vmem:[#allocation3 + $0x658] sm:$0xff] }
 0x225   :  { %3870 = vmatprep.subr.bf16.mxu1 %v7460_v20  ;;  %v7371_v20 = vcombine.low %v326_v5, %v330_v6  ;;  %v7508_v25 = vcombine.high %v462_v18, %v466_v19  ;;  %v7507_v32 = vcombine.low %v462_v18, %v466_v19  ;;  %v7539_v6 = vcombine.low %v494_v56, %v498_v57  ;;  %v518_v19 = vld [vmem:[#allocation3 + $0x818] sm:$0xff] }
 0x226   :  { %3830 = vmatpush1.bf16.msra.mxu0 %v7331_v28  ;;  %v346_v28 = vld [vmem:[#allocation3 + $0x2b8] sm:$0xff] }
 0x227   :  { %3831 = vmatprep.subr.bf16.mxu0 %v7340_v29  ;;  %v474_v29 = vld [vmem:[#allocation3 + $0x6b8] sm:$0xff]  ;;  %v7388_v33 = vcombine.high %v342_v26, %v346_v28 }
 0x228   :  { %3871 = vmatpush1.bf16.msra.mxu1 %v7459_v21  ;;  %v470_v21 = vld [vmem:[#allocation3 + $0x698] sm:$0xff] }
 0x229   :  { %3872 = vmatprep.subr.bf16.mxu1 %v7468_v22  ;;  %v7379_v22 = vcombine.low %v334_v16, %v338_v17  ;;  %v7516_v46 = vcombine.high %v470_v21, %v474_v29  ;;  %v7515_v41 = vcombine.low %v470_v21, %v474_v29  ;;  %v526_v29 = vld [vmem:[#allocation3 + $0x858] sm:$0xff] }
 0x22a   :  { %3832 = vmatpush1.bf16.msra.mxu0 %v7339_v38  ;;  %v354_v38 = vld [vmem:[#allocation3 + $0x2f8] sm:$0xff] }
 0x22b   :  { %3833 = vmatprep.subr.bf16.mxu0 %v7348_v51  ;;  %v482_v51 = vld [vmem:[#allocation3 + $0x6f8] sm:$0xff]  ;;  %v7396_v7 = vcombine.high %v350_v37, %v354_v38 }
 0x22c   :  { %3873 = vmatpush1.bf16.msra.mxu1 %v7467_v39  ;;  %v3529_v10 = vpop.f32.mrb[8].mxu0  ;;  %v478_v39 = vld [vmem:[#allocation3 + $0x6d8] sm:$0xff] }
 0x22d   :  { %3874 = vmatprep.subr.bf16.mxu1 %v7476_v40  ;;  %v3531_v54 = vpop.f32.mrb[9].mxu0  ;;  %v7387_v40 = vcombine.low %v342_v26, %v346_v28  ;;  %v7524_v8 = vcombine.high %v478_v39, %v482_v51 }
 0x22e   :  { %v3570_v53 = vpop.f32.mrb[8].mxu1  ;;  %v3533_v61 = vpop.f32.mrb[10].mxu0  ;;  %3834 = vmatpush1.bf16.msra.mxu0 %v7347_v58  ;;  %v362_v58 = vld [vmem:[#allocation3 + $0x338] sm:$0xff] }
 0x22f   :  { %v9454_v59 = vadd.f32 %v3570_v53, %v3529_v10  ;;  %v3572_v60 = vpop.f32.mrb[9].mxu1  ;;  %v3534_v0 = vpop.f32.mrb[11].mxu0  ;;  %3835 = vmatprep.subr.bf16.mxu0 %v7356_v45  ;;  %v490_v45 = vld [vmem:[#allocation3 + $0x738] sm:$0xff]  ;;  %v7395_v10 = vcombine.low %v350_v37, %v354_v38  ;;  %v7404_v49 = vcombine.high %v358_v42, %v362_v58 }
 0x230   :  { %v9456_v63 = vadd.f32 %v3572_v60, %v3531_v54  ;;  %3875 = vmatpush1.bf16.msra.mxu1 %v7475_v44  ;;  %v3574_v3 = vpop.f32.mrb[10].mxu1  ;;  %v486_v44 = vld [vmem:[#allocation3 + $0x718] sm:$0xff]  ;;  %v7403_v60 = vcombine.low %v358_v42, %v362_v58  ;;  %v7540_v0 = vcombine.high %v494_v56, %v498_v57 }
 0x231   :  { %3876 = vmatprep.subr.bf16.mxu1 %v7484_v48  ;;  %v3575_v11 = vpop.f32.mrb[11].mxu1  ;;  %v7523_v48 = vcombine.low %v478_v39, %v482_v51  ;;  %v7532_v50 = vcombine.high %v486_v44, %v490_v45  ;;  %v366_v53 = vld [vmem:[#allocation3 + $0x358] sm:$0xff]  ;;  %v7531_v61 = vcombine.low %v486_v44, %v490_v45 }
 0x232   :  { %3836 = vmatpush1.bf16.msra.mxu0 %v7355_v62  ;;  %v370_v54 = vld [vmem:[#allocation3 + $0x378] sm:$0xff] }
 0x233   :  { %3837 = vmatprep.subr.bf16.mxu0 %v7364_v2  ;;  %v7412_v62 = vcombine.high %v366_v53, %v370_v54  ;;  %v378_v2 = vld [vmem:[#allocation3 + $0x3b8] sm:$0xff]  ;;  %v7411_v5 = vcombine.low %v366_v53, %v370_v54 }
 0x234   :  { %3877 = vmatpush1.bf16.msra.mxu1 %v7483_v1  ;;  %v374_v1 = vld [vmem:[#allocation3 + $0x398] sm:$0xff] }
 0x235   :  { %3878 = vmatprep.subr.bf16.mxu1 %v7492_v4  ;;  %v502_v3 = vld [vmem:[#allocation3 + $0x798] sm:$0xff]  ;;  %v7420_v11 = vcombine.high %v374_v1, %v378_v2 }
 0x236   :  { %3838 = vmatpush1.bf16.msra.mxu0 %v7363_v31  ;;  %v506_v4 = vld [vmem:[#allocation3 + $0x7b8] sm:$0xff] }
 0x237   :  { %3839 = vmatprep.subr.bf16.mxu0 %v7372_v36  ;;  %v7548_v12 = vcombine.high %v502_v3, %v506_v4  ;;  %v386_v31 = vld [vmem:[#allocation3 + $0x3f8] sm:$0xff]  ;;  %v7547_v16 = vcombine.low %v502_v3, %v506_v4 }
 0x238   :  { %3879 = vmatpush1.bf16.msra.mxu1 %v7491_v35  ;;  %v510_v35 = vld [vmem:[#allocation3 + $0x7d8] sm:$0xff]  ;;  %v7428_v17 = vcombine.high %v382_v14, %v386_v31 }
 0x239   :  { %3880 = vmatprep.subr.bf16.mxu1 %v7500_v15  ;;  %v514_v36 = vld [vmem:[#allocation3 + $0x7f8] sm:$0xff]  ;;  %v7419_v15 = vcombine.low %v374_v1, %v378_v2 }
 0x23a   :  { %3840 = vmatpush1.bf16.msra.mxu0 %v7371_v20  ;;  %v7556_v18 = vcombine.high %v510_v35, %v514_v36  ;;  %v522_v20 = vld [vmem:[#allocation3 + $0x838] sm:$0xff]  ;;  %v7555_v26 = vcombine.low %v510_v35, %v514_v36 }
 0x23b   :  { %3841 = vmatprep.subr.bf16.mxu0 %v7380_v24  ;;  %v650_v24 = vld [vmem:[#allocation3 + $0xc38] sm:$0xff]  ;;  %v7564_v28 = vcombine.high %v518_v19, %v522_v20 }
 0x23c   :  { %3881 = vmatpush1.bf16.msra.mxu1 %v7499_v23  ;;  %v646_v23 = vld [vmem:[#allocation3 + $0xc18] sm:$0xff] }
 0x23d   :  { %3882 = vmatprep.subr.bf16.mxu1 %v7508_v25  ;;  %v7427_v25 = vcombine.low %v382_v14, %v386_v31  ;;  %v7692_v21 = vcombine.high %v646_v23, %v650_v24  ;;  %v7691_v37 = vcombine.low %v646_v23, %v650_v24  ;;  %v534_v51 = vld [vmem:[#allocation3 + $0x898] sm:$0xff] }
 0x23e   :  { %3842 = vmatpush1.bf16.msra.mxu0 %v7379_v22  ;;  %v530_v22 = vld [vmem:[#allocation3 + $0x878] sm:$0xff] }
 0x23f   :  { %3843 = vmatprep.subr.bf16.mxu0 %v7388_v33  ;;  %v658_v33 = vld [vmem:[#allocation3 + $0xc78] sm:$0xff]  ;;  %v7572_v38 = vcombine.high %v526_v29, %v530_v22 }
 0x240   :  { %3883 = vmatpush1.bf16.msra.mxu1 %v7507_v32  ;;  %v654_v32 = vld [vmem:[#allocation3 + $0xc58] sm:$0xff] }
 0x241   :  { %3884 = vmatprep.subr.bf16.mxu1 %v7516_v46  ;;  %v7563_v46 = vcombine.low %v518_v19, %v522_v20  ;;  %v7700_v39 = vcombine.high %v654_v32, %v658_v33  ;;  %v7699_v42 = vcombine.low %v654_v32, %v658_v33  ;;  %v542_v45 = vld [vmem:[#allocation3 + $0x8d8] sm:$0xff] }
 0x242   :  { %3844 = vmatpush1.bf16.msra.mxu0 %v7387_v40  ;;  %v538_v40 = vld [vmem:[#allocation3 + $0x8b8] sm:$0xff] }
 0x243   :  { %3845 = vmatprep.subr.bf16.mxu0 %v7396_v7  ;;  %v666_v7 = vld [vmem:[#allocation3 + $0xcb8] sm:$0xff]  ;;  %v7580_v58 = vcombine.high %v534_v51, %v538_v40 }
 0x244   :  { %3885 = vmatpush1.bf16.msra.mxu1 %v7515_v41  ;;  %v662_v41 = vld [vmem:[#allocation3 + $0xc98] sm:$0xff] }
 0x245   :  { %3886 = vmatprep.subr.bf16.mxu1 %v7524_v8  ;;  %v7571_v8 = vcombine.low %v526_v29, %v530_v22  ;;  %v7708_v44 = vcombine.high %v662_v41, %v666_v7  ;;  %v550_v54 = vld [vmem:[#allocation3 + $0x918] sm:$0xff] }
 0x246   :  { %3846 = vmatpush1.bf16.msra.mxu0 %v7395_v10  ;;  %v546_v10 = vld [vmem:[#allocation3 + $0x8f8] sm:$0xff] }
 0x247   :  { %3847 = vmatprep.subr.bf16.mxu0 %v7404_v49  ;;  %v674_v49 = vld [vmem:[#allocation3 + $0xcf8] sm:$0xff] }
 0x248   :  { %3887 = vmatpush1.bf16.msra.mxu1 %v7523_v48  ;;  %v670_v48 = vld [vmem:[#allocation3 + $0xcd8] sm:$0xff] }
 0x249   :  { %3888 = vmatprep.subr.bf16.mxu1 %v7532_v50  ;;  %v7588_v50 = vcombine.high %v542_v45, %v546_v10  ;;  %v7716_v53 = vcombine.high %v670_v48, %v674_v49  ;;  %v554_v56 = vld [vmem:[#allocation3 + $0x938] sm:$0xff] }
 0x24a   :  { %3848 = vmatpush1.bf16.msra.mxu0 %v7403_v60  ;;  %v678_v57 = vld [vmem:[#allocation3 + $0xd18] sm:$0xff]  ;;  %v7595_v4 = vcombine.low %v550_v54, %v554_v56 }
 0x24b   :  { %3849 = vmatprep.subr.bf16.mxu0 %v7412_v62  ;;  %v682_v60 = vld [vmem:[#allocation3 + $0xd38] sm:$0xff]  ;;  %v7596_v62 = vcombine.high %v550_v54, %v554_v56 }
 0x24c   :  { %3889 = vmatpush1.bf16.msra.mxu1 %v7531_v61  ;;  %v7587_v61 = vcombine.low %v542_v45, %v546_v10  ;;  %v562_v1 = vld [vmem:[#allocation3 + $0x978] sm:$0xff] }
 0x24d   :  { %3890 = vmatprep.subr.bf16.mxu1 %v7540_v0  ;;  %v558_v0 = vld [vmem:[#allocation3 + $0x958] sm:$0xff] }
 0x24e   :  { %3850 = vmatpush1.bf16.msra.mxu0 %v7411_v5  ;;  %v686_v2 = vld [vmem:[#allocation3 + $0xd58] sm:$0xff]  ;;  %v7723_v5 = vcombine.low %v678_v57, %v682_v60  ;;  %v7603_v36 = vcombine.low %v558_v0, %v562_v1 }
 0x24f   :  { %3851 = vmatprep.subr.bf16.mxu0 %v7420_v11  ;;  %v690_v3 = vld [vmem:[#allocation3 + $0xd78] sm:$0xff] }
 0x250   :  { %3891 = vmatpush1.bf16.msra.mxu1 %v7539_v6  ;;  %v7604_v6 = vcombine.high %v558_v0, %v562_v1  ;;  %v7732_v11 = vcombine.high %v686_v2, %v690_v3  ;;  %v570_v14 = vld [vmem:[#allocation3 + $0x9b8] sm:$0xff] }
 0x251   :  { %3892 = vmatprep.subr.bf16.mxu1 %v7548_v12  ;;  %v566_v12 = vld [vmem:[#allocation3 + $0x998] sm:$0xff] }
 0x252   :  { %3852 = vmatpush1.bf16.msra.mxu0 %v7419_v15  ;;  %v694_v31 = vld [vmem:[#allocation3 + $0xd98] sm:$0xff]  ;;  %v7731_v15 = vcombine.low %v686_v2, %v690_v3  ;;  %v7611_v32 = vcombine.low %v566_v12, %v570_v14 }
 0x253   :  { %3853 = vmatprep.subr.bf16.mxu0 %v7428_v17  ;;  %v698_v35 = vld [vmem:[#allocation3 + $0xdb8] sm:$0xff] }
 0x254   :  { %3893 = vmatpush1.bf16.msra.mxu1 %v7547_v16  ;;  %v7612_v16 = vcombine.high %v566_v12, %v570_v14  ;;  %v574_v19 = vld [vmem:[#allocation3 + $0x9d8] sm:$0xff] }
 0x255   :  { %3894 = vmatprep.subr.bf16.mxu1 %v7556_v18  ;;  %v7740_v18 = vcombine.high %v694_v31, %v698_v35  ;;  %v578_v20 = vld [vmem:[#allocation3 + $0x9f8] sm:$0xff] }
 0x256   :  { %3854 = vmatpush1.bf16.msra.mxu0 %v7427_v25  ;;  %v590_v10 = vld [vmem:[#allocation3 + $0xa58] sm:$0xff] }
 0x257   :  { %3905 = vmatprep.subr.bf16.mxu0 %v7564_v28  ;;  %v706_v28 = vld [vmem:[#allocation3 + $0xdf8] sm:$0xff] }
 0x258   :  { %3895 = vmatpush1.bf16.msra.mxu1 %v7555_v26  ;;  %v702_v26 = vld [vmem:[#allocation3 + $0xdd8] sm:$0xff] }
 0x259   :  { %3946 = vmatprep.subr.bf16.mxu1 %v7692_v21  ;;  %3856 = vmatmul.mubr.bf16.vlgmr.msra.gmra.mrb[24].mxu0 %v9402_v43  ;;  %v7579_v43 = vcombine.low %v534_v51, %v538_v40  ;;  %v582_v40 = vld [vmem:[#allocation3 + $0xa18] sm:$0xff] }
 0x25a   :  { %3906 = vmatpush1.bf16.msra.mxu0 %v7563_v46  ;;  %3937 = vmatprep.mubr.bf16.mxu0 %v9408_v52  ;;  %v7715_v52 = vcombine.low %v670_v48, %v674_v49  ;;  %v594_v48 = vld [vmem:[#allocation3 + $0xa78] sm:$0xff] }
 0x25b   :  { %3897 = vmatmul.mubr.bf16.vlgmr.msra.gmra.mrb[24].mxu1 %v9406_v9  ;;  %3907 = vmatprep.subr.bf16.mxu0 %v7572_v38  ;;  %v7707_v9 = vcombine.low %v662_v41, %v666_v7  ;;  %v7620_v38 = vcombine.high %v574_v19, %v578_v20  ;;  %v586_v41 = vld [vmem:[#allocation3 + $0xa38] sm:$0xff] }
 0x25c   :  { %3947 = vmatpush1.bf16.msra.mxu1 %v7691_v37  ;;  %3978 = vmatprep.mubr.bf16.mxu1 %v9411_v55  ;;  %v7724_v55 = vcombine.high %v678_v57, %v682_v60  ;;  %v7739_v37 = vcombine.low %v694_v31, %v698_v35  ;;  %v718_v49 = vld [vmem:[#allocation3 + $0xe58] sm:$0xff] }
 0x25d   :  { %3948 = vmatprep.subr.bf16.mxu1 %v7700_v39  ;;  %v598_v56 = vld [vmem:[#allocation3 + $0xa98] sm:$0xff] }
 0x25e   :  { %3908 = vmatpush1.bf16.msra.mxu0 %v7571_v8  ;;  %v714_v8 = vld [vmem:[#allocation3 + $0xe38] sm:$0xff] }
 0x25f   :  { %3909 = vmatprep.subr.bf16.mxu0 %v7580_v58  ;;  %v7747_v58 = vcombine.low %v702_v26, %v706_v28  ;;  %v602_v57 = vld [vmem:[#allocation3 + $0xab8] sm:$0xff] }
 0x260   :  { %3949 = vmatpush1.bf16.msra.mxu1 %v7699_v42  ;;  %v7619_v42 = vcombine.low %v574_v19, %v578_v20  ;;  %v726_v60 = vld [vmem:[#allocation3 + $0xe98] sm:$0xff] }
 0x261   :  { %3950 = vmatprep.subr.bf16.mxu1 %v7708_v44  ;;  %v7628_v44 = vcombine.high %v582_v40, %v586_v41  ;;  %v606_v1 = vld [vmem:[#allocation3 + $0xad8] sm:$0xff] }
 0x262   :  { %3910 = vmatpush1.bf16.msra.mxu0 %v7579_v43  ;;  %v722_v43 = vld [vmem:[#allocation3 + $0xe78] sm:$0xff] }
 0x263   :  { %3911 = vmatprep.subr.bf16.mxu0 %v7588_v50  ;;  %v7764_v54 = vcombine.high %v718_v49, %v722_v43  ;;  %v610_v2 = vld [vmem:[#allocation3 + $0xaf8] sm:$0xff] }
 0x264   :  { %3951 = vmatpush1.bf16.msra.mxu1 %v7707_v9  ;;  %v7627_v9 = vcombine.low %v582_v40, %v586_v41  ;;  %v734_v3 = vld [vmem:[#allocation3 + $0xed8] sm:$0xff] }
 0x265   :  { %3952 = vmatprep.subr.bf16.mxu1 %v7716_v53  ;;  %v7636_v53 = vcombine.high %v590_v10, %v594_v48  ;;  %v614_v14 = vld [vmem:[#allocation3 + $0xb18] sm:$0xff] }
 0x266   :  { %3912 = vmatpush1.bf16.msra.mxu0 %v7587_v61  ;;  %v730_v61 = vld [vmem:[#allocation3 + $0xeb8] sm:$0xff] }
 0x267   :  { %3913 = vmatprep.subr.bf16.mxu0 %v7596_v62  ;;  %v7763_v62 = vcombine.low %v718_v49, %v722_v43  ;;  %v7772_v0 = vcombine.high %v726_v60, %v730_v61  ;;  %v618_v31 = vld [vmem:[#allocation3 + $0xb38] sm:$0xff] }
 0x268   :  { %3953 = vmatpush1.bf16.msra.mxu1 %v7715_v52  ;;  %v7635_v52 = vcombine.low %v590_v10, %v594_v48  ;;  %v742_v35 = vld [vmem:[#allocation3 + $0xf18] sm:$0xff] }
 0x269   :  { %3954 = vmatprep.subr.bf16.mxu1 %v7724_v55  ;;  %v7644_v55 = vcombine.high %v598_v56, %v602_v57  ;;  %v622_v19 = vld [vmem:[#allocation3 + $0xb58] sm:$0xff] }
 0x26a   :  { %3914 = vmatpush1.bf16.msra.mxu0 %v7595_v4  ;;  %v738_v4 = vld [vmem:[#allocation3 + $0xef8] sm:$0xff] }
 0x26b   :  { %3915 = vmatprep.subr.bf16.mxu0 %v7604_v6  ;;  %v7771_v6 = vcombine.low %v726_v60, %v730_v61  ;;  %v7780_v12 = vcombine.high %v734_v3, %v738_v4  ;;  %v626_v20 = vld [vmem:[#allocation3 + $0xb78] sm:$0xff] }
 0x26c   :  { %3955 = vmatpush1.bf16.msra.mxu1 %v7723_v5  ;;  %v3611_v17 = vpop.f32.mrb[12].mxu0  ;;  %v7643_v5 = vcombine.low %v598_v56, %v602_v57  ;;  %v8343_v56 = vld [vmem:[#allocation8] ss:$16 sps:$4 sm:$0xff]   ;;  %v8346_v57 = vld [vmem:[#allocation8 + $0x8] ss:$16 sps:$4 sm:$0xff]  }
 0x26d   :  { %3956 = vmatprep.subr.bf16.mxu1 %v7732_v11  ;;  %v3612_v23 = vadd.f32 %v3611_v17, %v9454_v59  ;;  %v3613_v24 = vpop.f32.mrb[13].mxu0  ;;  %v7748_v59 = vcombine.high %v702_v26, %v706_v28  ;;  %v7652_v11 = vcombine.high %v606_v1, %v610_v2  ;;  %v7660_v17 = vcombine.high %v614_v14, %v618_v31  ;;  %v8351_v60 = vld [vmem:[#allocation8 + $0x24] ss:$16 sps:$4 sm:$0xff]  }
 0x26e   :  { %v3652_v25 = vpop.f32.mrb[12].mxu1  ;;  %v3614_v21 = vadd.f32 %v3613_v24, %v9456_v63  ;;  %v3615_v29 = vpop.f32.mrb[14].mxu0  ;;  %3916 = vmatpush1.bf16.msra.mxu0 %v7603_v36  ;;  %v710_v63 = vld [vmem:[#allocation3 + $0xe18] sm:$0xff]  ;;  %v7668_v28 = vcombine.high %v622_v19, %v626_v20 }
 0x26f   :  { %v3654_v22 = vpop.f32.mrb[13].mxu1  ;;  %v9464_v33 = vadd.f32 %v3652_v25, %v3612_v23  ;;  %v3616_v46 = vpop.f32.mrb[15].mxu0  ;;  %3917 = vmatprep.subr.bf16.mxu0 %v7612_v16  ;;  %v7756_v45 = vcombine.high %v710_v63, %v714_v8  ;;  %v7755_v50 = vcombine.low %v710_v63, %v714_v8  ;;  %v746_v36 = vld [vmem:[#allocation3 + $0xf38] sm:$0xff]  ;;  %v7779_v16 = vcombine.low %v734_v3, %v738_v4  ;;  %v8364_v4 = vld [vmem:[#allocation8 + $0x68] ss:$16 sps:$4 sm:$0xff]  }
 0x270   :  { %3957 = vmatpush1.bf16.msra.mxu1 %v7731_v15  ;;  %v3656_v39 = vpop.f32.mrb[14].mxu1  ;;  %v9466_v51 = vadd.f32 %v3654_v22, %v3614_v21  ;;  %v7651_v15 = vcombine.low %v606_v1, %v610_v2  ;;  %v750_v23 = vld [vmem:[#allocation3 + $0xf58] sm:$0xff]  ;;  %v7659_v25 = vcombine.low %v614_v14, %v618_v31  ;;  %v7787_v26 = vcombine.low %v742_v35, %v746_v36  ;;  %v8358_v2 = vld [vmem:[#allocation8 + $0x48] ss:$16 sps:$4 sm:$0xff]   ;;  %v8378_v31 = vld [vmem:[#allocation8 + $0xac] ss:$16 sps:$4 sm:$0xff]  }
 0x271   :  { %3958 = vmatprep.subr.bf16.mxu1 %v7740_v18  ;;  %v3657_v7 = vpop.f32.mrb[15].mxu1  ;;  %v7788_v18 = vcombine.high %v742_v35, %v746_v36  ;;  %v754_v24 = vld [vmem:[#allocation3 + $0xf78] sm:$0xff]  ;;  %v7667_v39 = vcombine.low %v622_v19, %v626_v20  ;;  %v8376_v36 = vld [vmem:[#allocation8 + $0xa8] ss:$16 sps:$4 sm:$0xff]  }
 0x272   :  { %3918 = vmatpush1.bf16.msra.mxu0 %v7611_v32  ;;  %v7796_v21 = vcombine.high %v750_v23, %v754_v24  ;;  %v630_v29 = vld [vmem:[#allocation3 + $0xb98] sm:$0xff]  ;;  %v9469_v32 = vsub.s32 1, %v9333_v47 }
 0x273   :  { %3919 = vmatprep.subr.bf16.mxu0 %v7620_v38  ;;  %v634_v22 = vld [vmem:[#allocation3 + $0xbb8] sm:$0xff]  ;;  %v9471_v38 = vld [vmem:[#allocation6] sm:$0xff] }
 0x274   :  { %3959 = vmatpush1.bf16.msra.mxu1 %v7739_v37  ;;  %v758_v46 = vld [vmem:[#allocation3 + $0xf98] sm:$0xff]  ;;  %v7676_v40 = vcombine.high %v630_v29, %v634_v22  ;;  %v4023_v8 = vrot.slane %v9471_v38, %v9469_v32 }
 0x275   :  { %3960 = vmatprep.subr.bf16.mxu1 %v7748_v59  ;;  %v762_v37 = vld [vmem:[#allocation3 + $0xfb8] sm:$0xff]  ;;  %v7795_v59 = vcombine.low %v750_v23, %v754_v24 }
 0x276   :  { %3920 = vmatpush1.bf16.msra.mxu0 %v7619_v42  ;;  %v7804_v41 = vcombine.high %v758_v46, %v762_v37  ;;  %v638_v7 = vld [vmem:[#allocation3 + $0xbd8] sm:$0xff]  ;;  %v4057_v49 = vadd.f32 %v4023_v8, %v9448_v34  ;;  %v8354_v34 = vld [vmem:[#allocation8 + $0x2c] ss:$16 sps:$4 sm:$0xff]  }
 0x277   :  { %3921 = vmatprep.subr.bf16.mxu0 %v7628_v44  ;;  %v642_v63 = vld [vmem:[#allocation3 + $0xbf8] sm:$0xff]  ;;  %v7675_v44 = vcombine.low %v630_v29, %v634_v22 }
 0x278   :  { %3961 = vmatpush1.bf16.msra.mxu1 %v7747_v58  ;;  %v766_v42 = vld [vmem:[#allocation3 + $0xfd8] sm:$0xff]  ;;  %v7684_v10 = vcombine.high %v638_v7, %v642_v63  ;;  %v7683_v43 = vcombine.low %v638_v7, %v642_v63  ;;  %v8394_v63 = vld [vmem:[#allocation8 + $0x108] ss:$16 sps:$4 sm:$0xff]  }
 0x279   :  { %3962 = vmatprep.subr.bf16.mxu1 %v7756_v45  ;;  %v770_v58 = vld [vmem:[#allocation3 + $0xff8] sm:$0xff]  ;;  %v7803_v45 = vcombine.low %v758_v46, %v762_v37  ;;  %v8390_v46 = vld [vmem:[#allocation8 + $0xec] ss:$16 sps:$4 sm:$0xff]  }
 0x27a   :  { %3922 = vmatpush1.bf16.msra.mxu0 %v7627_v9  ;;  %v7812_v48 = vcombine.high %v766_v42, %v770_v58  ;;  %v7811_v9 = vcombine.low %v766_v42, %v770_v58  ;;  %v8355_v1 = vld [vmem:[#allocation8 + $0x40] ss:$16 sps:$4 sm:$0xff]   ;;  %v8363_v3 = vld [vmem:[#allocation8 + $0x64] ss:$16 sps:$4 sm:$0xff]   ;;  %v8402_v42 = vld [vmem:[#allocation8 + $0x12c] ss:$16 sps:$4 sm:$0xff]  }
 0x27b   :  { %3923 = vmatprep.subr.bf16.mxu0 %v7636_v53  ;;  %v8348_v53 = vld [vmem:[#allocation8 + $0xc] ss:$16 sps:$4 sm:$0xff]   ;;  %v8375_v14 = vld [vmem:[#allocation8 + $0xa4] ss:$16 sps:$4 sm:$0xff]   ;;  %v8373_v35 = vld [vmem:[#allocation8 + $0xa0] ss:$16 sps:$4 sm:$0xff]  }
 0x27c   :  { %3963 = vmatpush1.bf16.msra.mxu1 %v7755_v50  ;;  %v8345_v50 = vld [vmem:[#allocation8 + $0x4] ss:$16 sps:$4 sm:$0xff]   ;;  %v8391_v7 = vld [vmem:[#allocation8 + $0x100] ss:$16 sps:$4 sm:$0xff]  }
 0x27d   :  { %3964 = vmatprep.subr.bf16.mxu1 %v7764_v54  ;;  %v4065_v54 = vmax.f32 %v4057_v49, 0.0  ;;  %v8387_v29 = vld [vmem:[#allocation8 + $0xe4] ss:$16 sps:$4 sm:$0xff]   ;;  %v8397_v58 = vld [vmem:[#allocation8 + $0x120] ss:$16 sps:$4 sm:$0xff]  }
 0x27e   :  { %3924 = vmatpush1.bf16.msra.mxu0 %v7635_v52  ;;  %v8349_v52 = vld [vmem:[#allocation8 + $0x20] ss:$16 sps:$4 sm:$0xff]   ;;  %v8399_v8 = vld [vmem:[#allocation8 + $0x124] ss:$16 sps:$4 sm:$0xff]   ;;  %v8406_v49 = vld [vmem:[#allocation8 + $0x148] ss:$16 sps:$4 sm:$0xff]  }
 0x27f   :  { %3925 = vmatprep.subr.bf16.mxu0 %v7644_v55  ;;  %v4073_v61 = vpack.c.bf16 %v4065_v54, %v4065_v54  ;;  %v8357_v55 = vld [vmem:[#allocation8 + $0x44] ss:$16 sps:$4 sm:$0xff]  }
 0x280   :  { %3965 = vmatpush1.bf16.msra.mxu1 %v7763_v62  ;;  %v8352_v62 = vld [vmem:[#allocation8 + $0x28] ss:$16 sps:$4 sm:$0xff]   ;;  %v8417_v54 = vld [vmem:[#allocation8 + $0x184] ss:$16 sps:$4 sm:$0xff]  }
 0x281   :  { %3966 = vmatprep.subr.bf16.mxu1 %v7772_v0  ;;  %v8360_v0 = vld [vmem:[#allocation8 + $0x4c] ss:$16 sps:$4 sm:$0xff]  }
 0x282   :  { %3926 = vmatpush1.bf16.msra.mxu0 %v7643_v5  ;;  %v8369_v5 = vld [vmem:[#allocation8 + $0x84] ss:$16 sps:$4 sm:$0xff]  }
 0x283   :  { %3927 = vmatprep.subr.bf16.mxu0 %v7652_v11  ;;  %v8367_v11 = vld [vmem:[#allocation8 + $0x80] ss:$16 sps:$4 sm:$0xff]  }
 0x284   :  { %3967 = vmatpush1.bf16.msra.mxu1 %v7771_v6  ;;  %v8372_v6 = vld [vmem:[#allocation8 + $0x8c] ss:$16 sps:$4 sm:$0xff]  }
 0x285   :  { %3968 = vmatprep.subr.bf16.mxu1 %v7780_v12  ;;  %v8370_v12 = vld [vmem:[#allocation8 + $0x88] ss:$16 sps:$4 sm:$0xff]  }
 0x286   :  { %3928 = vmatpush1.bf16.msra.mxu0 %v7651_v15  ;;  %v8381_v15 = vld [vmem:[#allocation8 + $0xc4] ss:$16 sps:$4 sm:$0xff]  }
 0x287   :  { %3929 = vmatprep.subr.bf16.mxu0 %v7660_v17  ;;  %v8384_v17 = vld [vmem:[#allocation8 + $0xcc] ss:$16 sps:$4 sm:$0xff]  }
 0x288   :  { %3969 = vmatpush1.bf16.msra.mxu1 %v7779_v16 }
 0x289   :  { %3970 = vmatprep.subr.bf16.mxu1 %v7788_v18 }
 0x28a   :  { %3930 = vmatpush1.bf16.msra.mxu0 %v7659_v25  ;;  %v8379_v25 = vld [vmem:[#allocation8 + $0xc0] ss:$16 sps:$4 sm:$0xff]  }
 0x28b   :  { %3931 = vmatprep.subr.bf16.mxu0 %v7668_v28 }
 0x28c   :  { %3971 = vmatpush1.bf16.msra.mxu1 %v7787_v26 }
 0x28d   :  { %3972 = vmatprep.subr.bf16.mxu1 %v7796_v21  ;;  %v8382_v21 = vld [vmem:[#allocation8 + $0xc8] ss:$16 sps:$4 sm:$0xff]  }
 0x28e   :  { %3932 = vmatpush1.bf16.msra.mxu0 %v7667_v39  ;;  %v8385_v39 = vld [vmem:[#allocation8 + $0xe0] ss:$16 sps:$4 sm:$0xff]  }
 0x28f   :  { %3933 = vmatprep.subr.bf16.mxu0 %v7676_v40  ;;  %v8393_v40 = vld [vmem:[#allocation8 + $0x104] ss:$16 sps:$4 sm:$0xff]  }
 0x290   :  { %3973 = vmatpush1.bf16.msra.mxu1 %v7795_v59  ;;  %v8388_v59 = vld [vmem:[#allocation8 + $0xe8] ss:$16 sps:$4 sm:$0xff]  }
 0x291   :  { %3974 = vmatprep.subr.bf16.mxu1 %v7804_v41  ;;  %v8396_v41 = vld [vmem:[#allocation8 + $0x10c] ss:$16 sps:$4 sm:$0xff]  }
 0x292   :  { %3934 = vmatpush1.bf16.msra.mxu0 %v7675_v44  ;;  %v8400_v44 = vld [vmem:[#allocation8 + $0x128] ss:$16 sps:$4 sm:$0xff]  }
 0x293   :  { %3935 = vmatprep.subr.bf16.mxu0 %v7684_v10  ;;  %v8408_v10 = vld [vmem:[#allocation8 + $0x14c] ss:$16 sps:$4 sm:$0xff]  }
 0x294   :  { %3975 = vmatpush1.bf16.msra.mxu1 %v7803_v45  ;;  %v8405_v45 = vld [vmem:[#allocation8 + $0x144] ss:$16 sps:$4 sm:$0xff]  }
 0x295   :  { %3976 = vmatprep.subr.bf16.mxu1 %v7812_v48  ;;  %v8403_v48 = vld [vmem:[#allocation8 + $0x140] ss:$16 sps:$4 sm:$0xff]  }
 0x296   :  { %3936 = vmatpush1.bf16.msra.mxu0 %v7683_v43  ;;  %v8411_v43 = vld [vmem:[#allocation8 + $0x164] ss:$16 sps:$4 sm:$0xff]  }
 0x297   :  { %5638 = vmatprep.subr.bf16.mxu0 %v8345_v50  ;;  %v8409_v50 = vld [vmem:[#allocation8 + $0x160] ss:$16 sps:$4 sm:$0xff]  }
 0x298   :  { %3977 = vmatpush1.bf16.msra.mxu1 %v7811_v9  ;;  %v8414_v9 = vld [vmem:[#allocation8 + $0x16c] ss:$16 sps:$4 sm:$0xff]  }
 0x299   :  { %5802 = vmatprep.subr.bf16.mxu1 %v8348_v53  ;;  %3938 = vmatmul.mubr.bf16.vlgmr.msra.gmra.mrb[28].mxu0 %v9420_v13  ;;  %v8366_v13 = vld [vmem:[#allocation8 + $0x6c] ss:$16 sps:$4 sm:$0xff]   ;;  %v8412_v53 = vld [vmem:[#allocation8 + $0x168] ss:$16 sps:$4 sm:$0xff]  }
 0x29a   :  { %5639 = vmatpush1.bf16.msra.mxu0 %v8343_v56  ;;  %5670 = vmatprep.mubr.bf16.mxu0 %v4073_v61  ;;  %v8420_v56 = vld [vmem:[#allocation8 + $0x18c] ss:$16 sps:$4 sm:$0xff]  }
 0x29b   :  { %3979 = vmatmul.mubr.bf16.vlgmr.msra.gmra.mrb[28].mxu1 %v9422_v30  ;;  %5640 = vmatprep.subr.bf16.mxu0 %v8351_v60  ;;  %v8361_v30 = vld [vmem:[#allocation8 + $0x60] ss:$16 sps:$4 sm:$0xff]   ;;  %v9483_v60 = vsub.s32 0, %v9333_v47 }
 0x29c   :  { %5803 = vmatpush1.bf16.msra.mxu1 %v8346_v57  ;;  %5834 = vmatprep.mubr.bf16.mxu1 %v4073_v61  ;;  %v8415_v57 = vld [vmem:[#allocation8 + $0x180] ss:$16 sps:$4 sm:$0xff]   ;;  %v8418_v61 = vld [vmem:[#allocation8 + $0x188] ss:$16 sps:$4 sm:$0xff]  }
 0x29d   :  { %5804 = vmatprep.subr.bf16.mxu1 %v8354_v34  ;;  %v8423_v34 = vld [vmem:[#allocation8 + $0x1a4] ss:$16 sps:$4 sm:$0xff]  }
 0x29e   :  { %5641 = vmatpush1.bf16.msra.mxu0 %v8349_v52  ;;  %v8426_v52 = vld [vmem:[#allocation8 + $0x1ac] ss:$16 sps:$4 sm:$0xff]  }
 0x29f   :  { %5642 = vmatprep.subr.bf16.mxu0 %v8357_v55  ;;  %v8421_v55 = vld [vmem:[#allocation8 + $0x1a0] ss:$16 sps:$4 sm:$0xff]  }
 0x2a0   :  { %5805 = vmatpush1.bf16.msra.mxu1 %v8352_v62  ;;  %v9486_v62 = vsub.s32 3, %v9333_v47 }
 0x2a1   :  { %5806 = vmatprep.subr.bf16.mxu1 %v8360_v0  ;;  %v4019_v0 = vrot.slane %v9471_v38, %v9483_v60 }
 0x2a2   :  { %5643 = vmatpush1.bf16.msra.mxu0 %v8355_v1  ;;  %v8424_v1 = vld [vmem:[#allocation8 + $0x1a8] ss:$16 sps:$4 sm:$0xff]  }
 0x2a3   :  { %5644 = vmatprep.subr.bf16.mxu0 %v8363_v3  ;;  %v8432_v3 = vld [vmem:[#allocation8 + $0x1cc] ss:$16 sps:$4 sm:$0xff]  }
 0x2a4   :  { %5807 = vmatpush1.bf16.msra.mxu1 %v8358_v2  ;;  %v8429_v2 = vld [vmem:[#allocation8 + $0x1c4] ss:$16 sps:$4 sm:$0xff]  }
 0x2a5   :  { %5808 = vmatprep.subr.bf16.mxu1 %v8366_v13  ;;  %v4031_v13 = vrot.slane %v9471_v38, %v9486_v62 }
 0x2a6   :  { %5645 = vmatpush1.bf16.msra.mxu0 %v8361_v30  ;;  %v8427_v30 = vld [vmem:[#allocation8 + $0x1c0] ss:$16 sps:$4 sm:$0xff]  }
 0x2a7   :  { %5646 = vmatprep.subr.bf16.mxu0 %v8369_v5  ;;  %v8430_v5 = vld [vmem:[#allocation8 + $0x1c8] ss:$16 sps:$4 sm:$0xff]  }
 0x2a8   :  { %5809 = vmatpush1.bf16.msra.mxu1 %v8364_v4  ;;  %v4056_v4 = vadd.f32 %v4019_v0, %v9446_v27  ;;  %v8439_v27 = vld [vmem:[#allocation8 + $0x200] ss:$16 sps:$4 sm:$0xff]  }
 0x2a9   :  { %5810 = vmatprep.subr.bf16.mxu1 %v8372_v6  ;;  %v8435_v6 = vld [vmem:[#allocation8 + $0x1e4] ss:$16 sps:$4 sm:$0xff]  }
 0x2aa   :  { %5647 = vmatpush1.bf16.msra.mxu0 %v8367_v11  ;;  %v8438_v11 = vld [vmem:[#allocation8 + $0x1ec] ss:$16 sps:$4 sm:$0xff]  }
 0x2ab   :  { %5648 = vmatprep.subr.bf16.mxu0 %v8375_v14  ;;  %v8433_v14 = vld [vmem:[#allocation8 + $0x1e0] ss:$16 sps:$4 sm:$0xff]  }
 0x2ac   :  { %5811 = vmatpush1.bf16.msra.mxu1 %v8370_v12  ;;  %v3693_v16 = vpop.f32.mrb[16].mxu0  ;;  %v4059_v12 = vadd.f32 %v4031_v13, %v9466_v51  ;;  %v8450_v51 = vld [vmem:[#allocation8 + $0x22c] ss:$16 sps:$4 sm:$0xff]  }
 0x2ad   :  { %5812 = vmatprep.subr.bf16.mxu1 %v8378_v31  ;;  %v3695_v19 = vpop.f32.mrb[17].mxu0  ;;  %v4064_v31 = vmax.f32 %v4056_v4, 0.0  ;;  %v8492_v13 = vld [vmem:[#allocation8 + $0x30c] ss:$16 sps:$4 sm:$0xff]   ;;  %v8490_v4 = vld [vmem:[#allocation8 + $0x308] ss:$16 sps:$4 sm:$0xff]  }
 0x2ae   :  { %v3734_v18 = vpop.f32.mrb[16].mxu1  ;;  %v3697_v24 = vpop.f32.mrb[18].mxu0  ;;  %5649 = vmatpush1.bf16.msra.mxu0 %v8373_v35  ;;  %v8436_v35 = vld [vmem:[#allocation8 + $0x1e8] ss:$16 sps:$4 sm:$0xff]  }
 0x2af   :  { %v9478_v20 = vadd.f32 %v3734_v18, %v3693_v16  ;;  %v3736_v23 = vpop.f32.mrb[17].mxu1  ;;  %v3698_v28 = vpop.f32.mrb[19].mxu0  ;;  %5650 = vmatprep.subr.bf16.mxu0 %v8381_v15  ;;  %v8444_v15 = vld [vmem:[#allocation8 + $0x20c] ss:$16 sps:$4 sm:$0xff]   ;;  %v4067_v16 = vmax.f32 %v4059_v12, 0.0 }
 0x2b0   :  { %v9480_v26 = vadd.f32 %v3736_v23, %v3695_v19  ;;  %5813 = vmatpush1.bf16.msra.mxu1 %v8376_v36  ;;  %v3738_v22 = vpop.f32.mrb[18].mxu1  ;;  %v8441_v36 = vld [vmem:[#allocation8 + $0x204] ss:$16 sps:$4 sm:$0xff]   ;;  %v8442_v18 = vld [vmem:[#allocation8 + $0x208] ss:$16 sps:$4 sm:$0xff]  }
 0x2b1   :  { %5814 = vmatprep.subr.bf16.mxu1 %v8384_v17  ;;  %v3739_v37 = vpop.f32.mrb[19].mxu1  ;;  %v4072_v17 = vpack.c.bf16 %v4064_v31, %v4064_v31  ;;  %v8447_v19 = vld [vmem:[#allocation8 + $0x224] ss:$16 sps:$4 sm:$0xff]   ;;  %v4075_v23 = vpack.c.bf16 %v4067_v16, %v4067_v16  ;;  %v8445_v24 = vld [vmem:[#allocation8 + $0x220] ss:$16 sps:$4 sm:$0xff]  }
 0x2b2   :  { %5651 = vmatpush1.bf16.msra.mxu0 %v8379_v25  ;;  %v8448_v25 = vld [vmem:[#allocation8 + $0x228] ss:$16 sps:$4 sm:$0xff]   ;;  %v8453_v28 = vld [vmem:[#allocation8 + $0x244] ss:$16 sps:$4 sm:$0xff]   ;;  %v8462_v37 = vld [vmem:[#allocation8 + $0x26c] ss:$16 sps:$4 sm:$0xff]  }
 0x2b3   :  { %5652 = vmatprep.subr.bf16.mxu0 %v8387_v29  ;;  %v8451_v29 = vld [vmem:[#allocation8 + $0x240] ss:$16 sps:$4 sm:$0xff]   ;;  %v8454_v22 = vld [vmem:[#allocation8 + $0x248] ss:$16 sps:$4 sm:$0xff]   ;;  %v8504_v31 = vld [vmem:[#allocation8 + $0x34c] ss:$16 sps:$4 sm:$0xff]  }
 0x2b4   :  { %5815 = vmatpush1.bf16.msra.mxu1 %v8382_v21  ;;  %v8456_v21 = vld [vmem:[#allocation8 + $0x24c] ss:$16 sps:$4 sm:$0xff]   ;;  %v8496_v12 = vld [vmem:[#allocation8 + $0x328] ss:$16 sps:$4 sm:$0xff]  }
 0x2b5   :  { %5816 = vmatprep.subr.bf16.mxu1 %v8390_v46  ;;  %v8459_v46 = vld [vmem:[#allocation8 + $0x264] ss:$16 sps:$4 sm:$0xff]   ;;  %v8510_v16 = vld [vmem:[#allocation8 + $0x36c] ss:$16 sps:$4 sm:$0xff]  }
 0x2b6   :  { %5653 = vmatpush1.bf16.msra.mxu0 %v8385_v39  ;;  %v8457_v39 = vld [vmem:[#allocation8 + $0x260] ss:$16 sps:$4 sm:$0xff]  }
 0x2b7   :  { %5654 = vmatprep.subr.bf16.mxu0 %v8393_v40  ;;  %v8465_v40 = vld [vmem:[#allocation8 + $0x284] ss:$16 sps:$4 sm:$0xff]  }
 0x2b8   :  { %5817 = vmatpush1.bf16.msra.mxu1 %v8388_v59  ;;  %v8460_v59 = vld [vmem:[#allocation8 + $0x268] ss:$16 sps:$4 sm:$0xff]  }
 0x2b9   :  { %5818 = vmatprep.subr.bf16.mxu1 %v8396_v41  ;;  %v8468_v41 = vld [vmem:[#allocation8 + $0x28c] ss:$16 sps:$4 sm:$0xff]  }
 0x2ba   :  { %5655 = vmatpush1.bf16.msra.mxu0 %v8391_v7  ;;  %v8463_v7 = vld [vmem:[#allocation8 + $0x280] ss:$16 sps:$4 sm:$0xff]  }
 0x2bb   :  { %5656 = vmatprep.subr.bf16.mxu0 %v8399_v8  ;;  %v8471_v8 = vld [vmem:[#allocation8 + $0x2a4] ss:$16 sps:$4 sm:$0xff]  }
 0x2bc   :  { %5819 = vmatpush1.bf16.msra.mxu1 %v8394_v63  ;;  %v8466_v63 = vld [vmem:[#allocation8 + $0x288] ss:$16 sps:$4 sm:$0xff]  }
 0x2bd   :  { %5820 = vmatprep.subr.bf16.mxu1 %v8402_v42  ;;  %v8474_v42 = vld [vmem:[#allocation8 + $0x2ac] ss:$16 sps:$4 sm:$0xff]  }
 0x2be   :  { %5657 = vmatpush1.bf16.msra.mxu0 %v8397_v58  ;;  %v8469_v58 = vld [vmem:[#allocation8 + $0x2a0] ss:$16 sps:$4 sm:$0xff]  }
 0x2bf   :  { %5658 = vmatprep.subr.bf16.mxu0 %v8405_v45  ;;  %v8477_v45 = vld [vmem:[#allocation8 + $0x2c4] ss:$16 sps:$4 sm:$0xff]  }
 0x2c0   :  { %5821 = vmatpush1.bf16.msra.mxu1 %v8400_v44  ;;  %v8472_v44 = vld [vmem:[#allocation8 + $0x2a8] ss:$16 sps:$4 sm:$0xff]  }
 0x2c1   :  { %5822 = vmatprep.subr.bf16.mxu1 %v8408_v10 }
 0x2c2   :  { %5659 = vmatpush1.bf16.msra.mxu0 %v8403_v48  ;;  %v8480_v48 = vld [vmem:[#allocation8 + $0x2cc] ss:$16 sps:$4 sm:$0xff]  }
 0x2c3   :  { %5660 = vmatprep.subr.bf16.mxu0 %v8411_v43 }
 0x2c4   :  { %5823 = vmatpush1.bf16.msra.mxu1 %v8406_v49 }
 0x2c5   :  { %5824 = vmatprep.subr.bf16.mxu1 %v8414_v9 }
 0x2c6   :  { %5661 = vmatpush1.bf16.msra.mxu0 %v8409_v50 }
 0x2c7   :  { %5662 = vmatprep.subr.bf16.mxu0 %v8417_v54 }
 0x2c8   :  { %5825 = vmatpush1.bf16.msra.mxu1 %v8412_v53 }
 0x2c9   :  { %5826 = vmatprep.subr.bf16.mxu1 %v8420_v56  ;;  %v8475_v56 = vld [vmem:[#allocation8 + $0x2c0] ss:$16 sps:$4 sm:$0xff]  }
 0x2ca   :  { %5663 = vmatpush1.bf16.msra.mxu0 %v8415_v57 }
 0x2cb   :  { %5664 = vmatprep.subr.bf16.mxu0 %v8423_v34  ;;  %v8478_v34 = vld [vmem:[#allocation8 + $0x2c8] ss:$16 sps:$4 sm:$0xff]  }
 0x2cc   :  { %5827 = vmatpush1.bf16.msra.mxu1 %v8418_v61 }
 0x2cd   :  { %5828 = vmatprep.subr.bf16.mxu1 %v8426_v52  ;;  %v8483_v52 = vld [vmem:[#allocation8 + $0x2e4] ss:$16 sps:$4 sm:$0xff]  }
 0x2ce   :  { %5665 = vmatpush1.bf16.msra.mxu0 %v8421_v55 }
 0x2cf   :  { %5666 = vmatprep.subr.bf16.mxu0 %v8429_v2  ;;  %v8481_v2 = vld [vmem:[#allocation8 + $0x2e0] ss:$16 sps:$4 sm:$0xff]  }
 0x2d0   :  { %5829 = vmatpush1.bf16.msra.mxu1 %v8424_v1 }
 0x2d1   :  { %5830 = vmatprep.subr.bf16.mxu1 %v8432_v3  ;;  %v8489_v3 = vld [vmem:[#allocation8 + $0x304] ss:$16 sps:$4 sm:$0xff]  }
 0x2d2   :  { %5667 = vmatpush1.bf16.msra.mxu0 %v8427_v30  ;;  %v8487_v30 = vld [vmem:[#allocation8 + $0x300] ss:$16 sps:$4 sm:$0xff]  }
 0x2d3   :  { %5668 = vmatprep.subr.bf16.mxu0 %v8435_v6  ;;  %v8498_v6 = vld [vmem:[#allocation8 + $0x32c] ss:$16 sps:$4 sm:$0xff]  }
 0x2d4   :  { %5831 = vmatpush1.bf16.msra.mxu1 %v8430_v5  ;;  %v8495_v5 = vld [vmem:[#allocation8 + $0x324] ss:$16 sps:$4 sm:$0xff]  }
 0x2d5   :  { %5832 = vmatprep.subr.bf16.mxu1 %v8438_v11  ;;  %v8493_v11 = vld [vmem:[#allocation8 + $0x320] ss:$16 sps:$4 sm:$0xff]  }
 0x2d6   :  { %5669 = vmatpush1.bf16.msra.mxu0 %v8433_v14  ;;  %v8501_v14 = vld [vmem:[#allocation8 + $0x344] ss:$16 sps:$4 sm:$0xff]  }
 0x2d7   :  { %5679 = vmatprep.subr.bf16.mxu0 %v8441_v36  ;;  %v8502_v36 = vld [vmem:[#allocation8 + $0x348] ss:$16 sps:$4 sm:$0xff]  }
 0x2d8   :  { %5833 = vmatpush1.bf16.msra.mxu1 %v8436_v35  ;;  %v8499_v35 = vld [vmem:[#allocation8 + $0x340] ss:$16 sps:$4 sm:$0xff]  }
 0x2d9   :  { %5843 = vmatprep.subr.bf16.mxu1 %v8444_v15  ;;  %5671 = vmatmul.mubr.bf16.vlgmr.msra.gmra.mrb[32].mxu0 %v4072_v17  ;;  %v8507_v15 = vld [vmem:[#allocation8 + $0x364] ss:$16 sps:$4 sm:$0xff]  }
 0x2da   :  { %5680 = vmatpush1.bf16.msra.mxu0 %v8439_v27  ;;  %5711 = vmatprep.mubr.bf16.mxu0 %v4075_v23  ;;  %v8505_v27 = vld [vmem:[#allocation8 + $0x360] ss:$16 sps:$4 sm:$0xff]  }
 0x2db   :  { %5835 = vmatmul.mubr.bf16.vlgmr.msra.gmra.mrb[32].mxu1 %v4072_v17  ;;  %5681 = vmatprep.subr.bf16.mxu0 %v8447_v19  ;;  %v8508_v17 = vld [vmem:[#allocation8 + $0x368] ss:$16 sps:$4 sm:$0xff]   ;;  %v8516_v19 = vld [vmem:[#allocation8 + $0x38c] ss:$16 sps:$4 sm:$0xff]  }
 0x2dc   :  { %5844 = vmatpush1.bf16.msra.mxu1 %v8442_v18  ;;  %5875 = vmatprep.mubr.bf16.mxu1 %v4075_v23  ;;  %v8513_v18 = vld [vmem:[#allocation8 + $0x384] ss:$16 sps:$4 sm:$0xff]   ;;  %v8511_v23 = vld [vmem:[#allocation8 + $0x380] ss:$16 sps:$4 sm:$0xff]  }
 0x2dd   :  { %5845 = vmatprep.subr.bf16.mxu1 %v8450_v51  ;;  %v9501_v51 = vsub.s32 2, %v9333_v47 }
 0x2de   :  { %5682 = vmatpush1.bf16.msra.mxu0 %v8445_v24  ;;  %v8514_v24 = vld [vmem:[#allocation8 + $0x388] ss:$16 sps:$4 sm:$0xff]  }
 0x2df   :  { %5683 = vmatprep.subr.bf16.mxu0 %v8453_v28  ;;  %v8522_v28 = vld [vmem:[#allocation8 + $0x3ac] ss:$16 sps:$4 sm:$0xff]  }
 0x2e0   :  { %5846 = vmatpush1.bf16.msra.mxu1 %v8448_v25  ;;  %v8519_v25 = vld [vmem:[#allocation8 + $0x3a4] ss:$16 sps:$4 sm:$0xff]  }
 0x2e1   :  { %5847 = vmatprep.subr.bf16.mxu1 %v8456_v21  ;;  %v4038_v21 = vsub.s32 5, %v9333_v47 }
 0x2e2   :  { %5684 = vmatpush1.bf16.msra.mxu0 %v8451_v29  ;;  %v8517_v29 = vld [vmem:[#allocation8 + $0x3a0] ss:$16 sps:$4 sm:$0xff]  }
 0x2e3   :  { %5685 = vmatprep.subr.bf16.mxu0 %v8459_v46  ;;  %v8520_v46 = vld [vmem:[#allocation8 + $0x3a8] ss:$16 sps:$4 sm:$0xff]  }
 0x2e4   :  { %5848 = vmatpush1.bf16.msra.mxu1 %v8454_v22  ;;  %v4027_v22 = vrot.slane %v9471_v38, %v9501_v51 }
 0x2e5   :  { %5849 = vmatprep.subr.bf16.mxu1 %v8462_v37  ;;  %v8525_v37 = vld [vmem:[#allocation8 + $0x3c4] ss:$16 sps:$4 sm:$0xff]  }
 0x2e6   :  { %5686 = vmatpush1.bf16.msra.mxu0 %v8457_v39  ;;  %v8528_v39 = vld [vmem:[#allocation8 + $0x3cc] ss:$16 sps:$4 sm:$0xff]  }
 0x2e7   :  { %5687 = vmatprep.subr.bf16.mxu0 %v8465_v40  ;;  %v8523_v40 = vld [vmem:[#allocation8 + $0x3c0] ss:$16 sps:$4 sm:$0xff]  }
 0x2e8   :  { %5850 = vmatpush1.bf16.msra.mxu1 %v8460_v59  ;;  %v4039_v59 = vrot.slane %v9471_v38, %v4038_v21  ;;  %v8582_v21 = vld [vmem:[#allocation8 + $0x4ec] ss:$16 sps:$4 sm:$0xff]  }
 0x2e9   :  { %5851 = vmatprep.subr.bf16.mxu1 %v8468_v41  ;;  %v4058_v41 = vadd.f32 %v4027_v22, %v9464_v33  ;;  %v8535_v33 = vld [vmem:[#allocation8 + $0x400] ss:$16 sps:$4 sm:$0xff]  }
 0x2ea   :  { %5688 = vmatpush1.bf16.msra.mxu0 %v8463_v7  ;;  %v8526_v7 = vld [vmem:[#allocation8 + $0x3c8] ss:$16 sps:$4 sm:$0xff]   ;;  %v8577_v22 = vld [vmem:[#allocation8 + $0x4e0] ss:$16 sps:$4 sm:$0xff]  }
 0x2eb   :  { %5689 = vmatprep.subr.bf16.mxu0 %v8471_v8  ;;  %v8534_v8 = vld [vmem:[#allocation8 + $0x3ec] ss:$16 sps:$4 sm:$0xff]  }
 0x2ec   :  { %5852 = vmatpush1.bf16.msra.mxu1 %v8466_v63  ;;  %v3775_v10 = vpop.f32.mrb[20].mxu0  ;;  %v8531_v63 = vld [vmem:[#allocation8 + $0x3e4] ss:$16 sps:$4 sm:$0xff]  }
 0x2ed   :  { %5853 = vmatprep.subr.bf16.mxu1 %v8474_v42  ;;  %v3776_v49 = vadd.f32 %v3775_v10, %v9478_v20  ;;  %v3777_v43 = vpop.f32.mrb[21].mxu0  ;;  %v8486_v20 = vld [vmem:[#allocation8 + $0x2ec] ss:$16 sps:$4 sm:$0xff]   ;;  %v8537_v10 = vld [vmem:[#allocation8 + $0x404] ss:$16 sps:$4 sm:$0xff]  }
 0x2ee   :  { %v3816_v9 = vpop.f32.mrb[20].mxu1  ;;  %v3778_v50 = vadd.f32 %v3777_v43, %v9480_v26  ;;  %v3779_v53 = vpop.f32.mrb[22].mxu0  ;;  %5690 = vmatpush1.bf16.msra.mxu0 %v8469_v58  ;;  %v8484_v26 = vld [vmem:[#allocation8 + $0x2e8] ss:$16 sps:$4 sm:$0xff]   ;;  %v8529_v58 = vld [vmem:[#allocation8 + $0x3e0] ss:$16 sps:$4 sm:$0xff]  }
 0x2ef   :  { %v3818_v54 = vpop.f32.mrb[21].mxu1  ;;  %v9496_v57 = vadd.f32 %v3816_v9, %v3776_v49  ;;  %v3780_v61 = vpop.f32.mrb[23].mxu0  ;;  %5691 = vmatprep.subr.bf16.mxu0 %v8477_v45  ;;  %v8532_v45 = vld [vmem:[#allocation8 + $0x3e8] ss:$16 sps:$4 sm:$0xff]  }
 0x2f0   :  { %5854 = vmatpush1.bf16.msra.mxu1 %v8472_v44  ;;  %v3820_v55 = vpop.f32.mrb[22].mxu1  ;;  %v9498_v0 = vadd.f32 %v3818_v54, %v3778_v50  ;;  %v4066_v44 = vmax.f32 %v4058_v41, 0.0  ;;  %v8538_v9 = vld [vmem:[#allocation8 + $0x408] ss:$16 sps:$4 sm:$0xff]   ;;  %v8543_v50 = vld [vmem:[#allocation8 + $0x424] ss:$16 sps:$4 sm:$0xff]  }
 0x2f1   :  { %5855 = vmatprep.subr.bf16.mxu1 %v8480_v48  ;;  %v3821_v1 = vpop.f32.mrb[23].mxu1  ;;  %v8540_v48 = vld [vmem:[#allocation8 + $0x40c] ss:$16 sps:$4 sm:$0xff]   ;;  %v8544_v61 = vld [vmem:[#allocation8 + $0x428] ss:$16 sps:$4 sm:$0xff]  }
 0x2f2   :  { %5692 = vmatpush1.bf16.msra.mxu0 %v8475_v56  ;;  %v4061_v42 = vadd.f32 %v4039_v59, %v9498_v0  ;;  %v4074_v43 = vpack.c.bf16 %v4066_v44, %v4066_v44  ;;  %v8546_v54 = vld [vmem:[#allocation8 + $0x42c] ss:$16 sps:$4 sm:$0xff]   ;;  %v8541_v56 = vld [vmem:[#allocation8 + $0x420] ss:$16 sps:$4 sm:$0xff]   ;;  %v8550_v0 = vld [vmem:[#allocation8 + $0x448] ss:$16 sps:$4 sm:$0xff]  }
 0x2f3   :  { %5693 = vmatprep.subr.bf16.mxu0 %v8483_v52  ;;  %v8552_v52 = vld [vmem:[#allocation8 + $0x44c] ss:$16 sps:$4 sm:$0xff]   ;;  %v8547_v55 = vld [vmem:[#allocation8 + $0x440] ss:$16 sps:$4 sm:$0xff]   ;;  %v8591_v41 = vld [vmem:[#allocation8 + $0x524] ss:$16 sps:$4 sm:$0xff]  }
 0x2f4   :  { %5856 = vmatpush1.bf16.msra.mxu1 %v8478_v34  ;;  %v4069_v49 = vmax.f32 %v4061_v42, 0.0  ;;  %v8549_v34 = vld [vmem:[#allocation8 + $0x444] ss:$16 sps:$4 sm:$0xff]   ;;  %v8558_v1 = vld [vmem:[#allocation8 + $0x46c] ss:$16 sps:$4 sm:$0xff]  }
 0x2f5   :  { %5857 = vmatprep.subr.bf16.mxu1 %v8486_v20  ;;  %v8555_v20 = vld [vmem:[#allocation8 + $0x464] ss:$16 sps:$4 sm:$0xff]   ;;  %v8583_v59 = vld [vmem:[#allocation8 + $0x500] ss:$16 sps:$4 sm:$0xff]  }
 0x2f6   :  { %5694 = vmatpush1.bf16.msra.mxu0 %v8481_v2  ;;  %v4077_v53 = vpack.c.bf16 %v4069_v49, %v4069_v49  ;;  %v8553_v2 = vld [vmem:[#allocation8 + $0x460] ss:$16 sps:$4 sm:$0xff]   ;;  %v8597_v42 = vld [vmem:[#allocation8 + $0x544] ss:$16 sps:$4 sm:$0xff]  }
 0x2f7   :  { %5695 = vmatprep.subr.bf16.mxu0 %v8489_v3  ;;  %v8561_v3 = vld [vmem:[#allocation8 + $0x484] ss:$16 sps:$4 sm:$0xff]   ;;  %v8595_v44 = vld [vmem:[#allocation8 + $0x540] ss:$16 sps:$4 sm:$0xff]  }
 0x2f8   :  { %5858 = vmatpush1.bf16.msra.mxu1 %v8484_v26  ;;  %v8556_v26 = vld [vmem:[#allocation8 + $0x468] ss:$16 sps:$4 sm:$0xff]   ;;  %v8601_v49 = vld [vmem:[#allocation8 + $0x560] ss:$16 sps:$4 sm:$0xff]  }
 0x2f9   :  { %5859 = vmatprep.subr.bf16.mxu1 %v8492_v13  ;;  %v8564_v13 = vld [vmem:[#allocation8 + $0x48c] ss:$16 sps:$4 sm:$0xff]  }
 0x2fa   :  { %5696 = vmatpush1.bf16.msra.mxu0 %v8487_v30  ;;  %v8559_v30 = vld [vmem:[#allocation8 + $0x480] ss:$16 sps:$4 sm:$0xff]  }
 0x2fb   :  { %5697 = vmatprep.subr.bf16.mxu0 %v8495_v5  ;;  %v8567_v5 = vld [vmem:[#allocation8 + $0x4a4] ss:$16 sps:$4 sm:$0xff]  }
 0x2fc   :  { %5860 = vmatpush1.bf16.msra.mxu1 %v8490_v4  ;;  %v8562_v4 = vld [vmem:[#allocation8 + $0x488] ss:$16 sps:$4 sm:$0xff]  }
 0x2fd   :  { %5861 = vmatprep.subr.bf16.mxu1 %v8498_v6  ;;  %v8570_v6 = vld [vmem:[#allocation8 + $0x4ac] ss:$16 sps:$4 sm:$0xff]  }
 0x2fe   :  { %5698 = vmatpush1.bf16.msra.mxu0 %v8493_v11  ;;  %v8565_v11 = vld [vmem:[#allocation8 + $0x4a0] ss:$16 sps:$4 sm:$0xff]  }
 0x2ff   :  { %5699 = vmatprep.subr.bf16.mxu0 %v8501_v14  ;;  %v8573_v14 = vld [vmem:[#allocation8 + $0x4c4] ss:$16 sps:$4 sm:$0xff]  }
 0x300   :  { %5862 = vmatpush1.bf16.msra.mxu1 %v8496_v12  ;;  %v8568_v12 = vld [vmem:[#allocation8 + $0x4a8] ss:$16 sps:$4 sm:$0xff]  }
 0x301   :  { %5863 = vmatprep.subr.bf16.mxu1 %v8504_v31 }
 0x302   :  { %5700 = vmatpush1.bf16.msra.mxu0 %v8499_v35  ;;  %v8576_v35 = vld [vmem:[#allocation8 + $0x4cc] ss:$16 sps:$4 sm:$0xff]  }
 0x303   :  { %5701 = vmatprep.subr.bf16.mxu0 %v8507_v15 }
 0x304   :  { %5864 = vmatpush1.bf16.msra.mxu1 %v8502_v36 }
 0x305   :  { %5865 = vmatprep.subr.bf16.mxu1 %v8510_v16 }
 0x306   :  { %5702 = vmatpush1.bf16.msra.mxu0 %v8505_v27 }
 0x307   :  { %5703 = vmatprep.subr.bf16.mxu0 %v8513_v18  ;;  %v8571_v18 = vld [vmem:[#allocation8 + $0x4c0] ss:$16 sps:$4 sm:$0xff]  }
 0x308   :  { %5866 = vmatpush1.bf16.msra.mxu1 %v8508_v17 }
 0x309   :  { %5867 = vmatprep.subr.bf16.mxu1 %v8516_v19 }
 0x30a   :  { %5704 = vmatpush1.bf16.msra.mxu0 %v8511_v23 }
 0x30b   :  { %5705 = vmatprep.subr.bf16.mxu0 %v8519_v25  ;;  %v8579_v25 = vld [vmem:[#allocation8 + $0x4e4] ss:$16 sps:$4 sm:$0xff]  }
 0x30c   :  { %5868 = vmatpush1.bf16.msra.mxu1 %v8514_v24  ;;  %v8574_v24 = vld [vmem:[#allocation8 + $0x4c8] ss:$16 sps:$4 sm:$0xff]  }
 0x30d   :  { %5869 = vmatprep.subr.bf16.mxu1 %v8522_v28 }
 0x30e   :  { %5706 = vmatpush1.bf16.msra.mxu0 %v8517_v29 }
 0x30f   :  { %5707 = vmatprep.subr.bf16.mxu0 %v8525_v37  ;;  %v8585_v37 = vld [vmem:[#allocation8 + $0x504] ss:$16 sps:$4 sm:$0xff]  }
 0x310   :  { %5870 = vmatpush1.bf16.msra.mxu1 %v8520_v46  ;;  %v8580_v46 = vld [vmem:[#allocation8 + $0x4e8] ss:$16 sps:$4 sm:$0xff]  }
 0x311   :  { %5871 = vmatprep.subr.bf16.mxu1 %v8528_v39  ;;  %v8588_v39 = vld [vmem:[#allocation8 + $0x50c] ss:$16 sps:$4 sm:$0xff]  }
 0x312   :  { %5708 = vmatpush1.bf16.msra.mxu0 %v8523_v40  ;;  %v8586_v40 = vld [vmem:[#allocation8 + $0x508] ss:$16 sps:$4 sm:$0xff]  }
 0x313   :  { %5709 = vmatprep.subr.bf16.mxu0 %v8531_v63  ;;  %v8589_v63 = vld [vmem:[#allocation8 + $0x520] ss:$16 sps:$4 sm:$0xff]  }
 0x314   :  { %5872 = vmatpush1.bf16.msra.mxu1 %v8526_v7  ;;  %v8594_v7 = vld [vmem:[#allocation8 + $0x52c] ss:$16 sps:$4 sm:$0xff]  }
 0x315   :  { %5873 = vmatprep.subr.bf16.mxu1 %v8534_v8  ;;  %v8592_v8 = vld [vmem:[#allocation8 + $0x528] ss:$16 sps:$4 sm:$0xff]  }
 0x316   :  { %5710 = vmatpush1.bf16.msra.mxu0 %v8529_v58  ;;  %v8600_v58 = vld [vmem:[#allocation8 + $0x54c] ss:$16 sps:$4 sm:$0xff]  }
 0x317   :  { %5720 = vmatprep.subr.bf16.mxu0 %v8537_v10  ;;  %v8603_v10 = vld [vmem:[#allocation8 + $0x564] ss:$16 sps:$4 sm:$0xff]  }
 0x318   :  { %5874 = vmatpush1.bf16.msra.mxu1 %v8532_v45  ;;  %v8598_v45 = vld [vmem:[#allocation8 + $0x548] ss:$16 sps:$4 sm:$0xff]  }
 0x319   :  { %5884 = vmatprep.subr.bf16.mxu1 %v8540_v48  ;;  %5712 = vmatmul.mubr.bf16.vlgmr.msra.gmra.mrb[32].mxu0 %v4074_v43  ;;  %v8606_v48 = vld [vmem:[#allocation8 + $0x56c] ss:$16 sps:$4 sm:$0xff]  }
 0x31a   :  { %5721 = vmatpush1.bf16.msra.mxu0 %v8535_v33  ;;  %5752 = vmatprep.mubr.bf16.mxu0 %v4077_v53  ;;  %v8604_v33 = vld [vmem:[#allocation8 + $0x568] ss:$16 sps:$4 sm:$0xff]  }
 0x31b   :  { %5876 = vmatmul.mubr.bf16.vlgmr.msra.gmra.mrb[32].mxu1 %v4074_v43  ;;  %5722 = vmatprep.subr.bf16.mxu0 %v8543_v50  ;;  %v8609_v43 = vld [vmem:[#allocation8 + $0x584] ss:$16 sps:$4 sm:$0xff]   ;;  %v8607_v50 = vld [vmem:[#allocation8 + $0x580] ss:$16 sps:$4 sm:$0xff]  }
 0x31c   :  { %5885 = vmatpush1.bf16.msra.mxu1 %v8538_v9  ;;  %5916 = vmatprep.mubr.bf16.mxu1 %v4077_v53  ;;  %v8612_v9 = vld [vmem:[#allocation8 + $0x58c] ss:$16 sps:$4 sm:$0xff]   ;;  %v4034_v53 = vsub.s32 4, %v9333_v47 }
 0x31d   :  { %5886 = vmatprep.subr.bf16.mxu1 %v8546_v54  ;;  %v8610_v54 = vld [vmem:[#allocation8 + $0x588] ss:$16 sps:$4 sm:$0xff]  }
 0x31e   :  { %5723 = vmatpush1.bf16.msra.mxu0 %v8541_v56  ;;  %v8615_v56 = vld [vmem:[#allocation8 + $0x5a4] ss:$16 sps:$4 sm:$0xff]  }
 0x31f   :  { %5724 = vmatprep.subr.bf16.mxu0 %v8549_v34  ;;  %v8613_v34 = vld [vmem:[#allocation8 + $0x5a0] ss:$16 sps:$4 sm:$0xff]  }
 0x320   :  { %5887 = vmatpush1.bf16.msra.mxu1 %v8544_v61  ;;  %v8618_v61 = vld [vmem:[#allocation8 + $0x5ac] ss:$16 sps:$4 sm:$0xff]  }
 0x321   :  { %5888 = vmatprep.subr.bf16.mxu1 %v8552_v52  ;;  %v4035_v52 = vrot.slane %v9471_v38, %v4034_v53  ;;  %v8628_v38 = vld [vmem:[#allocation8 + $0x5e8] ss:$16 sps:$4 sm:$0xff]  }
 0x322   :  { %5725 = vmatpush1.bf16.msra.mxu0 %v8547_v55  ;;  %v8616_v55 = vld [vmem:[#allocation8 + $0x5a8] ss:$16 sps:$4 sm:$0xff]  }
 0x323   :  { %5726 = vmatprep.subr.bf16.mxu0 %v8555_v20  ;;  %v8624_v20 = vld [vmem:[#allocation8 + $0x5cc] ss:$16 sps:$4 sm:$0xff]   ;;  %v8670_v53 = vld [vmem:[#allocation8 + $0x6c8] ss:$16 sps:$4 sm:$0xff]  }
 0x324   :  { %5889 = vmatpush1.bf16.msra.mxu1 %v8550_v0  ;;  %v8621_v0 = vld [vmem:[#allocation8 + $0x5c4] ss:$16 sps:$4 sm:$0xff]  }
 0x325   :  { %5890 = vmatprep.subr.bf16.mxu1 %v8558_v1  ;;  %v8619_v1 = vld [vmem:[#allocation8 + $0x5c0] ss:$16 sps:$4 sm:$0xff]  }
 0x326   :  { %5727 = vmatpush1.bf16.msra.mxu0 %v8553_v2  ;;  %v4060_v2 = vadd.f32 %v4035_v52, %v9496_v57  ;;  %v8634_v57 = vld [vmem:[#allocation8 + $0x608] ss:$16 sps:$4 sm:$0xff]   ;;  %v8673_v52 = vld [vmem:[#allocation8 + $0x6e0] ss:$16 sps:$4 sm:$0xff]  }
 0x327   :  { %5728 = vmatprep.subr.bf16.mxu0 %v8561_v3  ;;  %v8627_v3 = vld [vmem:[#allocation8 + $0x5e4] ss:$16 sps:$4 sm:$0xff]  }
 0x328   :  { %5891 = vmatpush1.bf16.msra.mxu1 %v8556_v26  ;;  %v8622_v26 = vld [vmem:[#allocation8 + $0x5c8] ss:$16 sps:$4 sm:$0xff]  }
 0x329   :  { %5892 = vmatprep.subr.bf16.mxu1 %v8564_v13  ;;  %v8630_v13 = vld [vmem:[#allocation8 + $0x5ec] ss:$16 sps:$4 sm:$0xff]  }
 0x32a   :  { %5729 = vmatpush1.bf16.msra.mxu0 %v8559_v30  ;;  %v8625_v30 = vld [vmem:[#allocation8 + $0x5e0] ss:$16 sps:$4 sm:$0xff]  }
 0x32b   :  { %5730 = vmatprep.subr.bf16.mxu0 %v8567_v5  ;;  %v8633_v5 = vld [vmem:[#allocation8 + $0x604] ss:$16 sps:$4 sm:$0xff]  }
 0x32c   :  { %5893 = vmatpush1.bf16.msra.mxu1 %v8562_v4  ;;  %v3857_v31 = vpop.f32.mrb[24].mxu0  ;;  %v4068_v4 = vmax.f32 %v4060_v2, 0.0 }
 0x32d   :  { %5894 = vmatprep.subr.bf16.mxu1 %v8570_v6  ;;  %v3859_v15 = vpop.f32.mrb[25].mxu0  ;;  %v8636_v6 = vld [vmem:[#allocation8 + $0x60c] ss:$16 sps:$4 sm:$0xff]  }
 0x32e   :  { %v3898_v36 = vpop.f32.mrb[24].mxu1  ;;  %v3861_v17 = vpop.f32.mrb[26].mxu0  ;;  %5731 = vmatpush1.bf16.msra.mxu0 %v8565_v11  ;;  %v8631_v11 = vld [vmem:[#allocation8 + $0x600] ss:$16 sps:$4 sm:$0xff]  }
 0x32f   :  { %v9509_v16 = vadd.f32 %v3898_v36, %v3857_v31  ;;  %v3900_v27 = vpop.f32.mrb[25].mxu1  ;;  %v3862_v23 = vpop.f32.mrb[27].mxu0  ;;  %5732 = vmatprep.subr.bf16.mxu0 %v8573_v14  ;;  %v8639_v14 = vld [vmem:[#allocation8 + $0x624] ss:$16 sps:$4 sm:$0xff]   ;;  %v8642_v31 = vld [vmem:[#allocation8 + $0x62c] ss:$16 sps:$4 sm:$0xff]  }
 0x330   :  { %v9511_v19 = vadd.f32 %v3900_v27, %v3859_v15  ;;  %5895 = vmatpush1.bf16.msra.mxu1 %v8568_v12  ;;  %v3902_v28 = vpop.f32.mrb[26].mxu1  ;;  %v4076_v12 = vpack.c.bf16 %v4068_v4, %v4068_v4  ;;  %v8640_v36 = vld [vmem:[#allocation8 + $0x628] ss:$16 sps:$4 sm:$0xff]   ;;  %v8645_v15 = vld [vmem:[#allocation8 + $0x644] ss:$16 sps:$4 sm:$0xff]  }
 0x331   :  { %5896 = vmatprep.subr.bf16.mxu1 %v8576_v35  ;;  %v3903_v29 = vpop.f32.mrb[27].mxu1  ;;  %v8637_v35 = vld [vmem:[#allocation8 + $0x620] ss:$16 sps:$4 sm:$0xff]   ;;  %v8648_v27 = vld [vmem:[#allocation8 + $0x64c] ss:$16 sps:$4 sm:$0xff]  }
 0x332   :  { %5733 = vmatpush1.bf16.msra.mxu0 %v8571_v18  ;;  %v8643_v17 = vld [vmem:[#allocation8 + $0x640] ss:$16 sps:$4 sm:$0xff]   ;;  %v8646_v18 = vld [vmem:[#allocation8 + $0x648] ss:$16 sps:$4 sm:$0xff]   ;;  %v8651_v23 = vld [vmem:[#allocation8 + $0x664] ss:$16 sps:$4 sm:$0xff]  }
 0x333   :  { %5734 = vmatprep.subr.bf16.mxu0 %v8579_v25  ;;  %v8649_v25 = vld [vmem:[#allocation8 + $0x660] ss:$16 sps:$4 sm:$0xff]   ;;  %v8652_v28 = vld [vmem:[#allocation8 + $0x668] ss:$16 sps:$4 sm:$0xff]   ;;  %v8660_v29 = vld [vmem:[#allocation8 + $0x68c] ss:$16 sps:$4 sm:$0xff]  }
 0x334   :  { %5897 = vmatpush1.bf16.msra.mxu1 %v8574_v24  ;;  %v8654_v24 = vld [vmem:[#allocation8 + $0x66c] ss:$16 sps:$4 sm:$0xff]   ;;  %v8685_v4 = vld [vmem:[#allocation8 + $0x720] ss:$16 sps:$4 sm:$0xff]  }
 0x335   :  { %5898 = vmatprep.subr.bf16.mxu1 %v8582_v21  ;;  %v8657_v21 = vld [vmem:[#allocation8 + $0x684] ss:$16 sps:$4 sm:$0xff]  }
 0x336   :  { %5735 = vmatpush1.bf16.msra.mxu0 %v8577_v22  ;;  %v8655_v22 = vld [vmem:[#allocation8 + $0x680] ss:$16 sps:$4 sm:$0xff]  }
 0x337   :  { %5736 = vmatprep.subr.bf16.mxu0 %v8585_v37  ;;  %v8663_v37 = vld [vmem:[#allocation8 + $0x6a4] ss:$16 sps:$4 sm:$0xff]  }
 0x338   :  { %5899 = vmatpush1.bf16.msra.mxu1 %v8580_v46  ;;  %v8658_v46 = vld [vmem:[#allocation8 + $0x688] ss:$16 sps:$4 sm:$0xff]  }
 0x339   :  { %5900 = vmatprep.subr.bf16.mxu1 %v8588_v39  ;;  %v8666_v39 = vld [vmem:[#allocation8 + $0x6ac] ss:$16 sps:$4 sm:$0xff]  }
 0x33a   :  { %5737 = vmatpush1.bf16.msra.mxu0 %v8583_v59  ;;  %v8661_v59 = vld [vmem:[#allocation8 + $0x6a0] ss:$16 sps:$4 sm:$0xff]  }
 0x33b   :  { %5738 = vmatprep.subr.bf16.mxu0 %v8591_v41  ;;  %v8664_v41 = vld [vmem:[#allocation8 + $0x6a8] ss:$16 sps:$4 sm:$0xff]  }
 0x33c   :  { %5901 = vmatpush1.bf16.msra.mxu1 %v8586_v40  ;;  %v4046_v40 = vsub.s32 7, %v9333_v47 }
 0x33d   :  { %5902 = vmatprep.subr.bf16.mxu1 %v8594_v7  ;;  %v8669_v7 = vld [vmem:[#allocation8 + $0x6c4] ss:$16 sps:$4 sm:$0xff]  }
 0x33e   :  { %5739 = vmatpush1.bf16.msra.mxu0 %v8589_v63 }
 0x33f   :  { %5740 = vmatprep.subr.bf16.mxu0 %v8597_v42 }
 0x340   :  { %5903 = vmatpush1.bf16.msra.mxu1 %v8592_v8  ;;  %v8672_v8 = vld [vmem:[#allocation8 + $0x6cc] ss:$16 sps:$4 sm:$0xff]  }
 0x341   :  { %5904 = vmatprep.subr.bf16.mxu1 %v8600_v58 }
 0x342   :  { %5741 = vmatpush1.bf16.msra.mxu0 %v8595_v44 }
 0x343   :  { %5742 = vmatprep.subr.bf16.mxu0 %v8603_v10 }
 0x344   :  { %5905 = vmatpush1.bf16.msra.mxu1 %v8598_v45 }
 0x345   :  { %5906 = vmatprep.subr.bf16.mxu1 %v8606_v48 }
 0x346   :  { %5743 = vmatpush1.bf16.msra.mxu0 %v8601_v49  ;;  %v9519_v49 = vld [vmem:[#allocation6] sm:$0xff] }
 0x347   :  { %5744 = vmatprep.subr.bf16.mxu0 %v8609_v43  ;;  %v8667_v43 = vld [vmem:[#allocation8 + $0x6c0] ss:$16 sps:$4 sm:$0xff]  }
 0x348   :  { %5907 = vmatpush1.bf16.msra.mxu1 %v8604_v33  ;;  %v4047_v33 = vrot.slane %v9519_v49, %v4046_v40  ;;  %v8721_v40 = vld [vmem:[#allocation8 + $0x7e0] ss:$16 sps:$4 sm:$0xff]  }
 0x349   :  { %5908 = vmatprep.subr.bf16.mxu1 %v8612_v9 }
 0x34a   :  { %5745 = vmatpush1.bf16.msra.mxu0 %v8607_v50 }
 0x34b   :  { %5746 = vmatprep.subr.bf16.mxu0 %v8615_v56 }
 0x34c   :  { %5909 = vmatpush1.bf16.msra.mxu1 %v8610_v54  ;;  %v8675_v54 = vld [vmem:[#allocation8 + $0x6e4] ss:$16 sps:$4 sm:$0xff]  }
 0x34d   :  { %5910 = vmatprep.subr.bf16.mxu1 %v8618_v61  ;;  %v8678_v61 = vld [vmem:[#allocation8 + $0x6ec] ss:$16 sps:$4 sm:$0xff]  }
 0x34e   :  { %5747 = vmatpush1.bf16.msra.mxu0 %v8613_v34 }
 0x34f   :  { %5748 = vmatprep.subr.bf16.mxu0 %v8621_v0  ;;  %v8681_v0 = vld [vmem:[#allocation8 + $0x704] ss:$16 sps:$4 sm:$0xff]  }
 0x350   :  { %5911 = vmatpush1.bf16.msra.mxu1 %v8616_v55  ;;  %v8676_v55 = vld [vmem:[#allocation8 + $0x6e8] ss:$16 sps:$4 sm:$0xff]  }
 0x351   :  { %5912 = vmatprep.subr.bf16.mxu1 %v8624_v20 }
 0x352   :  { %5749 = vmatpush1.bf16.msra.mxu0 %v8619_v1  ;;  %v8684_v1 = vld [vmem:[#allocation8 + $0x70c] ss:$16 sps:$4 sm:$0xff]  }
 0x353   :  { %5750 = vmatprep.subr.bf16.mxu0 %v8627_v3  ;;  %v8682_v3 = vld [vmem:[#allocation8 + $0x708] ss:$16 sps:$4 sm:$0xff]  }
 0x354   :  { %5913 = vmatpush1.bf16.msra.mxu1 %v8622_v26  ;;  %v8679_v26 = vld [vmem:[#allocation8 + $0x700] ss:$16 sps:$4 sm:$0xff]  }
 0x355   :  { %5914 = vmatprep.subr.bf16.mxu1 %v8630_v13  ;;  %v8687_v13 = vld [vmem:[#allocation8 + $0x724] ss:$16 sps:$4 sm:$0xff]  }
 0x356   :  { %5751 = vmatpush1.bf16.msra.mxu0 %v8625_v30  ;;  %v8690_v30 = vld [vmem:[#allocation8 + $0x72c] ss:$16 sps:$4 sm:$0xff]  }
 0x357   :  { %5761 = vmatprep.subr.bf16.mxu0 %v8633_v5  ;;  %v8693_v5 = vld [vmem:[#allocation8 + $0x744] ss:$16 sps:$4 sm:$0xff]  }
 0x358   :  { %5915 = vmatpush1.bf16.msra.mxu1 %v8628_v38  ;;  %v8688_v38 = vld [vmem:[#allocation8 + $0x728] ss:$16 sps:$4 sm:$0xff]  }
 0x359   :  { %5925 = vmatprep.subr.bf16.mxu1 %v8636_v6  ;;  %5753 = vmatmul.mubr.bf16.vlgmr.msra.gmra.mrb[32].mxu0 %v4076_v12  ;;  %v8696_v6 = vld [vmem:[#allocation8 + $0x74c] ss:$16 sps:$4 sm:$0xff]  }
 0x35a   :  { %5762 = vmatpush1.bf16.msra.mxu0 %v8631_v11  ;;  %v8691_v11 = vld [vmem:[#allocation8 + $0x740] ss:$16 sps:$4 sm:$0xff]  }
 0x35b   :  { %5917 = vmatmul.mubr.bf16.vlgmr.msra.gmra.mrb[32].mxu1 %v4076_v12  ;;  %5763 = vmatprep.subr.bf16.mxu0 %v8639_v14  ;;  %v8694_v12 = vld [vmem:[#allocation8 + $0x748] ss:$16 sps:$4 sm:$0xff]   ;;  %v8702_v14 = vld [vmem:[#allocation8 + $0x76c] ss:$16 sps:$4 sm:$0xff]  }
 0x35c   :  { %5926 = vmatpush1.bf16.msra.mxu1 %v8634_v57  ;;  %v8699_v57 = vld [vmem:[#allocation8 + $0x764] ss:$16 sps:$4 sm:$0xff]  }
 0x35d   :  { %5927 = vmatprep.subr.bf16.mxu1 %v8642_v31  ;;  %v8697_v31 = vld [vmem:[#allocation8 + $0x760] ss:$16 sps:$4 sm:$0xff]  }
 0x35e   :  { %5764 = vmatpush1.bf16.msra.mxu0 %v8637_v35  ;;  %v8700_v35 = vld [vmem:[#allocation8 + $0x768] ss:$16 sps:$4 sm:$0xff]  }
 0x35f   :  { %5765 = vmatprep.subr.bf16.mxu0 %v8645_v15  ;;  %v8708_v15 = vld [vmem:[#allocation8 + $0x78c] ss:$16 sps:$4 sm:$0xff]  }
 0x360   :  { %5928 = vmatpush1.bf16.msra.mxu1 %v8640_v36  ;;  %v8705_v36 = vld [vmem:[#allocation8 + $0x784] ss:$16 sps:$4 sm:$0xff]  }
 0x361   :  { %5929 = vmatprep.subr.bf16.mxu1 %v8648_v27  ;;  %v8703_v27 = vld [vmem:[#allocation8 + $0x780] ss:$16 sps:$4 sm:$0xff]  }
 0x362   :  { %5766 = vmatpush1.bf16.msra.mxu0 %v8643_v17  ;;  %v4042_v17 = vsub.s32 6, %v9333_v47 }
 0x363   :  { %5767 = vmatprep.subr.bf16.mxu0 %v8651_v23  ;;  %v8711_v23 = vld [vmem:[#allocation8 + $0x7a4] ss:$16 sps:$4 sm:$0xff]  }
 0x364   :  { %5930 = vmatpush1.bf16.msra.mxu1 %v8646_v18  ;;  %v8706_v18 = vld [vmem:[#allocation8 + $0x788] ss:$16 sps:$4 sm:$0xff]  }
 0x365   :  { %5931 = vmatprep.subr.bf16.mxu1 %v8654_v24  ;;  %v8714_v24 = vld [vmem:[#allocation8 + $0x7ac] ss:$16 sps:$4 sm:$0xff]  }
 0x366   :  { %5768 = vmatpush1.bf16.msra.mxu0 %v8649_v25  ;;  %v8709_v25 = vld [vmem:[#allocation8 + $0x7a0] ss:$16 sps:$4 sm:$0xff]  }
 0x367   :  { %5769 = vmatprep.subr.bf16.mxu0 %v8657_v21  ;;  %v8712_v21 = vld [vmem:[#allocation8 + $0x7a8] ss:$16 sps:$4 sm:$0xff]  }
 0x368   :  { %5932 = vmatpush1.bf16.msra.mxu1 %v8652_v28  ;;  %v4043_v28 = vrot.slane %v9519_v49, %v4042_v17  ;;  %v8736_v49 = vld [vmem:[#allocation11 + $0x28] ss:$16 sps:$4 sm:$0xff]   ;;  %v8787_v17 = vld [vmem:[#allocation11 + $0x140] ss:$16 sps:$4 sm:$0xff]  }
 0x369   :  { %5933 = vmatprep.subr.bf16.mxu1 %v8660_v29  ;;  %v8717_v29 = vld [vmem:[#allocation8 + $0x7c4] ss:$16 sps:$4 sm:$0xff]  }
 0x36a   :  { %5770 = vmatpush1.bf16.msra.mxu0 %v8655_v22  ;;  %v8720_v22 = vld [vmem:[#allocation8 + $0x7cc] ss:$16 sps:$4 sm:$0xff]  }
 0x36b   :  { %5771 = vmatprep.subr.bf16.mxu0 %v8663_v37  ;;  %v8718_v37 = vld [vmem:[#allocation8 + $0x7c8] ss:$16 sps:$4 sm:$0xff]  }
 0x36c   :  { %5934 = vmatpush1.bf16.msra.mxu1 %v8658_v46  ;;  %v3939_v63 = vpop.f32.mrb[28].mxu0  ;;  %v8715_v46 = vld [vmem:[#allocation8 + $0x7c0] ss:$16 sps:$4 sm:$0xff]  }
 0x36d   :  { %5935 = vmatprep.subr.bf16.mxu1 %v8666_v39  ;;  %v3940_v42 = vadd.f32 %v3939_v63, %v9509_v16  ;;  %v3941_v58 = vpop.f32.mrb[29].mxu0  ;;  %v8723_v39 = vld [vmem:[#allocation8 + $0x7e4] ss:$16 sps:$4 sm:$0xff]   ;;  %v8729_v63 = vld [vmem:[#allocation11 + $0x4] ss:$16 sps:$4 sm:$0xff]  }
 0x36e   :  { %v3980_v44 = vpop.f32.mrb[28].mxu1  ;;  %v3942_v45 = vadd.f32 %v3941_v58, %v9511_v19  ;;  %v3943_v10 = vpop.f32.mrb[30].mxu0  ;;  %5772 = vmatpush1.bf16.msra.mxu0 %v8661_v59  ;;  %v8726_v59 = vld [vmem:[#allocation8 + $0x7ec] ss:$16 sps:$4 sm:$0xff]  }
 0x36f   :  { %v3982_v48 = vpop.f32.mrb[29].mxu1  ;;  %v9522_v9 = vadd.f32 %v3980_v44, %v3940_v42  ;;  %v3944_v50 = vpop.f32.mrb[31].mxu0  ;;  %5773 = vmatprep.subr.bf16.mxu0 %v8669_v7  ;;  %v8724_v7 = vld [vmem:[#allocation8 + $0x7e8] ss:$16 sps:$4 sm:$0xff]   ;;  %v8727_v42 = vld [vmem:[#allocation11] ss:$16 sps:$4 sm:$0xff]  }
 0x370   :  { %5936 = vmatpush1.bf16.msra.mxu1 %v8664_v41  ;;  %v3984_v16 = vpop.f32.mrb[30].mxu1  ;;  %v3983_v56 = vadd.f32 %v3982_v48, %v3942_v45  ;;  %v8730_v44 = vld [vmem:[#allocation11 + $0x8] ss:$16 sps:$4 sm:$0xff]   ;;  %v8735_v45 = vld [vmem:[#allocation11 + $0x24] ss:$16 sps:$4 sm:$0xff]  }
 0x371   :  { %5937 = vmatprep.subr.bf16.mxu1 %v8672_v8  ;;  %v3985_v19 = vpop.f32.mrb[31].mxu1  ;;  %v4062_v47 = vadd.f32 %v4043_v28, %v9522_v9  ;;  %v8732_v8 = vld [vmem:[#allocation11 + $0xc] ss:$16 sps:$4 sm:$0xff]   ;;  %v8733_v48 = vld [vmem:[#allocation11 + $0x20] ss:$16 sps:$4 sm:$0xff]  }
 0x372   :  { %v4063_v34 = vadd.f32 %v4047_v33, %v3983_v56  ;;  %5774 = vmatpush1.bf16.msra.mxu0 %v8667_v43  ;;  %v8738_v10 = vld [vmem:[#allocation11 + $0x2c] ss:$16 sps:$4 sm:$0xff]   ;;  %v8741_v33 = vld [vmem:[#allocation11 + $0x44] ss:$16 sps:$4 sm:$0xff]   ;;  %v8739_v9 = vld [vmem:[#allocation11 + $0x40] ss:$16 sps:$4 sm:$0xff]  }
 0x373   :  { %5775 = vmatprep.subr.bf16.mxu0 %v8675_v54  ;;  %v4070_v41 = vmax.f32 %v4062_v47, 0.0  ;;  %v8744_v43 = vld [vmem:[#allocation11 + $0x4c] ss:$16 sps:$4 sm:$0xff]   ;;  %v8742_v50 = vld [vmem:[#allocation11 + $0x48] ss:$16 sps:$4 sm:$0xff]  }
 0x374   :  { %5938 = vmatpush1.bf16.msra.mxu1 %v8670_v53  ;;  %v4071_v20 = vmax.f32 %v4063_v34, 0.0  ;;  %v8747_v53 = vld [vmem:[#allocation11 + $0x64] ss:$16 sps:$4 sm:$0xff]   ;;  %v8750_v54 = vld [vmem:[#allocation11 + $0x6c] ss:$16 sps:$4 sm:$0xff]  }
 0x375   :  { %5939 = vmatprep.subr.bf16.mxu1 %v8678_v61  ;;  %v4078_v58 = vpack.c.bf16 %v4070_v41, %v4070_v41  ;;  %v8745_v16 = vld [vmem:[#allocation11 + $0x60] ss:$16 sps:$4 sm:$0xff]   ;;  %v8748_v56 = vld [vmem:[#allocation11 + $0x68] ss:$16 sps:$4 sm:$0xff]   ;;  %v8753_v61 = vld [vmem:[#allocation11 + $0x84] ss:$16 sps:$4 sm:$0xff]  }
 0x376   :  { %v4079_v2 = vpack.c.bf16 %v4071_v20, %v4071_v20  ;;  %5776 = vmatpush1.bf16.msra.mxu0 %v8673_v52  ;;  %v8756_v19 = vld [vmem:[#allocation11 + $0x8c] ss:$16 sps:$4 sm:$0xff]   ;;  %v8751_v34 = vld [vmem:[#allocation11 + $0x80] ss:$16 sps:$4 sm:$0xff]   ;;  %v8754_v52 = vld [vmem:[#allocation11 + $0x88] ss:$16 sps:$4 sm:$0xff]  }
 0x377   :  { %5777 = vmatprep.subr.bf16.mxu0 %v8681_v0  ;;  %v8762_v0 = vld [vmem:[#allocation11 + $0xac] ss:$16 sps:$4 sm:$0xff]   ;;  %v8757_v20 = vld [vmem:[#allocation11 + $0xa0] ss:$16 sps:$4 sm:$0xff]   ;;  %v8796_v28 = vld [vmem:[#allocation11 + $0x168] ss:$16 sps:$4 sm:$0xff]  }
 0x378   :  { %5940 = vmatpush1.bf16.msra.mxu1 %v8676_v55  ;;  %5793 = vmatprep.mubr.bf16.mxu0 %v4079_v2  ;;  %v8759_v55 = vld [vmem:[#allocation11 + $0xa4] ss:$16 sps:$4 sm:$0xff]   ;;  %v8816_v41 = vld [vmem:[#allocation11 + $0x1cc] ss:$16 sps:$4 sm:$0xff]  }
 0x379   :  { %5957 = vmatprep.mubr.bf16.mxu1 %v4079_v2  ;;  %5941 = vmatprep.subr.bf16.mxu1 %v8684_v1  ;;  %v8760_v1 = vld [vmem:[#allocation11 + $0xa8] ss:$16 sps:$4 sm:$0xff]   ;;  %v8765_v2 = vld [vmem:[#allocation11 + $0xc4] ss:$16 sps:$4 sm:$0xff]  }
 0x37a   :  { %5778 = vmatpush1.bf16.msra.mxu0 %v8679_v26  ;;  %v8768_v26 = vld [vmem:[#allocation11 + $0xcc] ss:$16 sps:$4 sm:$0xff]   ;;  %v8807_v47 = vld [vmem:[#allocation11 + $0x1a4] ss:$16 sps:$4 sm:$0xff]  }
 0x37b   :  { %5779 = vmatprep.subr.bf16.mxu0 %v8687_v13  ;;  %v8766_v13 = vld [vmem:[#allocation11 + $0xc8] ss:$16 sps:$4 sm:$0xff]  }
 0x37c   :  { %5942 = vmatpush1.bf16.msra.mxu1 %v8682_v3  ;;  %v8763_v3 = vld [vmem:[#allocation11 + $0xc0] ss:$16 sps:$4 sm:$0xff]  }
 0x37d   :  { %5943 = vmatprep.subr.bf16.mxu1 %v8690_v30  ;;  %v8771_v30 = vld [vmem:[#allocation11 + $0xe4] ss:$16 sps:$4 sm:$0xff]  }
 0x37e   :  { %5780 = vmatpush1.bf16.msra.mxu0 %v8685_v4  ;;  %v8774_v4 = vld [vmem:[#allocation11 + $0xec] ss:$16 sps:$4 sm:$0xff]  }
 0x37f   :  { %5781 = vmatprep.subr.bf16.mxu0 %v8693_v5  ;;  %v8772_v5 = vld [vmem:[#allocation11 + $0xe8] ss:$16 sps:$4 sm:$0xff]  }
 0x380   :  { %5944 = vmatpush1.bf16.msra.mxu1 %v8688_v38  ;;  %v8769_v38 = vld [vmem:[#allocation11 + $0xe0] ss:$16 sps:$4 sm:$0xff]  }
 0x381   :  { %5945 = vmatprep.subr.bf16.mxu1 %v8696_v6  ;;  %v8777_v6 = vld [vmem:[#allocation11 + $0x104] ss:$16 sps:$4 sm:$0xff]  }
 0x382   :  { %5782 = vmatpush1.bf16.msra.mxu0 %v8691_v11  ;;  %v8780_v11 = vld [vmem:[#allocation11 + $0x10c] ss:$16 sps:$4 sm:$0xff]  }
 0x383   :  { %5783 = vmatprep.subr.bf16.mxu0 %v8699_v57  ;;  %v8778_v57 = vld [vmem:[#allocation11 + $0x108] ss:$16 sps:$4 sm:$0xff]  }
 0x384   :  { %5946 = vmatpush1.bf16.msra.mxu1 %v8694_v12  ;;  %v8775_v12 = vld [vmem:[#allocation11 + $0x100] ss:$16 sps:$4 sm:$0xff]  }
 0x385   :  { %5947 = vmatprep.subr.bf16.mxu1 %v8702_v14  ;;  %v8783_v14 = vld [vmem:[#allocation11 + $0x124] ss:$16 sps:$4 sm:$0xff]  }
 0x386   :  { %5784 = vmatpush1.bf16.msra.mxu0 %v8697_v31  ;;  %v8786_v31 = vld [vmem:[#allocation11 + $0x12c] ss:$16 sps:$4 sm:$0xff]  }
 0x387   :  { %5785 = vmatprep.subr.bf16.mxu0 %v8705_v36  ;;  %v8784_v36 = vld [vmem:[#allocation11 + $0x128] ss:$16 sps:$4 sm:$0xff]  }
 0x388   :  { %5948 = vmatpush1.bf16.msra.mxu1 %v8700_v35  ;;  %v8781_v35 = vld [vmem:[#allocation11 + $0x120] ss:$16 sps:$4 sm:$0xff]  }
 0x389   :  { %5949 = vmatprep.subr.bf16.mxu1 %v8708_v15  ;;  %v8789_v15 = vld [vmem:[#allocation11 + $0x144] ss:$16 sps:$4 sm:$0xff]  }
 0x38a   :  { %5786 = vmatpush1.bf16.msra.mxu0 %v8703_v27  ;;  %v8792_v27 = vld [vmem:[#allocation11 + $0x14c] ss:$16 sps:$4 sm:$0xff]  }
 0x38b   :  { %5787 = vmatprep.subr.bf16.mxu0 %v8711_v23  ;;  %v8795_v23 = vld [vmem:[#allocation11 + $0x164] ss:$16 sps:$4 sm:$0xff]  }
 0x38c   :  { %5950 = vmatpush1.bf16.msra.mxu1 %v8706_v18  ;;  %v8790_v18 = vld [vmem:[#allocation11 + $0x148] ss:$16 sps:$4 sm:$0xff]  }
 0x38d   :  { %5951 = vmatprep.subr.bf16.mxu1 %v8714_v24  ;;  %v8798_v24 = vld [vmem:[#allocation11 + $0x16c] ss:$16 sps:$4 sm:$0xff]  }
 0x38e   :  { %5788 = vmatpush1.bf16.msra.mxu0 %v8709_v25  ;;  %v8793_v25 = vld [vmem:[#allocation11 + $0x160] ss:$16 sps:$4 sm:$0xff]  }
 0x38f   :  { %5789 = vmatprep.subr.bf16.mxu0 %v8717_v29  ;;  %v8804_v29 = vld [vmem:[#allocation11 + $0x18c] ss:$16 sps:$4 sm:$0xff]  }
 0x390   :  { %5952 = vmatpush1.bf16.msra.mxu1 %v8712_v21  ;;  %v8801_v21 = vld [vmem:[#allocation11 + $0x184] ss:$16 sps:$4 sm:$0xff]  }
 0x391   :  { %5953 = vmatprep.subr.bf16.mxu1 %v8720_v22  ;;  %v8799_v22 = vld [vmem:[#allocation11 + $0x180] ss:$16 sps:$4 sm:$0xff]  }
 0x392   :  { %5790 = vmatpush1.bf16.msra.mxu0 %v8715_v46  ;;  %v8802_v46 = vld [vmem:[#allocation11 + $0x188] ss:$16 sps:$4 sm:$0xff]  }
 0x393   :  { %5791 = vmatprep.subr.bf16.mxu0 %v8723_v39  ;;  %v8805_v39 = vld [vmem:[#allocation11 + $0x1a0] ss:$16 sps:$4 sm:$0xff]  }
 0x394   :  { %5954 = vmatpush1.bf16.msra.mxu1 %v8718_v37  ;;  %v8810_v37 = vld [vmem:[#allocation11 + $0x1ac] ss:$16 sps:$4 sm:$0xff]  }
 0x395   :  { %5955 = vmatprep.subr.bf16.mxu1 %v8726_v59  ;;  %v8808_v59 = vld [vmem:[#allocation11 + $0x1a8] ss:$16 sps:$4 sm:$0xff]  }
 0x396   :  { %5792 = vmatpush1.bf16.msra.mxu0 %v8721_v40  ;;  %v8813_v40 = vld [vmem:[#allocation11 + $0x1c4] ss:$16 sps:$4 sm:$0xff]  }
 0x397   :  { %6764 = vmatprep.subr.bf16.mxu0 %v8729_v63  ;;  %v8814_v63 = vld [vmem:[#allocation11 + $0x1c8] ss:$16 sps:$4 sm:$0xff]  }
 0x398   :  { %5956 = vmatpush1.bf16.msra.mxu1 %v8724_v7  ;;  %v8811_v7 = vld [vmem:[#allocation11 + $0x1c0] ss:$16 sps:$4 sm:$0xff]  }
 0x399   :  { %6846 = vmatprep.subr.bf16.mxu1 %v8732_v8  ;;  %5794 = vmatmul.mubr.bf16.vlgmr.msra.gmra.mrb[32].mxu0 %v4078_v58  ;;  %v8819_v8 = vld [vmem:[#allocation11 + $0x1e4] ss:$16 sps:$4 sm:$0xff]  }
 0x39a   :  { %6765 = vmatpush1.bf16.msra.mxu0 %v8727_v42  ;;  %v8822_v42 = vld [vmem:[#allocation11 + $0x1ec] ss:$16 sps:$4 sm:$0xff]  }
 0x39b   :  { %5958 = vmatmul.mubr.bf16.vlgmr.msra.gmra.mrb[32].mxu1 %v4078_v58  ;;  %6766 = vmatprep.subr.bf16.mxu0 %v8735_v45  ;;  %v8817_v58 = vld [vmem:[#allocation11 + $0x1e0] ss:$16 sps:$4 sm:$0xff]   ;;  %v8825_v45 = vld [vmem:[#allocation11 + $0x204] ss:$16 sps:$4 sm:$0xff]  }
 0x39c   :  { %6847 = vmatpush1.bf16.msra.mxu1 %v8730_v44  ;;  %v8820_v44 = vld [vmem:[#allocation11 + $0x1e8] ss:$16 sps:$4 sm:$0xff]  }
 0x39d   :  { %6848 = vmatprep.subr.bf16.mxu1 %v8738_v10  ;;  %v8828_v10 = vld [vmem:[#allocation11 + $0x20c] ss:$16 sps:$4 sm:$0xff]  }
 0x39e   :  { %6767 = vmatpush1.bf16.msra.mxu0 %v8733_v48  ;;  %v9527_v48 = vld [vmem:[#allocation9] sm:$0xf] }
 0x39f   :  { %6768 = vmatprep.subr.bf16.mxu0 %v8741_v33  ;;  %v4345_v33 = vrot.slane %v9527_v48, %v9469_v32 }
 0x3a0   :  { %6849 = vmatpush1.bf16.msra.mxu1 %v8736_v49  ;;  %v4341_v49 = vrot.slane %v9527_v48, %v9483_v60 }
 0x3a1   :  { %6850 = vmatprep.subr.bf16.mxu1 %v8744_v43  ;;  %v4353_v43 = vrot.slane %v9527_v48, %v9486_v62 }
 0x3a2   :  { %6769 = vmatpush1.bf16.msra.mxu0 %v8739_v9 }
 0x3a3   :  { %6770 = vmatprep.subr.bf16.mxu0 %v8747_v53 }
 0x3a4   :  { %6851 = vmatpush1.bf16.msra.mxu1 %v8742_v50 }
 0x3a5   :  { %6852 = vmatprep.subr.bf16.mxu1 %v8750_v54 }
 0x3a6   :  { %6771 = vmatpush1.bf16.msra.mxu0 %v8745_v16 }
 0x3a7   :  { %6772 = vmatprep.subr.bf16.mxu0 %v8753_v61 }
 0x3a8   :  { %6853 = vmatpush1.bf16.msra.mxu1 %v8748_v56 }
 0x3a9   :  { %6854 = vmatprep.subr.bf16.mxu1 %v8756_v19 }
 0x3aa   :  { %6773 = vmatpush1.bf16.msra.mxu0 %v8751_v34 }
 0x3ab   :  { %6774 = vmatprep.subr.bf16.mxu0 %v8759_v55 }
 0x3ac   :  { %6855 = vmatpush1.bf16.msra.mxu1 %v8754_v52 }
 0x3ad   :  { %6856 = vmatprep.subr.bf16.mxu1 %v8762_v0 }
 0x3ae   :  { %6775 = vmatpush1.bf16.msra.mxu0 %v8757_v20 }
 0x3af   :  { %6776 = vmatprep.subr.bf16.mxu0 %v8765_v2 }
 0x3b0   :  { %6857 = vmatpush1.bf16.msra.mxu1 %v8760_v1 }
 0x3b1   :  { %6858 = vmatprep.subr.bf16.mxu1 %v8768_v26  ;;  %v8823_v26 = vld [vmem:[#allocation11 + $0x200] ss:$16 sps:$4 sm:$0xff]  }
 0x3b2   :  { %6777 = vmatpush1.bf16.msra.mxu0 %v8763_v3  ;;  %v8826_v3 = vld [vmem:[#allocation11 + $0x208] ss:$16 sps:$4 sm:$0xff]  }
 0x3b3   :  { %6778 = vmatprep.subr.bf16.mxu0 %v8771_v30  ;;  %v8831_v30 = vld [vmem:[#allocation11 + $0x224] ss:$16 sps:$4 sm:$0xff]  }
 0x3b4   :  { %6859 = vmatpush1.bf16.msra.mxu1 %v8766_v13 }
 0x3b5   :  { %6860 = vmatprep.subr.bf16.mxu1 %v8774_v4  ;;  %v8834_v4 = vld [vmem:[#allocation11 + $0x22c] ss:$16 sps:$4 sm:$0xff]  }
 0x3b6   :  { %6779 = vmatpush1.bf16.msra.mxu0 %v8769_v38 }
 0x3b7   :  { %6780 = vmatprep.subr.bf16.mxu0 %v8777_v6  ;;  %v8832_v6 = vld [vmem:[#allocation11 + $0x228] ss:$16 sps:$4 sm:$0xff]  }
 0x3b8   :  { %6861 = vmatpush1.bf16.msra.mxu1 %v8772_v5  ;;  %v8829_v5 = vld [vmem:[#allocation11 + $0x220] ss:$16 sps:$4 sm:$0xff]  }
 0x3b9   :  { %6862 = vmatprep.subr.bf16.mxu1 %v8780_v11  ;;  %v8837_v11 = vld [vmem:[#allocation11 + $0x244] ss:$16 sps:$4 sm:$0xff]  }
 0x3ba   :  { %6781 = vmatpush1.bf16.msra.mxu0 %v8775_v12  ;;  %v8840_v12 = vld [vmem:[#allocation11 + $0x24c] ss:$16 sps:$4 sm:$0xff]  }
 0x3bb   :  { %6782 = vmatprep.subr.bf16.mxu0 %v8783_v14  ;;  %v8838_v14 = vld [vmem:[#allocation11 + $0x248] ss:$16 sps:$4 sm:$0xff]  }
 0x3bc   :  { %6863 = vmatpush1.bf16.msra.mxu1 %v8778_v57  ;;  %v8835_v57 = vld [vmem:[#allocation11 + $0x240] ss:$16 sps:$4 sm:$0xff]  }
 0x3bd   :  { %6864 = vmatprep.subr.bf16.mxu1 %v8786_v31  ;;  %v8843_v31 = vld [vmem:[#allocation11 + $0x264] ss:$16 sps:$4 sm:$0xff]  }
 0x3be   :  { %6783 = vmatpush1.bf16.msra.mxu0 %v8781_v35  ;;  %v8846_v35 = vld [vmem:[#allocation11 + $0x26c] ss:$16 sps:$4 sm:$0xff]  }
 0x3bf   :  { %6784 = vmatprep.subr.bf16.mxu0 %v8789_v15  ;;  %v8844_v15 = vld [vmem:[#allocation11 + $0x268] ss:$16 sps:$4 sm:$0xff]  }
 0x3c0   :  { %6865 = vmatpush1.bf16.msra.mxu1 %v8784_v36  ;;  %v8841_v36 = vld [vmem:[#allocation11 + $0x260] ss:$16 sps:$4 sm:$0xff]  }
 0x3c1   :  { %6866 = vmatprep.subr.bf16.mxu1 %v8792_v27  ;;  %v8849_v27 = vld [vmem:[#allocation11 + $0x284] ss:$16 sps:$4 sm:$0xff]  }
 0x3c2   :  { %6785 = vmatpush1.bf16.msra.mxu0 %v8787_v17  ;;  %v8852_v17 = vld [vmem:[#allocation11 + $0x28c] ss:$16 sps:$4 sm:$0xff]  }
 0x3c3   :  { %6786 = vmatprep.subr.bf16.mxu0 %v8795_v23  ;;  %v8850_v23 = vld [vmem:[#allocation11 + $0x288] ss:$16 sps:$4 sm:$0xff]  }
 0x3c4   :  { %6867 = vmatpush1.bf16.msra.mxu1 %v8790_v18  ;;  %v8847_v18 = vld [vmem:[#allocation11 + $0x280] ss:$16 sps:$4 sm:$0xff]  }
 0x3c5   :  { %6868 = vmatprep.subr.bf16.mxu1 %v8798_v24  ;;  %v8855_v24 = vld [vmem:[#allocation11 + $0x2a4] ss:$16 sps:$4 sm:$0xff]  }
 0x3c6   :  { %6787 = vmatpush1.bf16.msra.mxu0 %v8793_v25  ;;  %v8858_v25 = vld [vmem:[#allocation11 + $0x2ac] ss:$16 sps:$4 sm:$0xff]  }
 0x3c7   :  { %6788 = vmatprep.subr.bf16.mxu0 %v8801_v21  ;;  %v8856_v21 = vld [vmem:[#allocation11 + $0x2a8] ss:$16 sps:$4 sm:$0xff]  }
 0x3c8   :  { %6869 = vmatpush1.bf16.msra.mxu1 %v8796_v28  ;;  %v8853_v28 = vld [vmem:[#allocation11 + $0x2a0] ss:$16 sps:$4 sm:$0xff]  }
 0x3c9   :  { %6870 = vmatprep.subr.bf16.mxu1 %v8804_v29  ;;  %v8861_v29 = vld [vmem:[#allocation11 + $0x2c4] ss:$16 sps:$4 sm:$0xff]  }
 0x3ca   :  { %6789 = vmatpush1.bf16.msra.mxu0 %v8799_v22  ;;  %v8864_v22 = vld [vmem:[#allocation11 + $0x2cc] ss:$16 sps:$4 sm:$0xff]  }
 0x3cb   :  { %6790 = vmatprep.subr.bf16.mxu0 %v8807_v47  ;;  %v8862_v47 = vld [vmem:[#allocation11 + $0x2c8] ss:$16 sps:$4 sm:$0xff]  }
 0x3cc   :  { %6871 = vmatpush1.bf16.msra.mxu1 %v8802_v46  ;;  %v8859_v46 = vld [vmem:[#allocation11 + $0x2c0] ss:$16 sps:$4 sm:$0xff]  }
 0x3cd   :  { %6872 = vmatprep.subr.bf16.mxu1 %v8810_v37  ;;  %v8867_v37 = vld [vmem:[#allocation11 + $0x2e4] ss:$16 sps:$4 sm:$0xff]  }
 0x3ce   :  { %6791 = vmatpush1.bf16.msra.mxu0 %v8805_v39  ;;  %v8870_v39 = vld [vmem:[#allocation11 + $0x2ec] ss:$16 sps:$4 sm:$0xff]  }
 0x3cf   :  { %6792 = vmatprep.subr.bf16.mxu0 %v8813_v40  ;;  %v8868_v40 = vld [vmem:[#allocation11 + $0x2e8] ss:$16 sps:$4 sm:$0xff]  }
 0x3d0   :  { %6873 = vmatpush1.bf16.msra.mxu1 %v8808_v59  ;;  %v8865_v59 = vld [vmem:[#allocation11 + $0x2e0] ss:$16 sps:$4 sm:$0xff]  }
 0x3d1   :  { %6874 = vmatprep.subr.bf16.mxu1 %v8816_v41  ;;  %v8873_v41 = vld [vmem:[#allocation11 + $0x304] ss:$16 sps:$4 sm:$0xff]  }
 0x3d2   :  { %6793 = vmatpush1.bf16.msra.mxu0 %v8811_v7  ;;  %v8876_v7 = vld [vmem:[#allocation11 + $0x30c] ss:$16 sps:$4 sm:$0xff]  }
 0x3d3   :  { %6794 = vmatprep.subr.bf16.mxu0 %v8819_v8  ;;  %v8874_v8 = vld [vmem:[#allocation11 + $0x308] ss:$16 sps:$4 sm:$0xff]  }
 0x3d4   :  { %6875 = vmatpush1.bf16.msra.mxu1 %v8814_v63  ;;  %v8871_v63 = vld [vmem:[#allocation11 + $0x300] ss:$16 sps:$4 sm:$0xff]  }
 0x3d5   :  { %6876 = vmatprep.subr.bf16.mxu1 %v8822_v42  ;;  %v8879_v42 = vld [vmem:[#allocation11 + $0x324] ss:$16 sps:$4 sm:$0xff]  }
 0x3d6   :  { %6795 = vmatpush1.bf16.msra.mxu0 %v8817_v58  ;;  %v8882_v58 = vld [vmem:[#allocation11 + $0x32c] ss:$16 sps:$4 sm:$0xff]  }
 0x3d7   :  { %6805 = vmatprep.subr.bf16.mxu0 %v8825_v45  ;;  %v8880_v45 = vld [vmem:[#allocation11 + $0x328] ss:$16 sps:$4 sm:$0xff]  }
 0x3d8   :  { %6877 = vmatpush1.bf16.msra.mxu1 %v8820_v44  ;;  %v8877_v44 = vld [vmem:[#allocation11 + $0x320] ss:$16 sps:$4 sm:$0xff]  }
 0x3d9   :  { %6887 = vmatprep.subr.bf16.mxu1 %v8828_v10  ;;  %v8885_v10 = vld [vmem:[#allocation11 + $0x344] ss:$16 sps:$4 sm:$0xff]  }
 0x46c   :  { %v5795_v9 = vpop.f32.mrb[32].mxu0 }
 0x46d   :  { %v8274_v50 = vadd.f32 %v5795_v9, %v4341_v49  ;;  %v5797_v54 = vpop.f32.mrb[33].mxu0  ;;  %v8888_v49 = vld [vmem:[#allocation11 + $0x34c] ss:$16 sps:$4 sm:$0xff]   ;;  %v8891_v9 = vld [vmem:[#allocation11 + $0x364] ss:$16 sps:$4 sm:$0xff]  }
 0x46e   :  { %v9535_v53 = vpop.f32.mrb[32].mxu1  ;;  %v8275_v16 = vadd.f32 %v5797_v54, %v4345_v33  ;;  %v5799_v61 = vpop.f32.mrb[34].mxu0  ;;  %v8883_v33 = vld [vmem:[#allocation11 + $0x340] ss:$16 sps:$4 sm:$0xff]  }
 0x46f   :  { %v5961_v56 = vpop.f32.mrb[33].mxu1  ;;  %v5966_v19 = vmax.f32 %v8274_v50, 0.0  ;;  %v5800_v55 = vpop.f32.mrb[35].mxu0  ;;  %v8894_v50 = vld [vmem:[#allocation11 + $0x36c] ss:$16 sps:$4 sm:$0xff]  }
 0x470   :  { %v8277_v34 = vadd.f32 %v5961_v56, %v4353_v43  ;;  %v5963_v52 = vpop.f32.mrb[34].mxu1  ;;  %v5967_v0 = vmax.f32 %v8275_v16, 0.0  ;;  %v8886_v43 = vld [vmem:[#allocation11 + $0x348] ss:$16 sps:$4 sm:$0xff]   ;;  %v8889_v54 = vld [vmem:[#allocation11 + $0x360] ss:$16 sps:$4 sm:$0xff]  }
 0x471   :  { %v5964_v20 = vpop.f32.mrb[35].mxu1  ;;  %v5970_v13 = vpack.c.bf16 %v5966_v19, %v5966_v19  ;;  %v8892_v16 = vld [vmem:[#allocation11 + $0x368] ss:$16 sps:$4 sm:$0xff]   ;;  %v8897_v56 = vld [vmem:[#allocation11 + $0x384] ss:$16 sps:$4 sm:$0xff]  }
 0x472   :  { %v5969_v1 = vmax.f32 %v8277_v34, 0.0  ;;  %v5971_v2 = vpack.c.bf16 %v5967_v0, %v5967_v0  ;;  %v8900_v61 = vld [vmem:[#allocation11 + $0x38c] ss:$16 sps:$4 sm:$0xff]   ;;  %v8895_v19 = vld [vmem:[#allocation11 + $0x380] ss:$16 sps:$4 sm:$0xff]  }
 0x473   :  { %v8898_v34 = vld [vmem:[#allocation11 + $0x388] ss:$16 sps:$4 sm:$0xff]   ;;  %v8903_v52 = vld [vmem:[#allocation11 + $0x3a4] ss:$16 sps:$4 sm:$0xff]   ;;  %v8906_v55 = vld [vmem:[#allocation11 + $0x3ac] ss:$16 sps:$4 sm:$0xff]  }
 0x474   :  { %6796 = vmatprep.mubr.bf16.mxu0 %v5971_v2  ;;  %6878 = vmatprep.mubr.bf16.mxu1 %v5971_v2  ;;  %v5973_v38 = vpack.c.bf16 %v5969_v1, %v5969_v1  ;;  %v8901_v0 = vld [vmem:[#allocation11 + $0x3a0] ss:$16 sps:$4 sm:$0xff]   ;;  %v8904_v20 = vld [vmem:[#allocation11 + $0x3a8] ss:$16 sps:$4 sm:$0xff]   ;;  %v4349_v1 = vrot.slane %v9527_v48, %v9501_v51  ;;  %v8909_v2 = vld [vmem:[#allocation11 + $0x3c4] ss:$16 sps:$4 sm:$0xff]  }
 0x475   :  { %6797 = vmatmul.mubr.bf16.vlgmr.msra.gmra.mrb[36].mxu0 %v5970_v13  ;;  %6879 = vmatmul.mubr.bf16.vlgmr.msra.gmra.mrb[36].mxu1 %v5970_v13  ;;  %v8910_v13 = vld [vmem:[#allocation11 + $0x3c8] ss:$16 sps:$4 sm:$0xff]  }
 0x476   :  { %6806 = vmatpush1.bf16.msra.mxu0 %v8823_v26  ;;  %6888 = vmatpush1.bf16.msra.mxu1 %v8826_v3  ;;  %v8912_v26 = vld [vmem:[#allocation11 + $0x3cc] ss:$16 sps:$4 sm:$0xff]   ;;  %v8907_v3 = vld [vmem:[#allocation11 + $0x3c0] ss:$16 sps:$4 sm:$0xff]   ;;  %v8919_v48 = vld [vmem:[#allocation14 + $0x40] sm:$0xff]  }
 0x477   :  { %6837 = vmatprep.mubr.bf16.mxu0 %v5973_v38  ;;  %6919 = vmatprep.mubr.bf16.mxu1 %v5973_v38  ;;  %v8918_v38 = vld [vmem:[#allocation11 + $0x3ec] ss:$16 sps:$4 sm:$0xff]  }
 0x478   :  { %6807 = vmatprep.subr.bf16.mxu0 %v8831_v30  ;;  %6889 = vmatprep.subr.bf16.mxu1 %v8834_v4  ;;  %v8276_v30 = vadd.f32 %v9535_v53, %v4349_v1  ;;  %v8915_v4 = vld [vmem:[#allocation11 + $0x3e4] ss:$16 sps:$4 sm:$0xff]   ;;  %v8923_v53 = vld [vmem:[#allocation14 + $0x48] sm:$0xff]  }
 0x47a   :  { %6808 = vmatpush1.bf16.msra.mxu0 %v8829_v5  ;;  %6890 = vmatpush1.bf16.msra.mxu1 %v8832_v6  ;;  %v8913_v5 = vld [vmem:[#allocation11 + $0x3e0] ss:$16 sps:$4 sm:$0xff]   ;;  %v8916_v6 = vld [vmem:[#allocation11 + $0x3e8] ss:$16 sps:$4 sm:$0xff]  }
 0x47b   :  { %6809 = vmatprep.subr.bf16.mxu0 %v8837_v11  ;;  %6891 = vmatprep.subr.bf16.mxu1 %v8840_v12  ;;  %v5968_v11 = vmax.f32 %v8276_v30, 0.0  ;;  %v8920_v12 = vld [vmem:[#allocation14 + $0xc0] sm:$0xff]  }
 0x47e   :  { %6810 = vmatpush1.bf16.msra.mxu0 %v8835_v57  ;;  %6892 = vmatpush1.bf16.msra.mxu1 %v8838_v14  ;;  %v8921_v57 = vld [vmem:[#allocation14] sm:$0xff]  }
 0x47f   :  { %6811 = vmatprep.subr.bf16.mxu0 %v8843_v31  ;;  %6893 = vmatprep.subr.bf16.mxu1 %v8846_v35  ;;  %v8922_v14 = vld [vmem:[#allocation14 + $0x80] sm:$0xff]   ;;  %v5972_v31 = vpack.c.bf16 %v5968_v11, %v5968_v11  ;;  %v8924_v35 = vld [vmem:[#allocation14 + $0xc8] sm:$0xff]  }
 0x482   :  { %6812 = vmatpush1.bf16.msra.mxu0 %v8841_v36  ;;  %6894 = vmatpush1.bf16.msra.mxu1 %v8844_v15  ;;  %v8925_v36 = vld [vmem:[#allocation14 + $0x8] sm:$0xff]  }
 0x483   :  { %6813 = vmatprep.subr.bf16.mxu0 %v8849_v27  ;;  %6895 = vmatprep.subr.bf16.mxu1 %v8852_v17  ;;  %v8926_v15 = vld [vmem:[#allocation14 + $0x88] sm:$0xff]   ;;  %v8927_v27 = vld [vmem:[#allocation14 + $0x50] sm:$0xff]  }
 0x484   :  { %v8928_v17 = vld [vmem:[#allocation14 + $0xd0] sm:$0xff]  }
 0x486   :  { %6814 = vmatpush1.bf16.msra.mxu0 %v8847_v18  ;;  %6896 = vmatpush1.bf16.msra.mxu1 %v8850_v23  ;;  %v8929_v18 = vld [vmem:[#allocation14 + $0x10] sm:$0xff]  }
 0x487   :  { %6815 = vmatprep.subr.bf16.mxu0 %v8855_v24  ;;  %6897 = vmatprep.subr.bf16.mxu1 %v8858_v25  ;;  %v8930_v23 = vld [vmem:[#allocation14 + $0x90] sm:$0xff]   ;;  %v8931_v24 = vld [vmem:[#allocation14 + $0x58] sm:$0xff]  }
 0x488   :  { %v8932_v25 = vld [vmem:[#allocation14 + $0xd8] sm:$0xff]  }
 0x48a   :  { %6816 = vmatpush1.bf16.msra.mxu0 %v8853_v28  ;;  %6898 = vmatpush1.bf16.msra.mxu1 %v8856_v21  ;;  %v8933_v28 = vld [vmem:[#allocation14 + $0x18] sm:$0xff]  }
 0x48b   :  { %6817 = vmatprep.subr.bf16.mxu0 %v8861_v29  ;;  %6899 = vmatprep.subr.bf16.mxu1 %v8864_v22  ;;  %v8934_v21 = vld [vmem:[#allocation14 + $0x98] sm:$0xff]   ;;  %v8935_v29 = vld [vmem:[#allocation14 + $0x60] sm:$0xff]  }
 0x48c   :  { %v8936_v22 = vld [vmem:[#allocation14 + $0xe0] sm:$0xff]  }
 0x48e   :  { %6818 = vmatpush1.bf16.msra.mxu0 %v8859_v46  ;;  %6900 = vmatpush1.bf16.msra.mxu1 %v8862_v47  ;;  %v8937_v46 = vld [vmem:[#allocation14 + $0x20] sm:$0xff]  }
 0x48f   :  { %6819 = vmatprep.subr.bf16.mxu0 %v8867_v37  ;;  %6901 = vmatprep.subr.bf16.mxu1 %v8870_v39  ;;  %v8938_v47 = vld [vmem:[#allocation14 + $0xa0] sm:$0xff]   ;;  %v8939_v37 = vld [vmem:[#allocation14 + $0x68] sm:$0xff]  }
 0x490   :  { %v8940_v39 = vld [vmem:[#allocation14 + $0xe8] sm:$0xff]  }
 0x492   :  { %6820 = vmatpush1.bf16.msra.mxu0 %v8865_v59  ;;  %6902 = vmatpush1.bf16.msra.mxu1 %v8868_v40  ;;  %v8941_v59 = vld [vmem:[#allocation14 + $0x28] sm:$0xff]  }
 0x493   :  { %6821 = vmatprep.subr.bf16.mxu0 %v8873_v41  ;;  %6903 = vmatprep.subr.bf16.mxu1 %v8876_v7  ;;  %v8942_v40 = vld [vmem:[#allocation14 + $0xa8] sm:$0xff]   ;;  %v8943_v41 = vld [vmem:[#allocation14 + $0x70] sm:$0xff]  }
 0x494   :  { %v8944_v7 = vld [vmem:[#allocation14 + $0xf0] sm:$0xff]  }
 0x496   :  { %6822 = vmatpush1.bf16.msra.mxu0 %v8871_v63  ;;  %6904 = vmatpush1.bf16.msra.mxu1 %v8874_v8  ;;  %v8945_v63 = vld [vmem:[#allocation14 + $0x30] sm:$0xff]  }
 0x497   :  { %6823 = vmatprep.subr.bf16.mxu0 %v8879_v42  ;;  %6905 = vmatprep.subr.bf16.mxu1 %v8882_v58  ;;  %v8946_v8 = vld [vmem:[#allocation14 + $0xb0] sm:$0xff]   ;;  %v8947_v42 = vld [vmem:[#allocation14 + $0x78] sm:$0xff]  }
 0x498   :  { %v8948_v58 = vld [vmem:[#allocation14 + $0xf8] sm:$0xff]  }
 0x49a   :  { %6824 = vmatpush1.bf16.msra.mxu0 %v8877_v44  ;;  %6906 = vmatpush1.bf16.msra.mxu1 %v8880_v45  ;;  %v8949_v44 = vld [vmem:[#allocation14 + $0x38] sm:$0xff]  }
 0x49b   :  { %6825 = vmatprep.subr.bf16.mxu0 %v8885_v10  ;;  %6907 = vmatprep.subr.bf16.mxu1 %v8888_v49  ;;  %v8950_v45 = vld [vmem:[#allocation14 + $0xb8] sm:$0xff]  }
 0x49c   :  { %v6102_v10 = vld [vmem:[#allocation12] sm:$0xf] }
 0x49d   :  { %v6107_v49 = vrot.slane %v6102_v10, %v9483_v60 }
 0x49e   :  { %6826 = vmatpush1.bf16.msra.mxu0 %v8883_v33  ;;  %6908 = vmatpush1.bf16.msra.mxu1 %v8886_v43  ;;  %v6115_v33 = vrot.slane %v6102_v10, %v9501_v51  ;;  %v6111_v43 = vrot.slane %v6102_v10, %v9469_v32 }
 0x49f   :  { %6827 = vmatprep.subr.bf16.mxu0 %v8891_v9  ;;  %6909 = vmatprep.subr.bf16.mxu1 %v8894_v50  ;;  %v6119_v9 = vrot.slane %v6102_v10, %v9486_v62 }
 0x4a2   :  { %6828 = vmatpush1.bf16.msra.mxu0 %v8889_v54  ;;  %6910 = vmatpush1.bf16.msra.mxu1 %v8892_v16 }
 0x4a3   :  { %6829 = vmatprep.subr.bf16.mxu0 %v8897_v56  ;;  %6911 = vmatprep.subr.bf16.mxu1 %v8900_v61 }
 0x4a6   :  { %6830 = vmatpush1.bf16.msra.mxu0 %v8895_v19  ;;  %6912 = vmatpush1.bf16.msra.mxu1 %v8898_v34 }
 0x4a7   :  { %6831 = vmatprep.subr.bf16.mxu0 %v8903_v52  ;;  %6913 = vmatprep.subr.bf16.mxu1 %v8906_v55 }
 0x4aa   :  { %6832 = vmatpush1.bf16.msra.mxu0 %v8901_v0  ;;  %6914 = vmatpush1.bf16.msra.mxu1 %v8904_v20 }
 0x4ab   :  { %6833 = vmatprep.subr.bf16.mxu0 %v8909_v2  ;;  %6915 = vmatprep.subr.bf16.mxu1 %v8912_v26 }
 0x4ae   :  { %6834 = vmatpush1.bf16.msra.mxu0 %v8907_v3  ;;  %6916 = vmatpush1.bf16.msra.mxu1 %v8910_v13 }
 0x4af   :  { %6835 = vmatprep.subr.bf16.mxu0 %v8915_v4  ;;  %6917 = vmatprep.subr.bf16.mxu1 %v8918_v38  ;;  %v8197_v38 = vld [vmem:[#allocation15] ss:$0 sm:$0xff] }
 0x4b2   :  { %6836 = vmatpush1.bf16.msra.mxu0 %v8913_v5  ;;  %6918 = vmatpush1.bf16.msra.mxu1 %v8916_v6 }
 0x4b3   :  { %8230 = vmatprep.subr.bf16.mxu0 %v8919_v48  ;;  %8252 = vmatprep.subr.bf16.mxu1 %v8920_v12 }
 0x4b5   :  { %6838 = vmatmul.mubr.bf16.vlgmr.msra.gmra.mrb[36].mxu0 %v5972_v31  ;;  %6920 = vmatmul.mubr.bf16.vlgmr.msra.gmra.mrb[36].mxu1 %v5972_v31 }
 0x4b6   :  { %8231 = vmatpush3.bf16.msra.mxu0 %v8921_v57  ;;  %8253 = vmatpush3.bf16.msra.mxu1 %v8922_v14 }
 0x4b7   :  { %8232 = vmatprep.subr.bf16.mxu0 %v8923_v53  ;;  %8254 = vmatprep.subr.bf16.mxu1 %v8924_v35 }
 0x4ba   :  { %8233 = vmatpush3.bf16.msra.mxu0 %v8925_v36  ;;  %8255 = vmatpush3.bf16.msra.mxu1 %v8926_v15 }
 0x4bb   :  { %8234 = vmatprep.subr.bf16.mxu0 %v8927_v27  ;;  %8256 = vmatprep.subr.bf16.mxu1 %v8928_v17 }
 0x4be   :  { %8235 = vmatpush3.bf16.msra.mxu0 %v8929_v18  ;;  %8257 = vmatpush3.bf16.msra.mxu1 %v8930_v23 }
 0x4bf   :  { %8236 = vmatprep.subr.bf16.mxu0 %v8931_v24  ;;  %8258 = vmatprep.subr.bf16.mxu1 %v8932_v25 }
 0x4c2   :  { %8237 = vmatpush3.bf16.msra.mxu0 %v8933_v28  ;;  %8259 = vmatpush3.bf16.msra.mxu1 %v8934_v21 }
 0x4c3   :  { %8238 = vmatprep.subr.bf16.mxu0 %v8935_v29  ;;  %8260 = vmatprep.subr.bf16.mxu1 %v8936_v22 }
 0x4c6   :  { %8239 = vmatpush3.bf16.msra.mxu0 %v8937_v46  ;;  %8261 = vmatpush3.bf16.msra.mxu1 %v8938_v47 }
 0x4c7   :  { %8240 = vmatprep.subr.bf16.mxu0 %v8939_v37  ;;  %8262 = vmatprep.subr.bf16.mxu1 %v8940_v39 }
 0x4ca   :  { %8241 = vmatpush3.bf16.msra.mxu0 %v8941_v59  ;;  %8263 = vmatpush3.bf16.msra.mxu1 %v8942_v40 }
 0x4cb   :  { %8242 = vmatprep.subr.bf16.mxu0 %v8943_v41  ;;  %8264 = vmatprep.subr.bf16.mxu1 %v8944_v7 }
 0x4ce   :  { %8243 = vmatpush3.bf16.msra.mxu0 %v8945_v63  ;;  %8265 = vmatpush3.bf16.msra.mxu1 %v8946_v8 }
 0x4cf   :  { %8244 = vmatprep.subr.bf16.mxu0 %v8947_v42  ;;  %8266 = vmatprep.subr.bf16.mxu1 %v8948_v58 }
 0x4d2   :  { %8245 = vmatpush3.bf16.msra.mxu0 %v8949_v44  ;;  %8267 = vmatpush3.bf16.msra.mxu1 %v8950_v45 }
 0x588   :  { %v6839_v50 = vpop.f32.mrb[36].mxu0  ;;  %v6921_v54 = vpop.f32.mrb[36].mxu1 }
 0x589   :  { %v8278_v16 = vadd.f32 %v6839_v50, %v6107_v49  ;;  %v8280_v56 = vadd.f32 %v6921_v54, %v6115_v33  ;;  %v6841_v61 = vpop.f32.mrb[37].mxu0  ;;  %v6923_v19 = vpop.f32.mrb[37].mxu1 }
 0x58a   :  { %v8279_v34 = vadd.f32 %v6841_v61, %v6111_v43  ;;  %v8281_v52 = vadd.f32 %v6923_v19, %v6119_v9  ;;  %v6843_v55 = vpop.f32.mrb[38].mxu0  ;;  %v6925_v0 = vpop.f32.mrb[38].mxu1 }
 0x58b   :  { %v6928_v20 = vmax.f32 %v8278_v16, 0.0  ;;  %v6930_v1 = vmax.f32 %v8280_v56, 0.0  ;;  %v6844_v2 = vpop.f32.mrb[39].mxu0  ;;  %v6926_v60 = vpop.f32.mrb[39].mxu1 }
 0x58c   :  { %v6929_v26 = vmax.f32 %v8279_v34, 0.0  ;;  %v6931_v51 = vmax.f32 %v8281_v52, 0.0 }
 0x58d   :  { %v6932_v13 = vpack.c.bf16 %v6928_v20, %v6928_v20  ;;  %v6934_v62 = vpack.c.bf16 %v6930_v1, %v6930_v1 }
 0x58e   :  { %v6933_v3 = vpack.c.bf16 %v6929_v26, %v6929_v26  ;;  %v6935_v32 = vpack.c.bf16 %v6931_v51, %v6931_v51 }
 0x590   :  { %7231 = vmatprep.mubr.bf16.mxu0 %v6933_v3  ;;  %7271 = vmatprep.mubr.bf16.mxu1 %v6935_v32 }
 0x591   :  { %7232 = vmatmul.mubr.bf16.vlgmr.msra.gmra.mrb[40].mxu0 %v6932_v13  ;;  %7272 = vmatmul.mubr.bf16.vlgmr.msra.gmra.mrb[40].mxu1 %v6934_v62 }
 0x664   :  { %v8246_v30 = vpop.f32.mrb[40].mxu0  ;;  %v8268_v4 = vpop.f32.mrb[40].mxu1 }
 0x665   :  { %v8247_v5 = vpop.f32.mrb[41].mxu0  ;;  %v8269_v6 = vpop.f32.mrb[41].mxu1 }
 0x666   :  { %v8248_v11 = vadd.f32 %v8247_v5, %v8246_v30  ;;  %v8270_v48 = vadd.f32 %v8269_v6, %v8268_v4  ;;  %v8249_v12 = vpop.f32.mrb[42].mxu0  ;;  %v8271_v57 = vpop.f32.mrb[42].mxu1 }
 0x667   :  { %v8250_v14 = vpop.f32.mrb[43].mxu0  ;;  %v8272_v31 = vpop.f32.mrb[43].mxu1 }
 0x668   :  { %v7234_v53 = vadd.f32 %v8248_v11, %v8197_v38 }
 0x66a   :  { %v7274_v35 = vadd.f32 %v8270_v48, %v7234_v53 }
 0x66c   :  { %7279 = vst [vmem:[#allocation17] sm:$0xff] %v7274_v35 }
 0x66d   :  { %7284 = vsyncadd [#allocation5], 96  ;;  %s9177_s0 = smov [#allocation17]  }
 0x66e   :  { %s7285_s26 = sshll.u32 %s9177_s0, 4  ;;  %s7286_s26 = int_to_ptr.vmem [resolvable:$true] %s7285_s26 }
 0x66f   :  { %s9128_s27 = scalar_lea.vmem %s7286_s26, 32  ;;  %s9132_s29 = scalar_lea.vmem %s7286_s26, 128 }
 0x670   :  { %p9129_p8 = scmp.ne.s32.totalorder %s7286_s26, %s9128_s27  ;;  %p9133_p9 = scmp.lt.s32.totalorder %s7286_s26, %s7286_s26 }
 0x671   :  { %p9134_p10 = scmp.lt.s32.totalorder %s9132_s29, %s9128_s27 }
 0x673   :  { %p9135_p11 = por %p9134_p10, %p9133_p9 }
 0x675   :  { %p9136_p12 = pnand %p9135_p11, %p9129_p8 }
 0x677   :  { %9139 = shalt.err (!%p9136_p12)
}
 0x678   :  { %s9140_s6 = scalar_lea.hbm %s9567_s9, 32 }
 0x679   :  { %p9141_p13 = scmp.ne.s32.totalorder %s9567_s9, %s9140_s6  ;;  %p9144_p0 = scmp.lt.u32.totalorder %s9140_s6, %s9567_s9 }
 0x67b   :  { %p9146_p1 = pnand %p9144_p0, %p9141_p13 }
 0x67d   :  { %9149 = shalt.err (!%p9146_p1)
}
 0x67e   :  { %s9178_s28 = smov 2  }
 0x67f   :  { %7291 = dma.vmem_to_hbm [thread:$0]  %s7286_s26, 32, %s9567_s9, [#allocation5], %s9167_s10, %s9167_s10, %s9178_s28  }
 0x680   :  { %9160 = dma.done.wait [#allocation5], 128  }
 0x681   :  { %9161 = vsyncadd [#allocation5], 4294967168 }
 0x682   :  { %7295 = vsyncpa [#allocation4], 1 }
 0x683   :  { %7296 = vsyncpa [#allocation7], 1 }
 0x684   :  { %7297 = vsyncpa [#allocation10], 1 }
 0x685   :  { %7298 = vsyncpa [#allocation13], 1 }
 0x686   :  { %7299 = vsyncpa [#allocation16], 1 }
 0x687   :  { %7300 = vsyncpa [#allocation5], 1 }

</bundles_post_ra>
